<compile_context>
chip_gen: v5e
topology: v5e:2x2
jax: 0.10.0
libtpu: 0.0.40
codegen_flags: <defaults>
</compile_context>

<pallas_src>
import jax
import jax.numpy as jnp
from jax.experimental import pallas as pl
from jax.experimental.pallas import tpu as pltpu

EPS = 1e-5  # torch BatchNorm2d default


def make_cnn_kernel(N, H, W):
    """Fused kernel for the flat lane-dense layout p = h*(N*W) + n*W + w."""
    NW = N * W
    L = H * NW
    Lout = (H - 4) * NW                       # only valid-h rows are stored
    inv1 = 1.0 / float(N * (H - 1) * (W - 1))  # conv1-valid positions
    inv2 = 1.0 / float(N * (H - 3) * (W - 3))  # conv2-valid positions
    SH1 = L - 1                                # roll-left by 1 lane  (w+1)
    SHN = L - NW                               # roll-left by NW lanes (h+1)

    def taps(a):
        # Shared rotations: one unaligned lane rotate, two vreg-aligned ones.
        a01 = pltpu.roll(a, SH1, axis=1)       # (h, w+1)
        a10 = pltpu.roll(a, SHN, axis=1)       # (h+1, w)
        a11 = pltpu.roll(a01, SHN, axis=1)     # (h+1, w+1)
        return a01, a10, a11

    def bn_relu(y, m, inv, gamma, beta):
        # One-pass masked batch moments; invalid lanes are don't-care downstream.
        ym = y * m
        s1 = jnp.sum(ym, axis=1, keepdims=True)
        s2 = jnp.sum(ym * y, axis=1, keepdims=True)
        mean = s1 * inv
        var = s2 * inv - mean * mean
        scale = gamma * jax.lax.rsqrt(var + EPS)
        shift = beta - mean * scale
        return jnp.maximum(ym * scale + shift, 0.0)

    def kernel(d_ref, p1_ref, w2_ref, p2_ref, o_ref):
        # d_ref rows: 0..3 = the 4 conv1 taps of x, 4 = mask1, 5 = mask2.
        m1 = d_ref[4:5, :]                     # (1, L)
        m2 = d_ref[5:6, :]

        # ---- conv1: 1 -> C1, 2x2 — single small MXU dot (bias absorbed by BN)
        y1 = jnp.dot(p1_ref[:, 0:4], d_ref[0:4, :],
                     preferred_element_type=jnp.float32)          # (C1, L)
        z1 = bn_relu(y1, m1, inv1, p1_ref[:, 4:5], p1_ref[:, 5:6])

        # ---- MaxPool 2x2, stride 1 --------------------------------------
        z01, z10, z11 = taps(z1)
        p1 = jnp.maximum(jnp.maximum(z1, z01), jnp.maximum(z10, z11))

        # ---- conv2: C1 -> C2, 2x2 — taps stacked along K, ONE bf16 MXU dot
        p01, p10, p11 = taps(p1)
        rhs = jnp.concatenate([p1, p01, p10, p11], axis=0).astype(jnp.bfloat16)
        y2 = jnp.dot(w2_ref[...], rhs,
                     preferred_element_type=jnp.float32)          # (C2, L)
        z2 = bn_relu(y2, m2, inv2, p2_ref[:, 0:1], p2_ref[:, 1:2])

        # ---- MaxPool 2x2, stride 1; store only the valid-h rows ----------
        q01, q10, q11 = taps(z2)
        p2 = jnp.maximum(jnp.maximum(z2, q01), jnp.maximum(q10, q11))
        o_ref[...] = p2[:, :Lout]                                 # wide store

    return kernel, L, Lout


@jax.jit
def cnn_forward(x5, params):
    """x5: (B, T, 1, H, W) float32 — mirrors the torch 5-D input."""
    B, T, C, H, W = x5.shape
    assert C == 1
    N = B * T
    NW = N * W
    L = H * NW

    c1 = params["w1"].shape[0]   # 16
    c2 = params["w2"].shape[0]   # 32

    # ---- layout plumbing: flat index p = h*NW + n*W + w, big dim on lanes ----
    x = x5.reshape(N, H, W).astype(jnp.float32)
    xflat = jnp.transpose(x, (1, 0, 2)).reshape(L)

    pos = jnp.arange(L, dtype=jnp.int32)
    h_idx = pos // NW
    w_idx = pos % W
    m1 = ((h_idx < H - 1) & (w_idx < W - 1)).astype(jnp.float32)  # BN1 stats mask
    m2 = ((h_idx < H - 3) & (w_idx < W - 3)).astype(jnp.float32)  # BN2 stats mask

    # Pack input + its 4 conv1 taps + masks into ONE DMA. (Wrapped lanes of the
    # rolls never feed valid outputs or stats — they are masked/cropped away.)
    data = jnp.stack([xflat,
                      jnp.roll(xflat, -1),
                      jnp.roll(xflat, -NW),
                      jnp.roll(xflat, -(NW + 1)),
                      m1, m2], axis=0)                            # (6, L)

    # Per-channel params, packed. Conv biases b1/b2 are intentionally dropped:
    # a per-channel bias before training-mode BatchNorm is absorbed by the mean.
    p1pk = jnp.concatenate([params["w1"].reshape(c1, 4),
                            params["gamma1"].reshape(c1, 1),
                            params["beta1"].reshape(c1, 1)],
                           axis=1).astype(jnp.float32)            # (c1, 6)
    # w2 stacked along K: column index = t*c1 + cin with t = dh*2 + dw.
    w2s = jnp.transpose(params["w2"], (0, 2, 3, 1)).reshape(c2, 4 * c1)
    w2s = w2s.astype(jnp.bfloat16)                                # (c2, 4*c1)
    p2pk = jnp.concatenate([params["gamma2"].reshape(c2, 1),
                            params["beta2"].reshape(c2, 1)],
                           axis=1).astype(jnp.float32)            # (c2, 2)

    kernel, _, Lout = make_cnn_kernel(N, H, W)
    args = (data, p1pk, w2s, p2pk)

    p2 = pl.pallas_call(
        kernel,
        out_shape=jax.ShapeDtypeStruct((c2, Lout), jnp.float32),
        grid=(1,),
        in_specs=[pl.BlockSpec(a.shape, lambda i: (0, 0)) for a in args],
        out_specs=pl.BlockSpec((c2, Lout), lambda i: (0, 0)),
        compiler_params=pltpu.CompilerParams(dimension_semantics=("arbitrary",)),
    )(*args)

    # Crop the remaining w dimension and flatten channel-major (torch NCHW view).
    Ho, Wo = H - 4, W - 4
    p2 = p2.reshape(c2, Ho, N, W)[:, :, :, :Wo]                   # (C2, Ho, N, Wo)
    out = jnp.transpose(p2, (2, 0, 1, 3)).reshape(B, T, c2 * Ho * Wo)
    return out


def cnn_reference(x5, params):
    """Independent plain-JAX/XLA reference (training-mode BN, stride-1 pools)."""
    B, T, C, H, W = x5.shape
    x = x5.reshape(B * T, C, H, W).astype(jnp.float32)

    def conv(x, w, b):
        y = jax.lax.conv_general_dilated(
            x, w, window_strides=(1, 1), padding="VALID",
            dimension_numbers=("NCHW", "OIHW", "NCHW"))
        return y + b[None, :, None, None]

    def bn_relu(y, gamma, beta):
        mean = jnp.mean(y, axis=(0, 2, 3), keepdims=True)
        var = jnp.var(y, axis=(0, 2, 3), keepdims=True)
        yn = (y - mean) * jax.lax.rsqrt(var + EPS)
        return jnp.maximum(gamma[None, :, None, None] * yn + beta[None, :, None, None], 0.0)

    def pool(y):
        return jax.lax.reduce_window(y, -jnp.inf, jax.lax.max,
                                     (1, 1, 2, 2), (1, 1, 1, 1), "VALID")

    y = pool(bn_relu(conv(x, params["w1"], params["b1"]),
                     params["gamma1"], params["beta1"]))
    y = pool(bn_relu(conv(y, params["w2"], params["b2"]),
                     params["gamma2"], params["beta2"]))
    return y.reshape(B, T, -1)


def init_params(key):
    k1, k2, k3, k4, k5, k6 = jax.random.split(key, 6)
    return {
        "w1": 0.1 * jax.random.normal(k1, (16, 1, 2, 2), jnp.float32),
        "b1": 0.1 * jax.random.normal(k2, (16,), jnp.float32),
        "w2": 0.05 * jax.random.normal(k3, (32, 16, 2, 2), jnp.float32),
        "b2": 0.05 * jax.random.normal(k4, (32,), jnp.float32),
        "gamma1": 1.0 + 0.1 * jax.random.normal(k5, (16,), jnp.float32),
        "beta1": jnp.zeros((16,), jnp.float32),
        "gamma2": 1.0 + 0.1 * jax.random.normal(k6, (32,), jnp.float32),
        "beta2": jnp.zeros((32,), jnp.float32),
    }


if __name__ == "__main__":
    key = jax.random.PRNGKey(0)
    kx, kp = jax.random.split(key)
    B, T, C, H, W = 2, 4, 1, 16, 16
    x5 = jax.random.normal(kx, (B, T, C, H, W), jnp.float32)
    params = init_params(kp)

    out = jax.block_until_ready(cnn_forward(x5, params))
    assert out.shape == (B, T, 32 * (H - 4) * (W - 4)), out.shape  # (2, 4, 4608)

    # Loose-tolerance self-check (conv2 runs in bf16 on the MXU).
    ref = jax.block_until_ready(cnn_reference(x5, params))
    max_err = float(jnp.max(jnp.abs(out - ref)))
    assert max_err < 0.1, f"max abs error vs reference: {max_err}"
    print("KERNEL_OK")
</pallas_src>

<mosaic_0001>
module attributes {stable_mosaic.version = 11 : i64} {
  func.func @kernel(%arg0: i32, %arg1: memref<6x2048xf32, #tpu.memory_space<vmem>>, %arg2: memref<16x6xf32, #tpu.memory_space<vmem>>, %arg3: memref<32x64xbf16, #tpu.memory_space<vmem>>, %arg4: memref<32x2xf32, #tpu.memory_space<vmem>>, %arg5: memref<32x1536xf32, #tpu.memory_space<vmem>>) attributes {dimension_semantics = [#tpu.dimension_semantics<arbitrary>], iteration_bounds = array<i64: 1>, scalar_prefetch = 0 : i64, scratch_operands = 0 : i64, tpu.core_type = #tpu.core_type<tc>, window_params = [{pipeline_mode = #tpu.pipeline_mode<synchronous>, transform_indices = @transform_0, window_bounds = array<i64: 6, 2048>}, {pipeline_mode = #tpu.pipeline_mode<synchronous>, transform_indices = @transform_1, window_bounds = array<i64: 16, 6>}, {pipeline_mode = #tpu.pipeline_mode<synchronous>, transform_indices = @transform_2, window_bounds = array<i64: 32, 64>}, {pipeline_mode = #tpu.pipeline_mode<synchronous>, transform_indices = @transform_3, window_bounds = array<i64: 32, 2>}, {pipeline_mode = #tpu.pipeline_mode<synchronous>, transform_indices = @transform_4, window_bounds = array<i64: 32, 1536>}]} {
    %c4 = arith.constant 4 : index
    %c0 = arith.constant 0 : index
    %0 = vector.load %arg1[%c4, %c0] : memref<6x2048xf32, #tpu.memory_space<vmem>>, vector<1x2048xf32>
    %c5 = arith.constant 5 : index
    %c0_0 = arith.constant 0 : index
    %1 = vector.load %arg1[%c5, %c0_0] : memref<6x2048xf32, #tpu.memory_space<vmem>>, vector<1x2048xf32>
    %c0_1 = arith.constant 0 : index
    %c0_2 = arith.constant 0 : index
    %2 = vector.load %arg2[%c0_1, %c0_2] : memref<16x6xf32, #tpu.memory_space<vmem>>, vector<16x4xf32>
    %c0_3 = arith.constant 0 : index
    %c0_4 = arith.constant 0 : index
    %3 = vector.load %arg1[%c0_3, %c0_4] : memref<6x2048xf32, #tpu.memory_space<vmem>>, vector<4x2048xf32>
    %cst = arith.constant dense<0.000000e+00> : vector<16x2048xf32>
    %4 = tpu.matmul %2, %3, %cst {dimension_numbers = #tpu.dot_dimension_numbers<[1], [0], [0], [1], [0, 0, 1, 1], [], []>} : vector<16x4xf32>, vector<4x2048xf32>, vector<16x2048xf32> -> vector<16x2048xf32>
    %c0_5 = arith.constant 0 : index
    %c4_6 = arith.constant 4 : index
    %5 = vector.load %arg2[%c0_5, %c4_6] : memref<16x6xf32, #tpu.memory_space<vmem>>, vector<16x1xf32>
    %c0_7 = arith.constant 0 : index
    %c5_8 = arith.constant 5 : index
    %6 = vector.load %arg2[%c0_7, %c5_8] : memref<16x6xf32, #tpu.memory_space<vmem>>, vector<16x1xf32>
    %7 = vector.broadcast %0 : vector<1x2048xf32> to vector<16x2048xf32>
    %8 = arith.mulf %4, %7 : vector<16x2048xf32>
    %cst_9 = arith.constant dense<0.000000e+00> : vector<16xf32>
    %9 = vector.multi_reduction <add>, %8, %cst_9 [1] : vector<16x2048xf32> to vector<16xf32>
    %10 = vector.shape_cast %9 : vector<16xf32> to vector<16x1xf32>
    %11 = arith.mulf %8, %4 : vector<16x2048xf32>
    %cst_10 = arith.constant dense<0.000000e+00> : vector<16xf32>
    %12 = vector.multi_reduction <add>, %11, %cst_10 [1] : vector<16x2048xf32> to vector<16xf32>
    %13 = vector.shape_cast %12 : vector<16xf32> to vector<16x1xf32>
    %cst_11 = arith.constant 5.55555569E-4 : f32
    %14 = vector.broadcast %cst_11 : f32 to vector<16x1xf32>
    %15 = arith.mulf %10, %14 : vector<16x1xf32>
    %cst_12 = arith.constant 5.55555569E-4 : f32
    %16 = vector.broadcast %cst_12 : f32 to vector<16x1xf32>
    %17 = arith.mulf %13, %16 : vector<16x1xf32>
    %18 = arith.mulf %15, %15 : vector<16x1xf32>
    %19 = arith.subf %17, %18 : vector<16x1xf32>
    %cst_13 = arith.constant 9.99999974E-6 : f32
    %20 = vector.broadcast %cst_13 : f32 to vector<16x1xf32>
    %21 = arith.addf %19, %20 : vector<16x1xf32>
    %22 = math.rsqrt %21 : vector<16x1xf32>
    %23 = arith.mulf %5, %22 : vector<16x1xf32>
    %24 = arith.mulf %15, %23 : vector<16x1xf32>
    %25 = arith.subf %6, %24 : vector<16x1xf32>
    %26 = vector.broadcast %23 : vector<16x1xf32> to vector<16x2048xf32>
    %27 = arith.mulf %8, %26 : vector<16x2048xf32>
    %28 = vector.broadcast %25 : vector<16x1xf32> to vector<16x2048xf32>
    %29 = arith.addf %27, %28 : vector<16x2048xf32>
    %cst_14 = arith.constant 0.000000e+00 : f32
    %30 = vector.broadcast %cst_14 : f32 to vector<16x2048xf32>
    %31 = arith.maximumf %29, %30 : vector<16x2048xf32>
    %c2047_i32 = arith.constant 2047 : i32
    %32 = tpu.dynamic_rotate %31 by %c2047_i32 dim 1 : vector<16x2048xf32>, i32 -> vector<16x2048xf32>
    %c1920_i32 = arith.constant 1920 : i32
    %33 = tpu.dynamic_rotate %31 by %c1920_i32 dim 1 : vector<16x2048xf32>, i32 -> vector<16x2048xf32>
    %c1920_i32_15 = arith.constant 1920 : i32
    %34 = tpu.dynamic_rotate %32 by %c1920_i32_15 dim 1 : vector<16x2048xf32>, i32 -> vector<16x2048xf32>
    %35 = arith.maximumf %31, %32 : vector<16x2048xf32>
    %36 = arith.maximumf %33, %34 : vector<16x2048xf32>
    %37 = arith.maximumf %35, %36 : vector<16x2048xf32>
    %c2047_i32_16 = arith.constant 2047 : i32
    %38 = tpu.dynamic_rotate %37 by %c2047_i32_16 dim 1 : vector<16x2048xf32>, i32 -> vector<16x2048xf32>
    %c1920_i32_17 = arith.constant 1920 : i32
    %39 = tpu.dynamic_rotate %37 by %c1920_i32_17 dim 1 : vector<16x2048xf32>, i32 -> vector<16x2048xf32>
    %c1920_i32_18 = arith.constant 1920 : i32
    %40 = tpu.dynamic_rotate %38 by %c1920_i32_18 dim 1 : vector<16x2048xf32>, i32 -> vector<16x2048xf32>
    %41 = tpu.concatenate %37, %38, %39, %40 in 0 : vector<16x2048xf32>, vector<16x2048xf32>, vector<16x2048xf32>, vector<16x2048xf32> -> vector<64x2048xf32>
    %42 = arith.truncf %41 : vector<64x2048xf32> to vector<64x2048xbf16>
    %c0_19 = arith.constant 0 : index
    %c0_20 = arith.constant 0 : index
    %43 = vector.load %arg3[%c0_19, %c0_20] : memref<32x64xbf16, #tpu.memory_space<vmem>>, vector<32x64xbf16>
    %cst_21 = arith.constant dense<0.000000e+00> : vector<32x2048xf32>
    %44 = tpu.matmul %43, %42, %cst_21 {dimension_numbers = #tpu.dot_dimension_numbers<[1], [0], [0], [1], [0, 0, 1, 1], [], []>} : vector<32x64xbf16>, vector<64x2048xbf16>, vector<32x2048xf32> -> vector<32x2048xf32>
    %c0_22 = arith.constant 0 : index
    %c0_23 = arith.constant 0 : index
    %45 = vector.load %arg4[%c0_22, %c0_23] : memref<32x2xf32, #tpu.memory_space<vmem>>, vector<32x1xf32>
    %c0_24 = arith.constant 0 : index
    %c1 = arith.constant 1 : index
    %46 = vector.load %arg4[%c0_24, %c1] : memref<32x2xf32, #tpu.memory_space<vmem>>, vector<32x1xf32>
    %47 = vector.broadcast %1 : vector<1x2048xf32> to vector<32x2048xf32>
    %48 = arith.mulf %44, %47 : vector<32x2048xf32>
    %cst_25 = arith.constant dense<0.000000e+00> : vector<32xf32>
    %49 = vector.multi_reduction <add>, %48, %cst_25 [1] : vector<32x2048xf32> to vector<32xf32>
    %50 = vector.shape_cast %49 : vector<32xf32> to vector<32x1xf32>
    %51 = arith.mulf %48, %44 : vector<32x2048xf32>
    %cst_26 = arith.constant dense<0.000000e+00> : vector<32xf32>
    %52 = vector.multi_reduction <add>, %51, %cst_26 [1] : vector<32x2048xf32> to vector<32xf32>
    %53 = vector.shape_cast %52 : vector<32xf32> to vector<32x1xf32>
    %cst_27 = arith.constant 7.396450e-04 : f32
    %54 = vector.broadcast %cst_27 : f32 to vector<32x1xf32>
    %55 = arith.mulf %50, %54 : vector<32x1xf32>
    %cst_28 = arith.constant 7.396450e-04 : f32
    %56 = vector.broadcast %cst_28 : f32 to vector<32x1xf32>
    %57 = arith.mulf %53, %56 : vector<32x1xf32>
    %58 = arith.mulf %55, %55 : vector<32x1xf32>
    %59 = arith.subf %57, %58 : vector<32x1xf32>
    %cst_29 = arith.constant 9.99999974E-6 : f32
    %60 = vector.broadcast %cst_29 : f32 to vector<32x1xf32>
    %61 = arith.addf %59, %60 : vector<32x1xf32>
    %62 = math.rsqrt %61 : vector<32x1xf32>
    %63 = arith.mulf %45, %62 : vector<32x1xf32>
    %64 = arith.mulf %55, %63 : vector<32x1xf32>
    %65 = arith.subf %46, %64 : vector<32x1xf32>
    %66 = vector.broadcast %63 : vector<32x1xf32> to vector<32x2048xf32>
    %67 = arith.mulf %48, %66 : vector<32x2048xf32>
    %68 = vector.broadcast %65 : vector<32x1xf32> to vector<32x2048xf32>
    %69 = arith.addf %67, %68 : vector<32x2048xf32>
    %cst_30 = arith.constant 0.000000e+00 : f32
    %70 = vector.broadcast %cst_30 : f32 to vector<32x2048xf32>
    %71 = arith.maximumf %69, %70 : vector<32x2048xf32>
    %c2047_i32_31 = arith.constant 2047 : i32
    %72 = tpu.dynamic_rotate %71 by %c2047_i32_31 dim 1 : vector<32x2048xf32>, i32 -> vector<32x2048xf32>
    %c1920_i32_32 = arith.constant 1920 : i32
    %73 = tpu.dynamic_rotate %71 by %c1920_i32_32 dim 1 : vector<32x2048xf32>, i32 -> vector<32x2048xf32>
    %c1920_i32_33 = arith.constant 1920 : i32
    %74 = tpu.dynamic_rotate %72 by %c1920_i32_33 dim 1 : vector<32x2048xf32>, i32 -> vector<32x2048xf32>
    %75 = arith.maximumf %71, %72 : vector<32x2048xf32>
    %76 = arith.maximumf %73, %74 : vector<32x2048xf32>
    %77 = arith.maximumf %75, %76 : vector<32x2048xf32>
    %78 = vector.extract_strided_slice %77 {offsets = [0, 0], sizes = [32, 1536], strides = [1, 1]} : vector<32x2048xf32> to vector<32x1536xf32>
    %c0_34 = arith.constant 0 : index
    %c0_35 = arith.constant 0 : index
    %79 = vector.load %arg5[%c0_34, %c0_35] : memref<32x1536xf32, #tpu.memory_space<vmem>>, vector<32x1536xf32>
    tpu.vector_store %arg5[%c0_34, %c0_35], %78 {strides = array<i32>} : memref<32x1536xf32, #tpu.memory_space<vmem>>, vector<32x1536xf32>,
    return
  }
  func.func @transform_0(%arg0: i32) -> (i32, i32) {
    %c0_i32 = arith.constant 0 : i32
    %c0_i32_0 = arith.constant 0 : i32
    %c0_i32_1 = arith.constant 0 : i32
    return %c0_i32, %c0_i32_0 : i32, i32
  }
  func.func @transform_1(%arg0: i32) -> (i32, i32) {
    %c0_i32 = arith.constant 0 : i32
    %c0_i32_0 = arith.constant 0 : i32
    %c0_i32_1 = arith.constant 0 : i32
    return %c0_i32, %c0_i32_0 : i32, i32
  }
  func.func @transform_2(%arg0: i32) -> (i32, i32) {
    %c0_i32 = arith.constant 0 : i32
    %c0_i32_0 = arith.constant 0 : i32
    %c0_i32_1 = arith.constant 0 : i32
    return %c0_i32, %c0_i32_0 : i32, i32
  }
  func.func @transform_3(%arg0: i32) -> (i32, i32) {
    %c0_i32 = arith.constant 0 : i32
    %c0_i32_0 = arith.constant 0 : i32
    %c0_i32_1 = arith.constant 0 : i32
    return %c0_i32, %c0_i32_0 : i32, i32
  }
  func.func @transform_4(%arg0: i32) -> (i32, i32) {
    %c0_i32 = arith.constant 0 : i32
    %c0_i32_0 = arith.constant 0 : i32
    %c0_i32_1 = arith.constant 0 : i32
    return %c0_i32, %c0_i32_0 : i32, i32
  }
}

</mosaic_0001>

<bundles_post_ra>
// kernel: cnn_forward.1
= control target key start
LH: loop header
LB: loop body
LE: loop exit
PB: predicated region body
PF: predicated region fallthrough
CT: control target
= control target key end

     0   :  { %vm59_vm0 = vcmask 1043456   ;;  %vm52_vm1 = vcmask 31744   ;;  %s2618_s6 = smov 1   ;;  %s2620_s7 = smov 127   ;;  %vm1107_vm9 = vcmask 523264   ;;  %s5006_s0 = inlined_call_operand.vmem [shape: f32[6,2048], index: 0, kind: input, shape index: {}]   ;;  %s5007_s1 = inlined_call_operand.vmem [shape: f32[16,6], index: 1, kind: input, shape index: {}]   ;;  %s5008_s2 = inlined_call_operand.vmem [shape: bf16[32,64], index: 2, kind: input, shape index: {}]   ;;  %s5009_s3 = inlined_call_operand.vmem [shape: f32[32,2], index: 3, kind: input, shape index: {}]   ;;  %s5010_s4 = inlined_call_operand.vmem [shape: f32[32,1536], index: 4, kind: output, shape index: {}]  }
   0x1   :  { %v36_v0 = vld [vmem:[%s5006_s0] sm:$0xf]  ;;  %v37_v1 = vld [vmem:[%s5006_s0 + $0x8] sm:$0xf]  ;;  %v38_v2 = vld [vmem:[%s5006_s0 + $0x10] sm:$0xf] }
   0x2   :  { %2340 = vmatpush.msk.msra.mxu0 %vm59_vm0, %v36_v0  ;;  %2343 = vmatpush.msk.msra.mxu1 %vm59_vm0, %v37_v1  ;;  %v39_v3 = vld [vmem:[%s5006_s0 + $0x18] sm:$0xf]  ;;  %v2665_v4 = vld [vmem:[%s5007_s1] sm:$0xff]  ;;  %v42_v6 = vld [vmem:[%s5006_s0 + $0x30] sm:$0xf] }
   0x3   :  { %2346 = vmatpush.msk.msra.mxu2 %vm59_vm0, %v38_v2  ;;  %2349 = vmatpush.msk.msra.mxu3 %vm59_vm0, %v39_v3  ;;  %v40_v5 = vld [vmem:[%s5006_s0 + $0x20] sm:$0xf]  ;;  %v43_v7 = vld [vmem:[%s5006_s0 + $0x38] sm:$0xf]  ;;  %v41_v8 = vld [vmem:[%s5006_s0 + $0x28] sm:$0xf] }
   0x4   :  { %2341 = vmatmul.msk.f32.vlgmr.msra.gmra.mxu0 %vm52_vm1, %v2665_v4  ;;  %2344 = vmatmul.msk.f32.vlgmr.msra.gmra.mxu1 %vm52_vm1, %v2665_v4  ;;  %v44_v9 = vld [vmem:[%s5006_s0 + $0x40] sm:$0xf]  ;;  %v46_v10 = vld [vmem:[%s5006_s0 + $0x50] sm:$0xf]  ;;  %v47_v11 = vld [vmem:[%s5006_s0 + $0x58] sm:$0xf] }
   0x5   :  { %2347 = vmatmul.msk.f32.vlgmr.msra.gmra.mxu2 %vm52_vm1, %v2665_v4  ;;  %2350 = vmatmul.msk.f32.vlgmr.msra.gmra.mxu3 %vm52_vm1, %v2665_v4  ;;  %v45_v12 = vld [vmem:[%s5006_s0 + $0x48] sm:$0xf]  ;;  %v48_v14 = vld [vmem:[%s5006_s0 + $0x60] sm:$0xf]  ;;  %v50_v15 = vld [vmem:[%s5006_s0 + $0x70] sm:$0xf] }
   0x6   :  { %2352 = vmatpush.msk.msrb.mxu0 %vm59_vm0, %v40_v5  ;;  %2358 = vmatpush.msk.msrb.mxu2 %vm59_vm0, %v42_v6  ;;  %v2710_v13 = vld [vmem:[%s5007_s1 + $0x8] sm:$0xff]  ;;  %v51_v16 = vld [vmem:[%s5006_s0 + $0x78] sm:$0xf] }
   0x7   :  { %2361 = vmatpush.msk.msrb.mxu3 %vm59_vm0, %v43_v7  ;;  %2355 = vmatpush.msk.msrb.mxu1 %vm59_vm0, %v41_v8  ;;  %v49_v17 = vld [vmem:[%s5006_s0 + $0x68] sm:$0xf]  ;;  %v2332_v20 = vld [vmem:[%s5006_s0 + $0x4] ss:$8 sm:$0xf] }
   0x8   :  { %2364 = vmatpush.msk.msra.mxu0 %vm59_vm0, %v44_v9  ;;  %2370 = vmatpush.msk.msra.mxu2 %vm59_vm0, %v46_v10  ;;  %v2333_v21 = vld [vmem:[%s5006_s0 + $0x4] ss:$8 sm:$0xf0] }
   0x9   :  { %2373 = vmatpush.msk.msra.mxu3 %vm59_vm0, %v47_v11  ;;  %2367 = vmatpush.msk.msra.mxu1 %vm59_vm0, %v45_v12  ;;  %v2792_v22 = vor.u32 %v2333_v21, %v2332_v20  ;;  %v2334_v50 = vld [vmem:[%s5006_s0 + $0x44] ss:$8 sm:$0xf] }
   0xa   :  { %v2335_v51 = vld [vmem:[%s5006_s0 + $0x44] ss:$8 sm:$0xf0] }
   0xb   :  { %v478_v27 = vperm.slane %v2792_v22, 0  ;;  %v479_v28 = vperm.slane %v2792_v22, 1  ;;  %v480_v29 = vperm.slane %v2792_v22, 2  ;;  %v481_v39 = vperm.slane %v2792_v22, 3 }
   0xc   :  { %2342 = vmatmul.msk.f32.gmra.mxu0 %vm52_vm1, %v2710_v13  ;;  %2345 = vmatmul.msk.f32.gmra.mxu1 %vm52_vm1, %v2710_v13  ;;  %v482_v40 = vperm.slane %v2792_v22, 4  ;;  %v483_v45 = vperm.slane %v2792_v22, 5  ;;  %v484_v56 = vperm.slane %v2792_v22, 6  ;;  %v2831_v61 = vor.u32 %v2335_v51, %v2334_v50 }
   0xd   :  { %2348 = vmatmul.msk.f32.gmra.mxu2 %vm52_vm1, %v2710_v13  ;;  %2351 = vmatmul.msk.f32.gmra.mxu3 %vm52_vm1, %v2710_v13 }
  0x14   :  { %2353 = vmatmul.msk.f32.vlgmr.msrb.gmra.mxu0 %vm52_vm1, %v2665_v4  ;;  %2356 = vmatmul.msk.f32.vlgmr.msrb.gmra.mxu1 %vm52_vm1, %v2665_v4 }
  0x15   :  { %2359 = vmatmul.msk.f32.vlgmr.msrb.gmra.mxu2 %vm52_vm1, %v2665_v4  ;;  %2362 = vmatmul.msk.f32.vlgmr.msrb.gmra.mxu3 %vm52_vm1, %v2665_v4 }
  0x16   :  { %2376 = vmatpush.msk.msrb.mxu0 %vm59_vm0, %v48_v14  ;;  %2382 = vmatpush.msk.msrb.mxu2 %vm59_vm0, %v50_v15  ;;  %v485_v15 = vperm.slane %v2792_v22, 7 }
  0x17   :  { %2385 = vmatpush.msk.msrb.mxu3 %vm59_vm0, %v51_v16  ;;  %2379 = vmatpush.msk.msrb.mxu1 %vm59_vm0, %v49_v17  ;;  %v486_v16 = vperm.slane %v2831_v61, 0 }
  0x1c   :  { %2354 = vmatmul.msk.f32.gmra.mxu0 %vm52_vm1, %v2710_v13  ;;  %2357 = vmatmul.msk.f32.gmra.mxu1 %vm52_vm1, %v2710_v13 }
  0x1d   :  { %2360 = vmatmul.msk.f32.gmra.mxu2 %vm52_vm1, %v2710_v13  ;;  %2363 = vmatmul.msk.f32.gmra.mxu3 %vm52_vm1, %v2710_v13 }
  0x24   :  { %2365 = vmatmul.msk.f32.vlgmr.msra.gmra.mxu0 %vm52_vm1, %v2665_v4  ;;  %2368 = vmatmul.msk.f32.vlgmr.msra.gmra.mxu1 %vm52_vm1, %v2665_v4 }
  0x25   :  { %2371 = vmatmul.msk.f32.vlgmr.msra.gmra.mxu2 %vm52_vm1, %v2665_v4  ;;  %2374 = vmatmul.msk.f32.vlgmr.msra.gmra.mxu3 %vm52_vm1, %v2665_v4 }
  0x2c   :  { %2366 = vmatmul.msk.f32.gmra.mxu0 %vm52_vm1, %v2710_v13  ;;  %2369 = vmatmul.msk.f32.gmra.mxu1 %vm52_vm1, %v2710_v13 }
  0x2d   :  { %2372 = vmatmul.msk.f32.gmra.mxu2 %vm52_vm1, %v2710_v13  ;;  %2375 = vmatmul.msk.f32.gmra.mxu3 %vm52_vm1, %v2710_v13 }
  0x34   :  { %2377 = vmatmul.msk.f32.vlgmr.msrb.gmra.mxu0 %vm52_vm1, %v2665_v4  ;;  %2380 = vmatmul.msk.f32.vlgmr.msrb.gmra.mxu1 %vm52_vm1, %v2665_v4 }
  0x35   :  { %2383 = vmatmul.msk.f32.vlgmr.msrb.gmra.mxu2 %vm52_vm1, %v2665_v4  ;;  %2386 = vmatmul.msk.f32.vlgmr.msrb.gmra.mxu3 %vm52_vm1, %v2665_v4 }
  0x3c   :  { %2378 = vmatmul.msk.f32.gmra.mxu0 %vm52_vm1, %v2710_v13  ;;  %2381 = vmatmul.msk.f32.gmra.mxu1 %vm52_vm1, %v2710_v13 }
  0x3d   :  { %2384 = vmatmul.msk.f32.gmra.mxu2 %vm52_vm1, %v2710_v13  ;;  %2387 = vmatmul.msk.f32.gmra.mxu3 %vm52_vm1, %v2710_v13 }
  0x81   :  { %v125_v18 = vpop.f32.mrf.mxu0  ;;  %v148_v19 = vpop.f32.mrf.mxu1 }
  0x82   :  { %v2797_v30 = vmul.f32 %v478_v27, %v125_v18  ;;  %v2799_v31 = vmul.f32 %v479_v28, %v148_v19 }
  0x84   :  { %v576_v37 = vmul.f32 %v2797_v30, %v125_v18  ;;  %v577_v38 = vmul.f32 %v2799_v31, %v148_v19  ;;  %v542_v41 = vadd.f32 %v2799_v31, %v2797_v30 }
  0x86   :  { %v608_v46 = vadd.f32 %v577_v38, %v576_v37 }
  0x88   :  { %v171_v23 = vpop.f32.mrf.mxu2  ;;  %v194_v24 = vpop.f32.mrf.mxu3 }
  0x89   :  { %v128_v25 = vpop.f32.mrf.mxu0  ;;  %v151_v26 = vpop.f32.mrf.mxu1  ;;  %v2801_v34 = vmul.f32 %v480_v29, %v171_v23  ;;  %v2816_v48 = vmul.f32 %v481_v39, %v194_v24 }
  0x8a   :  { %v2810_v43 = vmul.f32 %v478_v27, %v128_v25  ;;  %v2812_v44 = vmul.f32 %v479_v28, %v151_v26 }
  0x8b   :  { %v578_v42 = vmul.f32 %v2801_v34, %v171_v23  ;;  %v543_v47 = vadd.f32 %v542_v41, %v2801_v34  ;;  %v579_v63 = vmul.f32 %v2816_v48, %v194_v24  ;;  %v488_v41 = vperm.slane %v2831_v61, 2 }
  0x8c   :  { %v592_v59 = vmul.f32 %v2810_v43, %v128_v25  ;;  %v593_v60 = vmul.f32 %v2812_v44, %v151_v26  ;;  %v559_v2 = vadd.f32 %v2812_v44, %v2810_v43  ;;  %v487_v25 = vperm.slane %v2831_v61, 1 }
  0x8d   :  { %v609_v55 = vadd.f32 %v608_v46, %v578_v42  ;;  %v544_v62 = vadd.f32 %v543_v47, %v2816_v48 }
  0x8e   :  { %v625_v8 = vadd.f32 %v593_v60, %v592_v59 }
  0x8f   :  { %v610_v5 = vadd.f32 %v609_v55, %v579_v63 }
  0x90   :  { %v174_v32 = vpop.f32.mrf.mxu2  ;;  %v197_v33 = vpop.f32.mrf.mxu3 }
  0x91   :  { %v217_v35 = vpop.f32.mrf.mxu0  ;;  %v240_v36 = vpop.f32.mrf.mxu1  ;;  %v2826_v52 = vmul.f32 %v480_v29, %v174_v32  ;;  %v2845_v10 = vmul.f32 %v481_v39, %v197_v33 }
  0x92   :  { %v2818_v49 = vmul.f32 %v482_v40, %v217_v35  ;;  %v2836_v1 = vmul.f32 %v483_v45, %v240_v36 }
  0x93   :  { %v594_v3 = vmul.f32 %v2826_v52, %v174_v32  ;;  %v560_v9 = vadd.f32 %v559_v2, %v2826_v52  ;;  %v595_v27 = vmul.f32 %v2845_v10, %v197_v33 }
  0x94   :  { %v580_v0 = vmul.f32 %v2818_v49, %v217_v35  ;;  %v545_v6 = vadd.f32 %v544_v62, %v2818_v49  ;;  %v581_v14 = vmul.f32 %v2836_v1, %v240_v36 }
  0x95   :  { %v626_v17 = vadd.f32 %v625_v8, %v594_v3  ;;  %v561_v26 = vadd.f32 %v560_v9, %v2845_v10 }
  0x96   :  { %v611_v12 = vadd.f32 %v610_v5, %v580_v0  ;;  %v546_v20 = vadd.f32 %v545_v6, %v2836_v1  ;;  %v489_v6 = vperm.slane %v2831_v61, 3 }
  0x97   :  { %v627_v37 = vadd.f32 %v626_v17, %v595_v27 }
  0x98   :  { %v263_v53 = vpop.f32.mrf.mxu2  ;;  %v286_v54 = vpop.f32.mrf.mxu3  ;;  %v612_v29 = vadd.f32 %v611_v12, %v581_v14  ;;  %v490_v14 = vperm.slane %v2831_v61, 4 }
  0x99   :  { %v220_v57 = vpop.f32.mrf.mxu0  ;;  %v243_v58 = vpop.f32.mrf.mxu1  ;;  %v2842_v7 = vmul.f32 %v484_v56, %v263_v53  ;;  %v2861_v35 = vmul.f32 %v485_v15, %v286_v54 }
  0x9a   :  { %v2847_v11 = vmul.f32 %v482_v40, %v220_v57  ;;  %v2858_v22 = vmul.f32 %v483_v45, %v243_v58 }
  0x9b   :  { %v582_v21 = vmul.f32 %v2842_v7, %v263_v53  ;;  %v547_v32 = vadd.f32 %v546_v20, %v2842_v7  ;;  %v583_v46 = vmul.f32 %v2861_v35, %v286_v54 }
  0x9c   :  { %v596_v28 = vmul.f32 %v2847_v11, %v220_v57  ;;  %v562_v38 = vadd.f32 %v561_v26, %v2847_v11  ;;  %v597_v42 = vmul.f32 %v2858_v22, %v243_v58 }
  0x9d   :  { %v613_v40 = vadd.f32 %v612_v29, %v582_v21  ;;  %v548_v45 = vadd.f32 %v547_v32, %v2861_v35 }
  0x9e   :  { %v628_v33 = vadd.f32 %v627_v37, %v596_v28  ;;  %v563_v51 = vadd.f32 %v562_v38, %v2858_v22 }
  0x9f   :  { %v614_v57 = vadd.f32 %v613_v40, %v583_v46 }
  0xa0   :  { %v266_v18 = vpop.f32.mrf.mxu2  ;;  %v289_v19 = vpop.f32.mrf.mxu3  ;;  %v629_v63 = vadd.f32 %v628_v33, %v597_v42 }
  0xa1   :  { %v309_v23 = vpop.f32.mrf.mxu0  ;;  %v332_v24 = vpop.f32.mrf.mxu1  ;;  %v2866_v39 = vmul.f32 %v484_v56, %v266_v18  ;;  %v2881_v0 = vmul.f32 %v485_v15, %v289_v19 }
  0xa2   :  { %v2863_v36 = vmul.f32 %v486_v16, %v309_v23  ;;  %v2873_v50 = vmul.f32 %v487_v25, %v332_v24 }
  0xa3   :  { %v598_v53 = vmul.f32 %v2866_v39, %v266_v18  ;;  %v564_v54 = vadd.f32 %v563_v51, %v2866_v39  ;;  %v599_v18 = vmul.f32 %v2881_v0, %v289_v19 }
  0xa4   :  { %v584_v47 = vmul.f32 %v2863_v36, %v309_v23  ;;  %v549_v59 = vadd.f32 %v548_v45, %v2863_v36  ;;  %v585_v5 = vmul.f32 %v2873_v50, %v332_v24  ;;  %v491_v24 = vperm.slane %v2831_v61, 5 }
  0xa5   :  { %v630_v8 = vadd.f32 %v629_v63, %v598_v53  ;;  %v565_v17 = vadd.f32 %v564_v54, %v2881_v0 }
  0xa6   :  { %v615_v3 = vadd.f32 %v614_v57, %v584_v47  ;;  %v550_v9 = vadd.f32 %v549_v59, %v2873_v50  ;;  %v493_v57 = vperm.slane %v2831_v61, 7 }
  0xa7   :  { %v631_v26 = vadd.f32 %v630_v8, %v599_v18 }
  0xa8   :  { %v355_v55 = vpop.f32.mrf.mxu2  ;;  %v378_v56 = vpop.f32.mrf.mxu3  ;;  %v616_v20 = vadd.f32 %v615_v3, %v585_v5 }
  0xa9   :  { %v2878_v60 = vmul.f32 %v488_v41, %v355_v55  ;;  %v312_v58 = vpop.f32.mrf.mxu0  ;;  %v335_v62 = vpop.f32.mrf.mxu1  ;;  %v2896_v23 = vmul.f32 %v489_v6, %v378_v56 }
  0xaa   :  { %v2883_v2 = vmul.f32 %v486_v16, %v312_v58  ;;  %v2893_v16 = vmul.f32 %v487_v25, %v335_v62 }
  0xab   :  { %v586_v12 = vmul.f32 %v2878_v60, %v355_v55  ;;  %v551_v21 = vadd.f32 %v550_v9, %v2878_v60  ;;  %v587_v45 = vmul.f32 %v2896_v23, %v378_v56  ;;  %v492_v55 = vperm.slane %v2831_v61, 6 }
  0xac   :  { %v600_v15 = vmul.f32 %v2883_v2, %v312_v58  ;;  %v566_v27 = vadd.f32 %v565_v17, %v2883_v2  ;;  %v601_v25 = vmul.f32 %v2893_v16, %v335_v62 }
  0xad   :  { %v617_v32 = vadd.f32 %v616_v20, %v586_v12  ;;  %v552_v42 = vadd.f32 %v551_v21, %v2896_v23 }
  0xae   :  { %v632_v40 = vadd.f32 %v631_v26, %v600_v15  ;;  %v567_v47 = vadd.f32 %v566_v27, %v2893_v16 }
  0xaf   :  { %v618_v53 = vadd.f32 %v617_v32, %v587_v45 }
  0xb0   :  { %v358_v28 = vpop.f32.mrf.mxu2  ;;  %v381_v29 = vpop.f32.mrf.mxu3  ;;  %v633_v58 = vadd.f32 %v632_v40, %v601_v25 }
  0xb1   :  { %v2900_v37 = vmul.f32 %v488_v41, %v358_v28  ;;  %v401_v19 = vpop.f32.mrf.mxu0  ;;  %v424_v38 = vpop.f32.mrf.mxu1  ;;  %v2916_v63 = vmul.f32 %v489_v6, %v381_v29 }
  0xb2   :  { %v2903_v33 = vmul.f32 %v490_v14, %v401_v19  ;;  %v2907_v46 = vmul.f32 %v491_v24, %v424_v38 }
  0xb3   :  { %v602_v51 = vmul.f32 %v2900_v37, %v358_v28  ;;  %v568_v62 = vadd.f32 %v567_v47, %v2900_v37  ;;  %v603_v20 = vmul.f32 %v2916_v63, %v381_v29 }
  0xb4   :  { %v588_v41 = vmul.f32 %v2903_v33, %v401_v19  ;;  %v553_v59 = vadd.f32 %v552_v42, %v2903_v33  ;;  %v589_v54 = vmul.f32 %v2907_v46, %v424_v38 }
  0xb5   :  { %v634_v3 = vadd.f32 %v633_v58, %v602_v51  ;;  %v569_v15 = vadd.f32 %v568_v62, %v2916_v63 }
  0xb6   :  { %v619_v56 = vadd.f32 %v618_v53, %v588_v41  ;;  %v554_v61 = vadd.f32 %v553_v59, %v2907_v46 }
  0xb7   :  { %v635_v32 = vadd.f32 %v634_v3, %v603_v20 }
  0xb8   :  { %v447_v5 = vpop.f32.mrf.mxu2  ;;  %v470_v8 = vpop.f32.mrf.mxu3  ;;  %v620_v21 = vadd.f32 %v619_v56, %v589_v54 }
  0xb9   :  { %v2919_v9 = vmul.f32 %v492_v55, %v447_v5  ;;  %v2921_v12 = vmul.f32 %v493_v57, %v470_v8  ;;  %v404_v17 = vpop.f32.mrf.mxu0  ;;  %v427_v18 = vpop.f32.mrf.mxu1 }
  0xba   :  { %v2926_v6 = vmul.f32 %v490_v14, %v404_v17  ;;  %v2929_v27 = vmul.f32 %v491_v24, %v427_v18 }
  0xbb   :  { %v590_v26 = vmul.f32 %v2919_v9, %v447_v5  ;;  %v555_v28 = vadd.f32 %v554_v61, %v2919_v9  ;;  %v591_v38 = vmul.f32 %v2921_v12, %v470_v8 }
  0xbc   :  { %v604_v19 = vmul.f32 %v2926_v6, %v404_v17  ;;  %v570_v40 = vadd.f32 %v569_v15, %v2926_v6  ;;  %v605_v14 = vmul.f32 %v2929_v27, %v427_v18 }
  0xbd   :  { %v556_v25 = vadd.f32 %v555_v28, %v2921_v12  ;;  %v621_v42 = vadd.f32 %v620_v21, %v590_v26 }
  0xbe   :  { %v636_v29 = vadd.f32 %v635_v32, %v604_v19  ;;  %v571_v53 = vadd.f32 %v570_v40, %v2929_v27 }
  0xbf   :  { %557 = vadd.xlane.f32.xlu0 %v556_v25  ;;  %v622_v45 = vadd.f32 %v621_v42, %v591_v38 }
  0xc0   :  { %v450_v47 = vpop.f32.mrf.mxu2  ;;  %v473_v24 = vpop.f32.mrf.mxu3  ;;  %v637_v59 = vadd.f32 %v636_v29, %v605_v14 }
  0xc1   :  { %v2937_v51 = vmul.f32 %v492_v55, %v450_v47  ;;  %v2939_v41 = vmul.f32 %v493_v57, %v473_v24  ;;  %623 = vadd.xlane.f32.xlu1 %v622_v45  ;;  %v2617_v55 = vmov 4  }
  0xc2   :  { %2436 = vset.pattern.permute.xlu0 %v2617_v55  ;;  %2437 = vset.pattern.permute.xlu1 %v2617_v55 }
  0xc3   :  { %v606_v58 = vmul.f32 %v2937_v51, %v450_v47  ;;  %v572_v62 = vadd.f32 %v571_v53, %v2937_v51  ;;  %v607_v56 = vmul.f32 %v2939_v41, %v473_v24 }
  0xc5   :  { %v573_v54 = vadd.f32 %v572_v62, %v2939_v41  ;;  %v638_v3 = vadd.f32 %v637_v59, %v606_v58 }
  0xc7   :  { %574 = vadd.xlane.f32.xlu0 %v573_v54  ;;  %v639_v5 = vadd.f32 %v638_v3, %v607_v56 }
  0xc9   :  { %640 = vadd.xlane.f32.xlu1 %v639_v5 }
 0x132   :  { %v558_v57 = vpop.xlane.xlu0 %557 }
 0x133   :  { %v642_v8 = vmul.f32 0.00055555557, %v558_v57 }
 0x134   :  { %v624_v17 = vpop.xlane.xlu1 %623 }
 0x135   :  { %v646_v18 = vmul.f32 %v642_v8, %v642_v8  ;;  %v644_v61 = vmul.f32 0.00055555557, %v624_v17 }
 0x137   :  { %v648_v15 = vsub.f32 %v644_v61, %v646_v18  ;;  %v2619_v18 = vmov 5  }
 0x138   :  { %2438 = vset.pattern.permute.xlu2 %v2619_v18 }
 0x139   :  { %v650_v20 = vadd.f32 1e-05, %v648_v15 }
 0x13a   :  { %v575_v21 = vpop.xlane.xlu0 %574 }
 0x13b   :  { %2605 = vrsqrt.f32 %v650_v20  ;;  %v643_v26 = vmul.f32 0.00055555557, %v575_v21  ;;  %vm658_vm3 = vweird.f32 %v650_v20 }
 0x13c   :  { %v641_v28 = vpop.xlane.xlu1 %640 }
 0x13d   :  { %v647_v32 = vmul.f32 %v643_v26, %v643_v26  ;;  %v645_v19 = vmul.f32 0.00055555557, %v641_v28 }
 0x13f   :  { %v649_v38 = vsub.f32 %v645_v19, %v647_v32 }
 0x141   :  { %v2606_v40 = vpop.eup %2605  ;;  %v651_v25 = vadd.f32 1e-05, %v649_v38 }
 0x142   :  { %v653_v42 = vmul.f32 %v2606_v40, %v650_v20  ;;  %vm659_vm2 = vweird.f32 %v2606_v40 }
 0x143   :  { %2607 = vrsqrt.f32 %v651_v25  ;;  %vm660_vm4 = vmor %vm658_vm3, %vm659_vm2  ;;  %vm668_vm6 = vweird.f32 %v651_v25 }
 0x144   :  { %v654_v29 = vmul.f32 %v2606_v40, %v653_v42 }
 0x146   :  { %v655_v14 = vmul.f32 0.5, %v654_v29 }
 0x148   :  { %v656_v45 = vsub.f32 1.5, %v655_v14 }
 0x149   :  { %v2608_v47 = vpop.eup %2607 }
 0x14a   :  { %v663_v24 = vmul.f32 %v2608_v47, %v651_v25  ;;  %v657_v53 = vmul.f32 %v2606_v40, %v656_v45  ;;  %vm669_vm5 = vweird.f32 %v2608_v47 }
 0x14b   :  { %vm670_vm7 = vmor %vm668_vm6, %vm669_vm5 }
 0x14c   :  { %v664_v59 = vmul.f32 %v2608_v47, %v663_v24  ;;  %v661_v58 = vsel %vm660_vm4, %v2606_v40, %v657_v53 }
 0x14d   :  { %v672_v62 = vmul.f32 %v661_v58, %v2665_v4 }
 0x14e   :  { %v665_v56 = vmul.f32 0.5, %v664_v59 }
 0x14f   :  { %688 = vperm.xlu0 %2436, %v672_v62   ;;  %v674_v54 = vmul.f32 %v672_v62, %v642_v8 }
 0x150   :  { %v666_v3 = vsub.f32 1.5, %v665_v56 }
 0x151   :  { %678 = vrot.lane.b32.xlu2 %v674_v54, %s2618_s6 }
 0x152   :  { %v667_v5 = vmul.f32 %v2608_v47, %v666_v3 }
 0x154   :  { %v671_v55 = vsel %vm670_vm7, %v2608_v47, %v667_v5 }
 0x155   :  { %v673_v57 = vmul.f32 %v671_v55, %v2710_v13 }
 0x157   :  { %693 = vperm.xlu1 %2437, %v673_v57   ;;  %v675_v17 = vmul.f32 %v673_v57, %v643_v26 }
 0x159   :  { %680 = vrot.lane.b32.xlu2 %v675_v17, %s2618_s6 }
 0x1ab   :  { %v679_v61 = vpop.permute.xlu2 %678 }
 0x1ac   :  { %v684_v8 = vsub.f32 %v2665_v4, %v679_v61 }
 0x1ae   :  { %730 = vperm.xlu2 %2438, %v684_v8  }
 0x1b3   :  { %v681_v15 = vpop.permute.xlu2 %680 }
 0x1b4   :  { %v685_v20 = vsub.f32 %v2710_v13, %v681_v15 }
 0x1b6   :  { %735 = vperm.xlu2 %2438, %v685_v20  }
 0x1c1   :  { %v2954_v28 = vpop.permute.xlu0 %688 }
 0x1c2   :  { %v701_v26 = vmul.f32 %v2954_v28, %v2836_v1  ;;  %v699_v19 = vmul.f32 %v2954_v28, %v2816_v48  ;;  %v698_v4 = vmul.f32 %v2954_v28, %v2801_v34  ;;  %v700_v58 = vmul.f32 %v2954_v28, %v2818_v49 }
 0x1c9   :  { %v2956_v32 = vpop.permute.xlu1 %693 }
 0x1ca   :  { %v717_v40 = vmul.f32 %v2956_v32, %v2858_v22  ;;  %v715_v25 = vmul.f32 %v2956_v32, %v2845_v10  ;;  %v714_v1 = vmul.f32 %v2956_v32, %v2826_v52  ;;  %v716_v52 = vmul.f32 %v2956_v32, %v2847_v11 }
 0x1cb   :  { %v713_v45 = vmul.f32 %v2956_v32, %v2812_v44  ;;  %v720_v11 = vmul.f32 %v2956_v32, %v2883_v2  ;;  %v697_v44 = vmul.f32 %v2954_v28, %v2799_v31  ;;  %v704_v31 = vmul.f32 %v2954_v28, %v2863_v36 }
 0x1cc   :  { %v718_v15 = vmul.f32 %v2956_v32, %v2866_v39  ;;  %v712_v20 = vmul.f32 %v2956_v32, %v2810_v43 }
 0x208   :  { %v2952_v21 = vpop.permute.xlu2 %730 }
 0x209   :  { %v2965_v38 = vadd.f32 %v2952_v21, %v701_v26  ;;  %v2968_v13 = vadd.f32 %v2952_v21, %v699_v19  ;;  %v2977_v48 = vadd.f32 %v2952_v21, %v698_v4  ;;  %v3032_v5 = vadd.f32 %v2952_v21, %v700_v58 }
 0x20a   :  { %v3035_v55 = vadd.f32 %v2952_v21, %v697_v44  ;;  %v3039_v57 = vadd.f32 %v2952_v21, %v704_v31  ;;  %v702_v19 = vmul.f32 %v2954_v28, %v2842_v7  ;;  %v723_v4 = vmul.f32 %v2956_v32, %v2916_v63 }
 0x20b   :  { %v775_v22 = vmax.f32 %v2965_v38, 0.0  ;;  %v773_v10 = vmax.f32 %v2968_v13, 0.0  ;;  %v5025_v53 = vmax.f32 %v2977_v48, 0.0  ;;  %v774_v61 = vmax.f32 %v3032_v5, 0.0 }
 0x20c   :  { %v5017_v8 = vmax.f32 %v3035_v55, 0.0  ;;  %v5021_v26 = vmax.f32 %v3039_v57, 0.0  ;;  %v707_v63 = vmul.f32 %v2954_v28, %v2896_v23  ;;  %v722_v31 = vmul.f32 %v2956_v32, %v2900_v37 }
 0x20e   :  { %v3090_v58 = vadd.f32 %v2952_v21, %v707_v63 }
 0x210   :  { %v2979_v42 = vpop.permute.xlu2 %735 }
 0x211   :  { %v2982_v34 = vadd.f32 %v2979_v42, %v717_v40  ;;  %v2985_v29 = vadd.f32 %v2979_v42, %v715_v25  ;;  %v2988_v14 = vadd.f32 %v2979_v42, %v714_v1  ;;  %v3003_v62 = vadd.f32 %v2979_v42, %v716_v52 }
 0x212   :  { %v3022_v2 = vadd.f32 %v2979_v42, %v713_v45  ;;  %v3027_v3 = vadd.f32 %v2979_v42, %v720_v11  ;;  %v696_v40 = vmul.f32 %v2954_v28, %v2797_v30  ;;  %v3066_v39 = vadd.f32 %v2979_v42, %v718_v15 }
 0x213   :  { %v791_v47 = vmax.f32 %v2982_v34, 0.0  ;;  %v789_v24 = vmax.f32 %v2985_v29, 0.0  ;;  %v5026_v59 = vmax.f32 %v2988_v14, 0.0  ;;  %v790_v36 = vmax.f32 %v3003_v62, 0.0 }
 0x214   :  { %v5020_v17 = vmax.f32 %v3022_v2, 0.0  ;;  %v5023_v18 = vmax.f32 %v3027_v3, 0.0  ;;  %v3069_v7 = vadd.f32 %v2979_v42, %v712_v20  ;;  %v3078_v1 = vadd.f32 %v2979_v42, %v723_v4 }
 0x215   :  { %v2449_v56 = vpack.i.bf16 %v791_v47, %v775_v22  ;;  %v2439_v54 = vpack.i.bf16 %v789_v24, %v773_v10  ;;  %v2464_v49 = vpack.i.bf16 %v5026_v59, %v5025_v53  ;;  %v2444_v25 = vpack.i.bf16 %v790_v36, %v774_v61 }
 0x216   :  { %v2459_v43 = vpack.i.bf16 %v5020_v17, %v5017_v8  ;;  %v2479_v30 = vpack.i.bf16 %v5023_v18, %v5021_v26  ;;  %v3083_v52 = vadd.f32 %v2952_v21, %v702_v19  ;;  %v3086_v45 = vadd.f32 %v2952_v21, %v696_v40 }
 0x217   :  { %2450 = vrot.lane.b32.xlu1 %v2449_v56, %s2620_s7  ;;  %2440 = vrot.lane.b32.xlu2 %v2439_v54, %s2620_s7  ;;  %v5027_v23 = vmax.f32 %v3066_v39, 0.0  ;;  %v5016_v11 = vmax.f32 %v3069_v7, 0.0  ;;  %v5012_v44 = vmax.f32 %v3078_v1, 0.0  ;;  %v5011_v15 = vmax.f32 %v3090_v58, 0.0 }
 0x218   :  { %2465 = vrot.lane.b32.xlu0 %v2464_v49, %s2620_s7  ;;  %v5028_v56 = vmax.f32 %v3083_v52, 0.0  ;;  %v5015_v54 = vmax.f32 %v3086_v45, 0.0  ;;  %v719_v49 = vmul.f32 %v2956_v32, %v2881_v0  ;;  %v703_v20 = vmul.f32 %v2954_v28, %v2861_v35 }
 0x219   :  { %v706_v19 = vmul.f32 %v2954_v28, %v2878_v60  ;;  %v3118_v40 = vadd.f32 %v2979_v42, %v722_v31  ;;  %v2494_v35 = vpack.i.bf16 %v5012_v44, %v5011_v15  ;;  %v721_v31 = vmul.f32 %v2956_v32, %v2893_v16 }
 0x21a   :  { %v2454_v4 = vpack.i.bf16 %v5027_v23, %v5028_v56  ;;  %v2474_v0 = vpack.i.bf16 %v5016_v11, %v5015_v54  ;;  %v3115_v37 = vadd.f32 %v2979_v42, %v719_v49  ;;  %v3127_v60 = vadd.f32 %v2952_v21, %v703_v20 }
 0x21b   :  { %v5124_v38 = vmax.f32 %v3083_v52, 0.0  ;;  %v5125_v62 = vmax.f32 %v3066_v39, 0.0  ;;  %v5126_v34 = vmax.f32 %v2988_v14, 0.0  ;;  %v725_v39 = vmul.f32 %v2956_v32, %v2929_v27 }
 0x21c   :  { %v5022_v63 = vmax.f32 %v3127_v60, 0.0 }
 0x21f   :  { %2445 = vrot.lane.b32.xlu2 %v2444_v25, %s2620_s7  ;;  %2460 = vrot.lane.b32.xlu1 %v2459_v43, %s2620_s7  ;;  %v3130_v25 = vadd.f32 %v2952_v21, %v706_v19  ;;  %v5024_v43 = vmax.f32 %v3115_v37, 0.0 }
 0x220   :  { %2480 = vrot.lane.b32.xlu0 %v2479_v30, %s2620_s7  ;;  %v5014_v30 = vmax.f32 %v3118_v40, 0.0 }
 0x221   :  { %v5013_v49 = vmax.f32 %v3130_v25, 0.0  ;;  %v2469_v20 = vpack.i.bf16 %v5024_v43, %v5022_v63 }
 0x223   :  { %v2489_v19 = vpack.i.bf16 %v5014_v30, %v5013_v49  ;;  %v866_v49 = vlaneseq }
 0x227   :  { %2455 = vrot.lane.b32.xlu2 %v2454_v4, %s2620_s7  ;;  %2475 = vrot.lane.b32.xlu1 %v2474_v0, %s2620_s7  ;;  %v705_v4 = vmul.f32 %v2954_v28, %v2873_v50  ;;  %v3150_v0 = vadd.f32 %v2979_v42, %v721_v31 }
 0x228   :  { %2495 = vrot.lane.b32.xlu0 %v2494_v35, %s2620_s7 }
 0x229   :  { %v3155_v16 = vadd.f32 %v2952_v21, %v705_v4  ;;  %v5019_v35 = vmax.f32 %v3150_v0, 0.0 }
 0x22b   :  { %v5018_v15 = vmax.f32 %v3155_v16, 0.0 }
 0x22d   :  { %v2484_v44 = vpack.i.bf16 %v5019_v35, %v5018_v15 }
 0x22f   :  { %2470 = vrot.lane.b32.xlu2 %v2469_v20, %s2620_s7  ;;  %2490 = vrot.lane.b32.xlu1 %v2489_v19, %s2620_s7  ;;  %v3164_v20 = vand.u32 127, %v866_v49 }
 0x231   :  { %5123 = vst [vmem:[#allocation2_spill] sm:$0xff] %v3164_v20  ;;  %vm868_vm8 = vcmp.lt.s32.totalorder %v3164_v20, 127  ;;  %v2338_v20 = vld [vmem:[%s5006_s0 + $0x45] ss:$8 sm:$0xf] }
 0x237   :  { %2485 = vrot.lane.b32.xlu2 %v2484_v44, %s2620_s7  ;;  %v708_v44 = vmul.f32 %v2954_v28, %v2903_v33 }
 0x239   :  { %v3220_v52 = vadd.f32 %v2952_v21, %v708_v44 }
 0x271   :  { %v2441_v50 = vpop.permute.xlu2 %2440 }
 0x272   :  { %v2443_v54 = vunpack.i.h.bf16 %v2441_v50  ;;  %v2442_v11 = vunpack.i.l.bf16 %v2441_v50  ;;  %v3179_v50 = vmul.f32 %v2954_v28, %v2907_v46 }
 0x279   :  { %v2446_v31 = vpop.permute.xlu2 %2445 }
 0x27a   :  { %v2448_v30 = vunpack.i.h.bf16 %v2446_v31  ;;  %v2447_v4 = vunpack.i.l.bf16 %v2446_v31  ;;  %v3175_v31 = vmul.f32 %v2956_v32, %v2926_v6 }
 0x27c   :  { %v891_v8 = vsel %vm868_vm8, %v2442_v11, %v2447_v4  ;;  %v892_v15 = vsel %vm868_vm8, %v2443_v54, %v2448_v30 }
 0x27d   :  { %v904_v33 = vmax.f32 %v773_v10, %v891_v8 }
 0x281   :  { %v2456_v19 = vpop.permute.xlu2 %2455 }
 0x282   :  { %v2458_v35 = vunpack.i.h.bf16 %v2456_v19  ;;  %v2457_v17 = vunpack.i.l.bf16 %v2456_v19  ;;  %v920_v19 = vmax.f32 %v789_v24, %v892_v15 }
 0x289   :  { %v2451_v49 = vpop.permute.xlu1 %2450  ;;  %v2471_v26 = vpop.permute.xlu2 %2470 }
 0x28a   :  { %v2453_v63 = vunpack.i.h.bf16 %v2451_v49  ;;  %v2452_v18 = vunpack.i.l.bf16 %v2451_v49  ;;  %v2473_v43 = vunpack.i.h.bf16 %v2471_v26  ;;  %v2472_v53 = vunpack.i.l.bf16 %v2471_v26  ;;  %v2466_v59 = vpop.permute.xlu0 %2465 }
 0x28b   :  { %v2468_v23 = vunpack.i.h.bf16 %v2466_v59  ;;  %v2467_v56 = vunpack.i.l.bf16 %v2466_v59 }
 0x28c   :  { %v887_v6 = vsel %vm868_vm8, %v2452_v18, %v2457_v17  ;;  %v888_v46 = vsel %vm868_vm8, %v2453_v63, %v2458_v35  ;;  %v889_v49 = vsel %vm868_vm8, %v2447_v4, %v2452_v18  ;;  %v890_v26 = vsel %vm868_vm8, %v2448_v30, %v2453_v63 }
 0x28d   :  { %v905_v13 = vmax.f32 %v774_v61, %v889_v49  ;;  %v906_v29 = vmax.f32 %v775_v22, %v887_v6  ;;  %v921_v10 = vmax.f32 %v790_v36, %v890_v26  ;;  %v922_v24 = vmax.f32 %v791_v47, %v888_v46 }
 0x28e   :  { %v885_v59 = vsel %vm868_vm8, %v2457_v17, %v2472_v53  ;;  %v886_v18 = vsel %vm868_vm8, %v2458_v35, %v2473_v43  ;;  %v894_v8 = vsel %vm868_vm8, %v2468_v23, %v2443_v54  ;;  %v893_v5 = vsel %vm868_vm8, %v2467_v56, %v2442_v11 }
 0x28f   :  { %v907_v22 = vmax.f32 %v5124_v38, %v885_v59  ;;  %v923_v36 = vmax.f32 %v5125_v62, %v886_v18  ;;  %v919_v47 = vmax.f32 %v5126_v34, %v894_v8  ;;  %v5127_v17 = vmax.f32 %v2977_v48, 0.0 }
 0x290   :  { %v936_v15 = vmax.f32 %v904_v33, %v905_v13  ;;  %v952_v30 = vmax.f32 %v920_v19, %v921_v10  ;;  %v937_v63 = vmax.f32 %v905_v13, %v906_v29  ;;  %v953_v35 = vmax.f32 %v921_v10, %v922_v24 }
 0x291   :  { %v903_v61 = vmax.f32 %v5127_v17, %v893_v5  ;;  %v3217_v54 = vpop.permute.xlu2 %2485  ;;  %v2461_v4 = vpop.permute.xlu1 %2460  ;;  %v951_v6 = vmax.f32 %v919_v47, %v920_v19  ;;  %v938_v19 = vmax.f32 %v906_v29, %v907_v22  ;;  %v954_v8 = vmax.f32 %v922_v24, %v923_v36 }
 0x292   :  { %v2488_v14 = vunpack.i.h.bf16 %v3217_v54  ;;  %v2487_v48 = vunpack.i.l.bf16 %v3217_v54  ;;  %v2481_v46 = vpop.permute.xlu0 %2480  ;;  %v2463_v49 = vunpack.i.h.bf16 %v2461_v4  ;;  %v2462_v26 = vunpack.i.l.bf16 %v2461_v4 }
 0x293   :  { %v935_v11 = vmax.f32 %v903_v61, %v904_v33  ;;  %v2483_v13 = vunpack.i.h.bf16 %v2481_v46  ;;  %v2482_v10 = vunpack.i.l.bf16 %v2481_v46  ;;  %v2499_v59 = vpack.i.bf16 %v952_v30, %v936_v15 }
 0x294   :  { %v2504_v18 = vpack.i.bf16 %v953_v35, %v937_v63  ;;  %v896_v33 = vsel %vm868_vm8, %v2463_v49, %v2468_v23  ;;  %v895_v44 = vsel %vm868_vm8, %v2462_v26, %v2467_v56  ;;  %v5128_v56 = vmax.f32 %v3115_v37, 0.0 }
 0x295   :  { %v882_v27 = vsel %vm868_vm8, %v2483_v13, %v2488_v14  ;;  %v884_v5 = vsel %vm868_vm8, %v2473_v43, %v2483_v13  ;;  %v881_v38 = vsel %vm868_vm8, %v2482_v10, %v2487_v48  ;;  %v883_v23 = vsel %vm868_vm8, %v2472_v53, %v2482_v10  ;;  %2500 = vrot.lane.b32.xlu2 %v2499_v59, %s2620_s7 }
 0x296   :  { %v924_v29 = vmax.f32 %v5128_v56, %v884_v5  ;;  %v5129_v24 = vmax.f32 %v3027_v3, 0.0  ;;  %v5130_v34 = vmax.f32 %v3127_v60, 0.0  ;;  %v5131_v17 = vmax.f32 %v3039_v57, 0.0  ;;  %2505 = vrot.lane.b32.xlu1 %v2504_v18, %s2620_s7 }
 0x297   :  { %v5132_v53 = vmax.f32 %v3022_v2, 0.0  ;;  %v5133_v13 = vmax.f32 %v3035_v55, 0.0  ;;  %v3260_v10 = vpack.c.bf16 %v951_v6, %v935_v11  ;;  %v3262_v3 = vpack.c.bf16 %v952_v30, %v936_v15 }
 0x298   :  { %v3247_v62 = vmax.f32 %v5129_v24, %v882_v27  ;;  %v908_v43 = vmax.f32 %v5130_v34, %v883_v23  ;;  %v3253_v4 = vmax.f32 %v5131_v17, %v881_v38  ;;  %v3272_v27 = vmax.f32 %v923_v36, %v924_v29 }
 0x299   :  { %v918_v46 = vmax.f32 %v5132_v53, %v896_v33  ;;  %v902_v37 = vmax.f32 %v5133_v13, %v895_v44  ;;  %v3274_v18 = vpop.permute.xlu1 %2475  ;;  %v3276_v55 = vpack.c.bf16 %v953_v35, %v937_v63  ;;  %v3278_v44 = vpack.c.bf16 %v954_v8, %v938_v19 }
 0x29a   :  { %v3265_v59 = vmax.f32 %v908_v43, %v3253_v4  ;;  %v3268_v60 = vmax.f32 %v924_v29, %v3247_v62  ;;  %v3270_v57 = vmax.f32 %v907_v22, %v908_v43  ;;  %v2478_v15 = vunpack.i.h.bf16 %v3274_v18 }
 0x29b   :  { %v934_v2 = vmax.f32 %v902_v37, %v903_v61  ;;  %v950_v33 = vmax.f32 %v918_v46, %v919_v47  ;;  %v2477_v30 = vunpack.i.l.bf16 %v3274_v18  ;;  %v3284_v5 = vadd.f32 %v2979_v42, %v3175_v31 }
 0x29c   :  { %v3287_v22 = vadd.f32 %v2979_v42, %v725_v39  ;;  %v2514_v36 = vpack.i.bf16 %v951_v6, %v935_v11  ;;  %v2519_v23 = vpack.i.bf16 %v954_v8, %v938_v19  ;;  %v898_v47 = vsel %vm868_vm8, %v2478_v15, %v2463_v49  ;;  %v3321_v19 = vpop.permute.xlu0 %2495 }
 0x29d   :  { %v2509_v38 = vpack.i.bf16 %v950_v33, %v934_v2  ;;  %v3289_v61 = vpack.c.bf16 %v950_v33, %v934_v2  ;;  %v897_v63 = vsel %vm868_vm8, %v2477_v30, %v2462_v26  ;;  %v3301_v31 = vpack.c.bf16 %v3272_v27, %v3270_v57 }
 0x29e   :  { %v3305_v35 = vpack.c.bf16 %v3268_v60, %v3265_v59  ;;  %v5134_v11 = vmax.f32 %v3069_v7, 0.0  ;;  %v5135_v39 = vmax.f32 %v3086_v45, 0.0  ;;  %2515 = vrot.lane.b32.xlu2 %v2514_v36, %s2620_s7  ;;  %v3319_v26 = vadd.f32 %v2952_v21, %v3179_v50  ;;  %2520 = vrot.lane.b32.xlu1 %v2519_v23, %s2620_s7 }
 0x29f   :  { %2510 = vrot.lane.b32.xlu0 %v2509_v38, %s2620_s7  ;;  %v727_v7 = vmul.f32 %v2956_v32, %v2939_v41  ;;  %v798_v8 = vmax.f32 %v3284_v5, 0.0  ;;  %v799_v45 = vmax.f32 %v3287_v22, 0.0  ;;  %v782_v24 = vmax.f32 %v3220_v52, 0.0 }
 0x2a0   :  { %v3309_v6 = vmax.f32 %v5134_v11, %v898_v47  ;;  %v3313_v49 = vmax.f32 %v5135_v39, %v897_v63  ;;  %v711_v50 = vmul.f32 %v2954_v28, %v2921_v12  ;;  %v710_v34 = vmul.f32 %v2954_v28, %v2919_v9 }
 0x2a1   :  { %v726_v43 = vmul.f32 %v2956_v32, %v2937_v51  ;;  %v2498_v41 = vunpack.i.h.bf16 %v3321_v19  ;;  %v2491_v17 = vpop.permute.xlu1 %2490  ;;  %v783_v53 = vmax.f32 %v3319_v26, 0.0  ;;  %v3340_v13 = vadd.f32 %v2979_v42, %v727_v7 }
 0x2a2   :  { %v933_v56 = vmax.f32 %v3313_v49, %v902_v37  ;;  %v949_v29 = vmax.f32 %v3309_v6, %v918_v46  ;;  %v2497_v37 = vunpack.i.l.bf16 %v3321_v19  ;;  %v2493_v2 = vunpack.i.h.bf16 %v2491_v17 }
 0x2a3   :  { %v2492_v12 = vunpack.i.l.bf16 %v2491_v17  ;;  %v2529_v9 = vpack.i.bf16 %v798_v8, %v782_v24  ;;  %v2534_v51 = vpack.i.bf16 %v799_v45, %v783_v53  ;;  %v3354_v28 = vadd.f32 %v2952_v21, %v711_v50 }
 0x2a4   :  { %v3342_v46 = vpack.c.bf16 %v949_v29, %v933_v56  ;;  %v2524_v33 = vpack.i.bf16 %v949_v29, %v933_v56  ;;  %v3357_v32 = vadd.f32 %v2979_v42, %v726_v43  ;;  %v878_v36 = vsel %vm868_vm8, %v2493_v2, %v2498_v41 }
 0x2a5   :  { %v880_v38 = vsel %vm868_vm8, %v2488_v14, %v2493_v2  ;;  %v877_v23 = vsel %vm868_vm8, %v2492_v12, %v2497_v37  ;;  %v879_v47 = vsel %vm868_vm8, %v2487_v48, %v2492_v12  ;;  %v5136_v63 = vmax.f32 %v3150_v0, 0.0 }
 0x2a6   :  { %v5137_v11 = vmax.f32 %v3118_v40, 0.0  ;;  %v5138_v19 = vmax.f32 %v3155_v16, 0.0  ;;  %v5139_v56 = vmax.f32 %v3130_v25, 0.0  ;;  %2530 = vrot.lane.b32.xlu2 %v2529_v9, %s2620_s7  ;;  %2535 = vrot.lane.b32.xlu1 %v2534_v51, %s2620_s7  ;;  %v801_v54 = vmax.f32 %v3340_v13, 0.0 }
 0x2a7   :  { %v926_v42 = vmax.f32 %v5136_v63, %v880_v38  ;;  %2525 = vrot.lane.b32.xlu0 %v2524_v33, %s2620_s7  ;;  %v3384_v0 = vadd.f32 %v2952_v21, %v710_v34  ;;  %v800_v25 = vmax.f32 %v3357_v32, 0.0  ;;  %v785_v50 = vmax.f32 %v3354_v28, 0.0 }
 0x2a8   :  { %v927_v39 = vmax.f32 %v5137_v11, %v878_v36  ;;  %v910_v7 = vmax.f32 %v5138_v19, %v879_v47  ;;  %v911_v14 = vmax.f32 %v5139_v56, %v877_v23  ;;  %v2549_v21 = vpack.i.bf16 %v3268_v60, %v3265_v59 }
 0x2a9   :  { %v957_v16 = vmax.f32 %v3247_v62, %v926_v42  ;;  %v784_v2 = vmax.f32 %v3384_v0, 0.0  ;;  %v2544_v13 = vpack.i.bf16 %v801_v54, %v785_v50  ;;  %v2559_v62 = vpack.i.bf16 %v3272_v27, %v3270_v57 }
 0x2aa   :  { %v942_v48 = vmax.f32 %v910_v7, %v911_v14  ;;  %v958_v40 = vmax.f32 %v926_v42, %v927_v39  ;;  %v941_v29 = vmax.f32 %v3253_v4, %v910_v7  ;;  %v5140_v11 = vmax.f32 %v3078_v1, 0.0 }
 0x2ab   :  { %v2539_v4 = vpack.i.bf16 %v800_v25, %v784_v2  ;;  %v5141_v7 = vmax.f32 %v3090_v58, 0.0 }
 0x2ac   :  { %v3390_v43 = vpack.c.bf16 %v957_v16, %v941_v29  ;;  %v3392_v17 = vpack.c.bf16 %v958_v40, %v942_v48  ;;  %v2564_v34 = vpack.i.bf16 %v958_v40, %v942_v48  ;;  %v2554_v12 = vpack.i.bf16 %v957_v16, %v941_v29 }
 0x2ae   :  { %2545 = vrot.lane.b32.xlu2 %v2544_v13, %s2620_s7  ;;  %2550 = vrot.lane.b32.xlu1 %v2549_v21, %s2620_s7 }
 0x2af   :  { %2540 = vrot.lane.b32.xlu0 %v2539_v4, %s2620_s7 }
 0x2b6   :  { %2560 = vrot.lane.b32.xlu2 %v2559_v62, %s2620_s7  ;;  %2565 = vrot.lane.b32.xlu1 %v2564_v34, %s2620_s7 }
 0x2b7   :  { %2555 = vrot.lane.b32.xlu0 %v2554_v12, %s2620_s7 }
 0x2ef   :  { %v2501_v59 = vpop.permute.xlu2 %2500 }
 0x2f0   :  { %v2503_v33 = vunpack.i.h.bf16 %v2501_v59  ;;  %v2502_v9 = vunpack.i.l.bf16 %v2501_v59 }
 0x2f8   :  { %v2516_v60 = vpop.permute.xlu2 %2515 }
 0x2f9   :  { %v2518_v51 = vunpack.i.h.bf16 %v2516_v60  ;;  %v2517_v28 = vunpack.i.l.bf16 %v2516_v60 }
 0x2fb   :  { %v1054_v36 = vsel %vm868_vm8, %v2518_v51, %v2503_v33  ;;  %v1053_v57 = vsel %vm868_vm8, %v2517_v28, %v2502_v9 }
 0x2fc   :  { %v1079_v27 = vpack.c.bf16 %v1054_v36, %v1053_v57 }
 0x2fe   :  { %1137 = vmatpush.bf16.msra.mxu1 %v1079_v27 }
 0x300   :  { %v3413_v38 = vpop.permute.xlu2 %2530 }
 0x301   :  { %v2533_v23 = vunpack.i.h.bf16 %v3413_v38  ;;  %v2532_v47 = vunpack.i.l.bf16 %v3413_v38 }
 0x302   :  { %1138 = vmatpush.bf16.msra.mxu1 %v3260_v10 }
 0x303   :  { %v876_v63 = vsel %vm868_vm8, %v2498_v41, %v2533_v23  ;;  %v875_v42 = vsel %vm868_vm8, %v2497_v37, %v2532_v47 }
 0x304   :  { %v3424_v19 = vmax.f32 %v5140_v11, %v876_v63  ;;  %v3428_v56 = vmax.f32 %v5141_v7, %v875_v42 }
 0x306   :  { %v943_v48 = vmax.f32 %v911_v14, %v3428_v56  ;;  %v959_v40 = vmax.f32 %v927_v39, %v3424_v19 }
 0x308   :  { %v3432_v29 = vpop.permute.xlu2 %2545  ;;  %v2579_v16 = vpack.i.bf16 %v959_v40, %v943_v48  ;;  %v3434_v13 = vpack.c.bf16 %v959_v40, %v943_v48  ;;  %v2506_v1 = vpop.permute.xlu1 %2505 }
 0x309   :  { %v2548_v41 = vunpack.i.h.bf16 %v3432_v29  ;;  %v2547_v37 = vunpack.i.l.bf16 %v3432_v29  ;;  %v2508_v21 = vunpack.i.h.bf16 %v2506_v1  ;;  %v2507_v4 = vunpack.i.l.bf16 %v2506_v1 }
 0x30a   :  { %2580 = vrot.lane.b32.xlu1 %v2579_v16, %s2620_s7 }
 0x30b   :  { %v899_v58 = vsel %vm868_vm8, %v2547_v37, %v2477_v30  ;;  %v900_v39 = vsel %vm868_vm8, %v2548_v41, %v2478_v15  ;;  %v1052_v34 = vsel %vm868_vm8, %v2503_v33, %v2508_v21  ;;  %v1051_v12 = vsel %vm868_vm8, %v2502_v9, %v2507_v4 }
 0x30c   :  { %v3451_v14 = vmax.f32 %v785_v50, %v899_v58  ;;  %v3453_v62 = vmax.f32 %v801_v54, %v900_v39  ;;  %v1080_v59 = vpack.c.bf16 %v1052_v34, %v1051_v12 }
 0x30e   :  { %v3461_v30 = vmax.f32 %v3451_v14, %v3313_v49  ;;  %v3465_v18 = vmax.f32 %v3453_v62, %v3309_v6  ;;  %1156 = vmatpush.bf16.msra.mxu2 %v1080_v59 }
 0x310   :  { %v3469_v54 = vpack.c.bf16 %v3465_v18, %v3461_v30  ;;  %v2521_v33 = vpop.permute.xlu1 %2520  ;;  %v2561_v11 = vpop.permute.xlu2 %2560 }
 0x311   :  { %v2511_v15 = vpop.permute.xlu0 %2510  ;;  %v2523_v36 = vunpack.i.h.bf16 %v2521_v33  ;;  %v2522_v9 = vunpack.i.l.bf16 %v2521_v33  ;;  %v2563_v1 = vunpack.i.h.bf16 %v2561_v11 }
 0x312   :  { %v2513_v50 = vunpack.i.h.bf16 %v2511_v15  ;;  %v2512_v60 = vunpack.i.l.bf16 %v2511_v15  ;;  %1157 = vmatpush.bf16.msra.mxu2 %v3262_v3 }
 0x313   :  { %v1049_v38 = vsel %vm868_vm8, %v2507_v4, %v2522_v9  ;;  %v1050_v63 = vsel %vm868_vm8, %v2508_v21, %v2523_v36  ;;  %v2562_v21 = vunpack.i.l.bf16 %v2561_v11  ;;  %v1048_v5 = vsel %vm868_vm8, %v2523_v36, %v2563_v1 }
 0x314   :  { %v1056_v57 = vsel %vm868_vm8, %v2513_v50, %v2518_v51  ;;  %v1055_v49 = vsel %vm868_vm8, %v2512_v60, %v2517_v28  ;;  %v3480_v42 = vpack.c.bf16 %v1050_v63, %v1049_v38 }
 0x315   :  { %v1078_v6 = vpack.c.bf16 %v1056_v57, %v1055_v49  ;;  %v1047_v52 = vsel %vm868_vm8, %v2522_v9, %v2562_v21 }
 0x316   :  { %1158 = vmatpush.bf16.msra.mxu2 %v1079_v27  ;;  %1175 = vmatpush.bf16.msra.mxu3 %v3480_v42 }
 0x317   :  { %1118 = vmatpush.bf16.msra.mxu0 %v1078_v6  ;;  %1139 = vmatpush.bf16.msra.mxu1 %v1078_v6  ;;  %v1082_v6 = vpack.c.bf16 %v1048_v5, %v1047_v52 }
 0x318   :  { %v2536_v51 = vpop.permute.xlu1 %2535 }
 0x319   :  { %v3483_v7 = vpop.permute.xlu0 %2525  ;;  %v2538_v28 = vunpack.i.h.bf16 %v2536_v51  ;;  %v2537_v48 = vunpack.i.l.bf16 %v2536_v51 }
 0x31a   :  { %v2528_v40 = vunpack.i.h.bf16 %v3483_v7  ;;  %v2527_v16 = vunpack.i.l.bf16 %v3483_v7  ;;  %1159 = vmatpush.bf16.msra.mxu2 %v3260_v10  ;;  %1176 = vmatpush.bf16.msra.mxu3 %v3276_v55  ;;  %v3506_v10 = vld [vmem:[%s5008_s2] sm:$0xff] }
 0x31b   :  { %1119 = vmatpush.bf16.msra.mxu0 %v3289_v61  ;;  %1140 = vmatpush.bf16.msra.mxu1 %v3289_v61  ;;  %v874_v27 = vsel %vm868_vm8, %v2533_v23, %v2538_v28  ;;  %v873_v4 = vsel %vm868_vm8, %v2532_v47, %v2537_v48 }
 0x31c   :  { %v1057_v58 = vsel %vm868_vm8, %v2527_v16, %v2512_v60  ;;  %v1058_v61 = vsel %vm868_vm8, %v2528_v40, %v2513_v50  ;;  %v929_v23 = vmax.f32 %v798_v8, %v874_v27  ;;  %v913_v47 = vmax.f32 %v782_v24, %v873_v4 }
 0x31d   :  { %v3512_v39 = vpack.c.bf16 %v1058_v61, %v1057_v58  ;;  %2400 = vmatmul.msk.bf16.vlgmr.msra.gmra.mxu2 %vm1107_vm9, %v3506_v10 }
 0x31e   :  { %2398 = vmatmul.msk.bf16.vlgmr.msra.gmra.mxu1 %vm1107_vm9, %v3506_v10  ;;  %v944_v34 = vmax.f32 %v3428_v56, %v913_v47  ;;  %v960_v12 = vmax.f32 %v3424_v19, %v929_v23  ;;  %1177 = vmatpush.bf16.msra.mxu3 %v1080_v59 }
 0x31f   :  { %1120 = vmatpush.bf16.msra.mxu0 %v3512_v39 }
 0x320   :  { %v2551_v8 = vpop.permute.xlu1 %2550  ;;  %v2569_v15 = vpack.i.bf16 %v960_v12, %v944_v34  ;;  %v3525_v50 = vpack.c.bf16 %v960_v12, %v944_v34 }
 0x321   :  { %v2541_v24 = vpop.permute.xlu0 %2540  ;;  %v2553_v60 = vunpack.i.h.bf16 %v2551_v8  ;;  %v2552_v33 = vunpack.i.l.bf16 %v2551_v8 }
 0x322   :  { %v2543_v57 = vunpack.i.h.bf16 %v2541_v24  ;;  %v2542_v49 = vunpack.i.l.bf16 %v2541_v24  ;;  %2570 = vrot.lane.b32.xlu0 %v2569_v15, %s2620_s7  ;;  %1178 = vmatpush.bf16.msra.mxu3 %v3262_v3 }
 0x323   :  { %1121 = vmatpush.bf16.msra.mxu0 %v3342_v46  ;;  %v1046_v19 = vsel %vm868_vm8, %v2563_v1, %v2553_v60  ;;  %v1045_v56 = vsel %vm868_vm8, %v2562_v21, %v2552_v33 }
 0x324   :  { %v870_v59 = vsel %vm868_vm8, %v2543_v57, %v2548_v41  ;;  %v872_v36 = vsel %vm868_vm8, %v2538_v28, %v2543_v57  ;;  %v1083_v9 = vpack.c.bf16 %v1046_v19, %v1045_v56  ;;  %v869_v11 = vsel %vm868_vm8, %v2542_v49, %v2547_v37 }
 0x325   :  { %v930_v38 = vmax.f32 %v799_v45, %v872_v36  ;;  %v931_v63 = vmax.f32 %v800_v25, %v870_v59  ;;  %v871_v41 = vsel %vm868_vm8, %v2537_v48, %v2542_v49  ;;  %v915_v51 = vmax.f32 %v784_v2, %v869_v11  ;;  %2402 = vmatmul.msk.bf16.vlgmr.msra.gmra.mxu3 %vm1107_vm9, %v3506_v10 }
 0x326   :  { %2396 = vmatmul.msk.bf16.vlgmr.msra.gmra.mxu0 %vm1107_vm9, %v3506_v10  ;;  %v914_v3 = vmax.f32 %v783_v53, %v871_v41  ;;  %1213 = vmatpush.bf16.msrb.mxu1 %v1083_v9 }
 0x327   :  { %1194 = vmatpush.bf16.msrb.mxu0 %v1082_v6  ;;  %v961_v22 = vmax.f32 %v929_v23, %v930_v38  ;;  %v963_v45 = vmax.f32 %v931_v63, %v3453_v62  ;;  %v962_v32 = vmax.f32 %v930_v38, %v931_v63  ;;  %v947_v25 = vmax.f32 %v915_v51, %v3451_v14  ;;  %v3575_v23 = vld [vmem:[%s5008_s2 + $0x8] sm:$0xff] }
 0x328   :  { %v2566_v0 = vpop.permute.xlu1 %2565  ;;  %v945_v29 = vmax.f32 %v913_v47, %v914_v3  ;;  %v946_v37 = vmax.f32 %v914_v3, %v915_v51 }
 0x329   :  { %v2556_v2 = vpop.permute.xlu0 %2555  ;;  %v2568_v28 = vunpack.i.h.bf16 %v2566_v0  ;;  %v2567_v48 = vunpack.i.l.bf16 %v2566_v0  ;;  %v2594_v62 = vpack.i.bf16 %v963_v45, %v947_v25  ;;  %v3583_v5 = vpack.c.bf16 %v963_v45, %v947_v25 }
 0x32a   :  { %v2558_v26 = vunpack.i.h.bf16 %v2556_v2  ;;  %v2557_v53 = vunpack.i.l.bf16 %v2556_v2  ;;  %1214 = vmatpush.bf16.msrb.mxu1 %v3301_v31  ;;  %v2574_v1 = vpack.i.bf16 %v961_v22, %v945_v29  ;;  %v2584_v21 = vpack.i.bf16 %v962_v32, %v946_v37 }
 0x32b   :  { %1195 = vmatpush.bf16.msrb.mxu0 %v3278_v44  ;;  %v3562_v27 = vpack.c.bf16 %v961_v22, %v945_v29  ;;  %2595 = vrot.lane.b32.xlu1 %v2594_v62, %s2620_s7  ;;  %v3579_v12 = vpack.c.bf16 %v962_v32, %v946_v37 }
 0x32c   :  { %v1042_v14 = vsel %vm868_vm8, %v2558_v26, %v2568_v28  ;;  %v1044_v4 = vsel %vm868_vm8, %v2553_v60, %v2558_v26  ;;  %v1041_v58 = vsel %vm868_vm8, %v2557_v53, %v2567_v48  ;;  %v1043_v61 = vsel %vm868_vm8, %v2552_v33, %v2557_v53  ;;  %2575 = vrot.lane.b32.xlu2 %v2574_v1, %s2620_s7 }
 0x32d   :  { %v1084_v47 = vpack.c.bf16 %v1044_v4, %v1043_v61  ;;  %v1085_v34 = vpack.c.bf16 %v1042_v14, %v1041_v58  ;;  %2585 = vrot.lane.b32.xlu0 %v2584_v21, %s2620_s7  ;;  %2401 = vmatmul.msk.bf16.gmra.mxu2 %vm1107_vm9, %v3575_v23 }
 0x32e   :  { %1215 = vmatpush.bf16.msrb.mxu1 %v1082_v6 }
 0x32f   :  { %1196 = vmatpush.bf16.msrb.mxu0 %v3480_v42  ;;  %1232 = vmatpush.bf16.msrb.mxu2 %v1084_v47  ;;  %v2589_v42 = vpack.i.bf16 %v3465_v18, %v3461_v30 }
 0x330   :  { %1251 = vmatpush.bf16.msrb.mxu3 %v1085_v34  ;;  %2399 = vmatmul.msk.bf16.gmra.mxu1 %vm1107_vm9, %v3575_v23 }
 0x332   :  { %1216 = vmatpush.bf16.msrb.mxu1 %v3278_v44 }
 0x333   :  { %1197 = vmatpush.bf16.msrb.mxu0 %v3276_v55  ;;  %1233 = vmatpush.bf16.msrb.mxu2 %v3305_v35 }
 0x334   :  { %1252 = vmatpush.bf16.msrb.mxu3 %v3390_v43  ;;  %2590 = vrot.lane.b32.xlu2 %v2589_v42, %s2620_s7 }
 0x335   :  { %2403 = vmatmul.msk.bf16.gmra.mxu3 %vm1107_vm9, %v3575_v23 }
 0x336   :  { %2397 = vmatmul.msk.bf16.gmra.mxu0 %vm1107_vm9, %v3575_v23 }
 0x337   :  { %1234 = vmatpush.bf16.msrb.mxu2 %v1083_v9 }
 0x338   :  { %1253 = vmatpush.bf16.msrb.mxu3 %v1084_v47 }
 0x33b   :  { %1235 = vmatpush.bf16.msrb.mxu2 %v3301_v31 }
 0x33c   :  { %1254 = vmatpush.bf16.msrb.mxu3 %v3305_v35 }
 0x33e   :  { %2408 = vmatmul.msk.bf16.vlgmr.msrb.gmra.mxu2 %vm1107_vm9, %v3506_v10 }
 0x340   :  { %2406 = vmatmul.msk.bf16.vlgmr.msrb.gmra.mxu1 %vm1107_vm9, %v3506_v10 }
 0x345   :  { %2410 = vmatmul.msk.bf16.vlgmr.msrb.gmra.mxu3 %vm1107_vm9, %v3506_v10 }
 0x346   :  { %2404 = vmatmul.msk.bf16.vlgmr.msrb.gmra.mxu0 %vm1107_vm9, %v3506_v10 }
 0x34e   :  { %2409 = vmatmul.msk.bf16.gmra.mxu2 %vm1107_vm9, %v3575_v23 }
 0x350   :  { %2407 = vmatmul.msk.bf16.gmra.mxu1 %vm1107_vm9, %v3575_v23 }
 0x355   :  { %2411 = vmatmul.msk.bf16.gmra.mxu3 %vm1107_vm9, %v3575_v23 }
 0x356   :  { %2405 = vmatmul.msk.bf16.gmra.mxu0 %vm1107_vm9, %v3575_v23 }
 0x37c   :  { %v2581_v55 = vpop.permute.xlu1 %2580 }
 0x37d   :  { %v2583_v44 = vunpack.i.h.bf16 %v2581_v55  ;;  %v2582_v31 = vunpack.i.l.bf16 %v2581_v55 }
 0x37f   :  { %v1039_v35 = vsel %vm868_vm8, %v2567_v48, %v2582_v31  ;;  %v1040_v30 = vsel %vm868_vm8, %v2568_v28, %v2583_v44 }
 0x380   :  { %v1086_v18 = vpack.c.bf16 %v1040_v30, %v1039_v35 }
 0x382   :  { %1270 = vmatpush.bf16.msra.mxu0 %v1086_v18 }
 0x386   :  { %1271 = vmatpush.bf16.msra.mxu0 %v3392_v17  ;;  %v2576_v52 = vpop.permute.xlu2 %2575 }
 0x387   :  { %v2578_v24 = vunpack.i.h.bf16 %v2576_v52  ;;  %v2577_v15 = vunpack.i.l.bf16 %v2576_v52 }
 0x38a   :  { %1272 = vmatpush.bf16.msra.mxu0 %v1085_v34 }
 0x38e   :  { %1273 = vmatpush.bf16.msra.mxu0 %v3390_v43  ;;  %v2591_v59 = vpop.permute.xlu2 %2590 }
 0x38f   :  { %v2593_v9 = vunpack.i.h.bf16 %v2591_v59  ;;  %v2592_v38 = vunpack.i.l.bf16 %v2591_v59 }
 0x391   :  { %2412 = vmatmul.msk.bf16.vlgmr.msra.gmra.mxu0 %vm1107_vm9, %v3506_v10  ;;  %v1059_v2 = vsel %vm868_vm8, %v2592_v38, %v2527_v16  ;;  %v1060_v29 = vsel %vm868_vm8, %v2593_v9, %v2528_v40 }
 0x392   :  { %v1092_v53 = vpack.c.bf16 %v1060_v29, %v1059_v2 }
 0x394   :  { %v2571_v8 = vpop.permute.xlu0 %2570 }
 0x395   :  { %v2573_v60 = vunpack.i.h.bf16 %v2571_v8  ;;  %v2572_v33 = vunpack.i.l.bf16 %v2571_v8 }
 0x397   :  { %v1038_v57 = vsel %vm868_vm8, %v2583_v44, %v2573_v60  ;;  %v1035_v49 = vsel %vm868_vm8, %v2572_v33, %v2577_v15  ;;  %v1036_v6 = vsel %vm868_vm8, %v2573_v60, %v2578_v24  ;;  %v1037_v43 = vsel %vm868_vm8, %v2582_v31, %v2572_v33 }
 0x398   :  { %v1087_v19 = vpack.c.bf16 %v1038_v57, %v1037_v43  ;;  %v1088_v56 = vpack.c.bf16 %v1036_v6, %v1035_v49 }
 0x39a   :  { %1289 = vmatpush.bf16.msra.mxu1 %v1087_v19  ;;  %1308 = vmatpush.bf16.msra.mxu2 %v1088_v56 }
 0x39b   :  { %v1142_v16 = vpop.f32.mrf.mxu1 }
 0x39d   :  { %v2596_v36 = vpop.permute.xlu1 %2595 }
 0x39e   :  { %1290 = vmatpush.bf16.msra.mxu1 %v3434_v13  ;;  %1309 = vmatpush.bf16.msra.mxu2 %v3525_v50  ;;  %v2598_v63 = vunpack.i.h.bf16 %v2596_v36  ;;  %v2597_v11 = vunpack.i.l.bf16 %v2596_v36 }
 0x39f   :  { %v2586_v41 = vpop.permute.xlu0 %2585 }
 0x3a0   :  { %v2588_v51 = vunpack.i.h.bf16 %v2586_v41  ;;  %v2587_v3 = vunpack.i.l.bf16 %v2586_v41  ;;  %v1030_v22 = vsel %vm868_vm8, %v2598_v63, %v2593_v9  ;;  %v1029_v45 = vsel %vm868_vm8, %v2597_v11, %v2592_v38  ;;  %v1161_v1 = vpop.f32.mrf.mxu2 }
 0x3a1   :  { %2413 = vmatmul.msk.bf16.gmra.mxu0 %vm1107_vm9, %v3575_v23  ;;  %v1091_v26 = vpack.c.bf16 %v1030_v22, %v1029_v45 }
 0x3a2   :  { %v1032_v32 = vsel %vm868_vm8, %v2588_v51, %v2598_v63  ;;  %v1034_v25 = vsel %vm868_vm8, %v2578_v24, %v2588_v51  ;;  %v1031_v0 = vsel %vm868_vm8, %v2587_v3, %v2597_v11  ;;  %1291 = vmatpush.bf16.msra.mxu1 %v1086_v18  ;;  %v1033_v37 = vsel %vm868_vm8, %v2577_v15, %v2587_v3 }
 0x3a3   :  { %v1090_v28 = vpack.c.bf16 %v1032_v32, %v1031_v0  ;;  %1310 = vmatpush.bf16.msra.mxu2 %v1087_v19  ;;  %v1089_v48 = vpack.c.bf16 %v1034_v25, %v1033_v37  ;;  %v1123_v7 = vpop.f32.mrf.mxu0 }
 0x3a5   :  { %1346 = vmatpush.bf16.msrb.mxu0 %v1090_v28  ;;  %1327 = vmatpush.bf16.msra.mxu3 %v1089_v48 }
 0x3a6   :  { %1292 = vmatpush.bf16.msra.mxu1 %v3392_v17  ;;  %v2336_v17 = vld [vmem:[%s5006_s0 + $0x5] ss:$8 sm:$0xf] }
 0x3a7   :  { %1311 = vmatpush.bf16.msra.mxu2 %v3434_v13  ;;  %v2337_v13 = vld [vmem:[%s5006_s0 + $0x5] ss:$8 sm:$0xf0] }
 0x3a8   :  { %v3674_v40 = vor.u32 %v2337_v13, %v2336_v17  ;;  %v1163_v61 = vpop.f32.mrf.mxu2 }
 0x3a9   :  { %1347 = vmatpush.bf16.msrb.mxu0 %v3579_v12  ;;  %2414 = vmatmul.msk.bf16.vlgmr.msra.gmra.mxu1 %vm1107_vm9, %v3506_v10 }
 0x3aa   :  { %1365 = vmatpush.bf16.msrb.mxu1 %v1091_v26  ;;  %1328 = vmatpush.bf16.msra.mxu3 %v3562_v27  ;;  %v1424_v62 = vperm.slane %v3674_v40, 0  ;;  %v1425_v14 = vperm.slane %v3674_v40, 1  ;;  %v1426_v4 = vperm.slane %v3674_v40, 2  ;;  %v1427_v58 = vperm.slane %v3674_v40, 3 }
 0x3ab   :  { %1384 = vmatpush.bf16.msrb.mxu2 %v1092_v53  ;;  %v1125_v21 = vpop.f32.mrf.mxu0 }
 0x3ac   :  { %2416 = vmatmul.msk.bf16.vlgmr.msra.gmra.mxu2 %vm1107_vm9, %v3506_v10  ;;  %v3699_v34 = vmul.f32 %v1426_v4, %v1161_v1  ;;  %v3706_v31 = vmul.f32 %v1424_v62, %v1125_v21  ;;  %v3720_v57 = vmul.f32 %v1426_v4, %v1163_v61 }
 0x3ad   :  { %1348 = vmatpush.bf16.msrb.mxu0 %v1089_v48 }
 0x3ae   :  { %1366 = vmatpush.bf16.msrb.mxu1 %v3583_v5  ;;  %1329 = vmatpush.bf16.msra.mxu3 %v1088_v56  ;;  %v1590_v44 = vmul.f32 %v3699_v34, %v1161_v1  ;;  %5142 = vst [vmem:[#allocation3_spill] sm:$0xff] %v3706_v31  ;;  %v1604_v15 = vmul.f32 %v3706_v31, %v1125_v21 }
 0x3af   :  { %1385 = vmatpush.bf16.msrb.mxu2 %v3469_v54  ;;  %5145 = vst [vmem:[#allocation6_spill] sm:$0xff] %v3720_v57  ;;  %v1606_v38 = vmul.f32 %v3720_v57, %v1163_v61 }
 0x3b0   :  { %v1166_v24 = vpop.f32.mrf.mxu2 }
 0x3b1   :  { %1349 = vmatpush.bf16.msrb.mxu0 %v3562_v27  ;;  %v1180_v27 = vpop.f32.mrf.mxu3  ;;  %v3729_v59 = vmul.f32 %v1426_v4, %v1166_v24 }
 0x3b2   :  { %1367 = vmatpush.bf16.msrb.mxu1 %v1090_v28  ;;  %1330 = vmatpush.bf16.msra.mxu3 %v3525_v50  ;;  %v3687_v50 = vmul.f32 %v1424_v62, %v1123_v7 }
 0x3b3   :  { %1386 = vmatpush.bf16.msrb.mxu2 %v1091_v26  ;;  %5149 = vst [vmem:[#allocation10_spill] sm:$0xff] %v3729_v59  ;;  %v1622_v11 = vmul.f32 %v3729_v59, %v1166_v24 }
 0x3b4   :  { %2420 = vmatmul.msk.bf16.vlgmr.msrb.gmra.mxu0 %vm1107_vm9, %v3506_v10  ;;  %v1588_v47 = vmul.f32 %v3687_v50, %v1123_v7 }
 0x3b5   :  { %2418 = vmatmul.msk.bf16.vlgmr.msra.gmra.mxu3 %vm1107_vm9, %v3506_v10 }
 0x3b6   :  { %1403 = vmatpush.bf16.msrb.mxu3 %v3512_v39  ;;  %1368 = vmatpush.bf16.msrb.mxu1 %v3579_v12  ;;  %v1144_v39 = vpop.f32.mrf.mxu1  ;;  %v3701_v12 = vmul.f32 %v1427_v58, %v1180_v27 }
 0x3b7   :  { %1387 = vmatpush.bf16.msrb.mxu2 %v3583_v5  ;;  %v1128_v5 = vpop.f32.mrf.mxu0 }
 0x3b8   :  { %v1591_v30 = vmul.f32 %v3701_v12, %v1180_v27  ;;  %v3709_v52 = vmul.f32 %v1424_v62, %v1128_v5  ;;  %v1168_v37 = vpop.f32.mrf.mxu2 }
 0x3b9   :  { %2415 = vmatmul.msk.bf16.gmra.mxu1 %vm1107_vm9, %v3575_v23  ;;  %v1182_v42 = vpop.f32.mrf.mxu3  ;;  %v3749_v48 = vmul.f32 %v1426_v4, %v1168_v37 }
 0x3ba   :  { %1404 = vmatpush.bf16.msrb.mxu3 %v3342_v46  ;;  %v3697_v46 = vmul.f32 %v1425_v14, %v1142_v16  ;;  %5143 = vst [vmem:[#allocation4_spill] sm:$0xff] %v3709_v52  ;;  %v3722_v49 = vmul.f32 %v1427_v58, %v1182_v42  ;;  %v1620_v19 = vmul.f32 %v3709_v52, %v1128_v5 }
 0x3bb   :  { %5152 = vst [vmem:[#allocation13_spill] sm:$0xff] %v3749_v48  ;;  %v1638_v13 = vmul.f32 %v3749_v48, %v1168_v37  ;;  %v1430_v37 = vperm.slane %v3674_v40, 6 }
 0x3bc   :  { %2417 = vmatmul.msk.bf16.gmra.mxu2 %vm1107_vm9, %v3575_v23  ;;  %v1589_v55 = vmul.f32 %v3697_v46, %v1142_v16  ;;  %5146 = vst [vmem:[#allocation7_spill] sm:$0xff] %v3722_v49  ;;  %v1607_v51 = vmul.f32 %v3722_v49, %v1182_v42  ;;  %v1520_v24 = vadd.f32 %v3697_v46, %v3687_v50 }
 0x3be   :  { %1405 = vmatpush.bf16.msrb.mxu3 %v1092_v53  ;;  %v1652_v35 = vadd.f32 %v1589_v55, %v1588_v47  ;;  %v1147_v18 = vpop.f32.mrf.mxu1 }
 0x3bf   :  { %v1130_v33 = vpop.f32.mrf.mxu0  ;;  %v3724_v6 = vmul.f32 %v1425_v14, %v1147_v18 }
 0x3c0   :  { %v1653_v8 = vadd.f32 %v1652_v35, %v1590_v44  ;;  %v3727_v56 = vmul.f32 %v1424_v62, %v1130_v33 }
 0x3c1   :  { %5147 = vst [vmem:[#allocation8_spill] sm:$0xff] %v3724_v6  ;;  %v1185_v43 = vpop.f32.mrf.mxu3  ;;  %v1621_v63 = vmul.f32 %v3724_v6, %v1147_v18 }
 0x3c2   :  { %1406 = vmatpush.bf16.msrb.mxu3 %v3469_v54  ;;  %v3714_v60 = vadd.f32 %v1653_v8, %v1591_v30  ;;  %v3718_v54 = vmul.f32 %v1425_v14, %v1144_v39  ;;  %5148 = vst [vmem:[#allocation9_spill] sm:$0xff] %v3727_v56  ;;  %v3731_v36 = vmul.f32 %v1427_v58, %v1185_v43 }
 0x3c3   :  { %v1636_v22 = vmul.f32 %v3727_v56, %v1130_v33  ;;  %v1686_v45 = vadd.f32 %v1621_v63, %v1620_v19  ;;  %v1428_v19 = vperm.slane %v3674_v40, 4 }
 0x3c4   :  { %2421 = vmatmul.msk.bf16.gmra.mxu0 %vm1107_vm9, %v3575_v23  ;;  %5144 = vst [vmem:[#allocation5_spill] sm:$0xff] %v3718_v54  ;;  %v1605_v9 = vmul.f32 %v3718_v54, %v1144_v39  ;;  %v1623_v32 = vmul.f32 %v3731_v36, %v1185_v43  ;;  %v1521_v43 = vadd.f32 %v1520_v24, %v3699_v34 }
 0x3c5   :  { %2419 = vmatmul.msk.bf16.gmra.mxu3 %vm1107_vm9, %v3575_v23  ;;  %5150 = vst [vmem:[#allocation11_spill] sm:$0xff] %v3731_v36  ;;  %v1687_v2 = vadd.f32 %v1686_v45, %v1622_v11  ;;  %v1554_v45 = vadd.f32 %v3724_v6, %v3709_v52 }
 0x3c6   :  { %v1669_v41 = vadd.f32 %v1605_v9, %v1604_v15  ;;  %v1149_v3 = vpop.f32.mrf.mxu1  ;;  %v1522_v63 = vadd.f32 %v1521_v43, %v3701_v12 }
 0x3c7   :  { %v3744_v25 = vmul.f32 %v1425_v14, %v1149_v3  ;;  %v3751_v53 = vadd.f32 %v1687_v2, %v1623_v32  ;;  %v1199_v21 = vpop.f32.mrf.mxu0  ;;  %v1237_v14 = vpop.f32.mrf.mxu2 }
 0x3c8   :  { %v1670_v0 = vadd.f32 %v1669_v41, %v1606_v38  ;;  %v1537_v38 = vadd.f32 %v3718_v54, %v3706_v31  ;;  %v3804_v11 = vmul.f32 %v1428_v19, %v1199_v21  ;;  %v1429_v41 = vperm.slane %v3674_v40, 5 }
 0x3c9   :  { %2422 = vmatmul.msk.bf16.vlgmr.msrb.gmra.mxu1 %vm1107_vm9, %v3506_v10  ;;  %5151 = vst [vmem:[#allocation12_spill] sm:$0xff] %v3744_v25  ;;  %v1637_v29 = vmul.f32 %v3744_v25, %v1149_v3  ;;  %v1187_v26 = vpop.f32.mrf.mxu3 }
 0x3ca   :  { %v3747_v28 = vadd.f32 %v1670_v0, %v1607_v51  ;;  %v3753_v17 = vmul.f32 %v1427_v58, %v1187_v26  ;;  %v1523_v0 = vadd.f32 %v1522_v63, %v3804_v11  ;;  %v1592_v2 = vmul.f32 %v3804_v11, %v1199_v21 }
 0x3cb   :  { %v1703_v7 = vadd.f32 %v1637_v29, %v1636_v22  ;;  %v1538_v22 = vadd.f32 %v1537_v38, %v3720_v57  ;;  %v3834_v63 = vmul.f32 %v1430_v37, %v1237_v14 }
 0x3cc   :  { %2424 = vmatmul.msk.bf16.vlgmr.msrb.gmra.mxu2 %vm1107_vm9, %v3506_v10  ;;  %5153 = vst [vmem:[#allocation14_spill] sm:$0xff] %v3753_v17  ;;  %v1639_v16 = vmul.f32 %v3753_v17, %v1187_v26  ;;  %v1571_v26 = vadd.f32 %v3744_v25, %v3727_v56  ;;  %v1655_v43 = vadd.f32 %v3714_v60, %v1592_v2 }
 0x3cd   :  { %v1704_v1 = vadd.f32 %v1703_v7, %v1638_v13 }
 0x3ce   :  { %v1218_v27 = vpop.f32.mrf.mxu1 }
 0x3cf   :  { %v3757_v62 = vadd.f32 %v1704_v1, %v1639_v16  ;;  %v1201_v39 = vpop.f32.mrf.mxu0  ;;  %v3769_v61 = vpop.f32.mrf.mxu2  ;;  %v3818_v29 = vmul.f32 %v1429_v41, %v1218_v27  ;;  %v1539_v16 = vadd.f32 %v1538_v22, %v3722_v49  ;;  %v1555_v1 = vadd.f32 %v1554_v45, %v3729_v59  ;;  %v2339_v22 = vld [vmem:[%s5006_s0 + $0x45] ss:$8 sm:$0xf0] }
 0x3d0   :  { %v3825_v13 = vmul.f32 %v1428_v19, %v1201_v39  ;;  %v1572_v45 = vadd.f32 %v1571_v26, %v3749_v48  ;;  %v1594_v49 = vmul.f32 %v3834_v63, %v1237_v14 }
 0x3d1   :  { %v3771_v47 = vpop.f32.mrf.mxu3  ;;  %v1524_v21 = vadd.f32 %v1523_v0, %v3818_v29  ;;  %v1593_v38 = vmul.f32 %v3818_v29, %v1218_v27  ;;  %v1431_v0 = vperm.slane %v3674_v40, 7  ;;  %v1556_v59 = vadd.f32 %v1555_v1, %v3731_v36 }
 0x3d2   :  { %5154 = vst [vmem:[#allocation15_spill] sm:$0xff] %v3825_v13  ;;  %v1608_v60 = vmul.f32 %v3825_v13, %v1201_v39  ;;  %v1540_v40 = vadd.f32 %v1539_v16, %v3825_v13  ;;  %v1573_v31 = vadd.f32 %v1572_v45, %v3753_v17 }
 0x3d3   :  { %v1656_v39 = vadd.f32 %v1655_v43, %v1593_v38  ;;  %v1525_v48 = vadd.f32 %v1524_v21, %v3834_v63  ;;  %v3880_v43 = vmul.f32 %v1430_v37, %v3769_v61 }
 0x3d5   :  { %2426 = vmatmul.msk.bf16.vlgmr.msrb.gmra.mxu3 %vm1107_vm9, %v3506_v10  ;;  %5160 = vst [vmem:[#allocation21_spill] sm:$0xff] %v3880_v43 }
 0x3d6   :  { %v3767_v4 = vpop.f32.mrf.mxu1 }
 0x3d7   :  { %v1204_v58 = vpop.f32.mrf.mxu0  ;;  %v3775_v42 = vpop.f32.mrf.mxu2  ;;  %v3848_v27 = vmul.f32 %v1429_v41, %v3767_v4 }
 0x3d8   :  { %v3829_v24 = vmul.f32 %v1428_v19, %v1204_v58  ;;  %v3887_v21 = vmul.f32 %v1430_v37, %v3775_v42 }
 0x3d9   :  { %2423 = vmatmul.msk.bf16.gmra.mxu1 %vm1107_vm9, %v3575_v23  ;;  %v3777_v55 = vpop.f32.mrf.mxu3  ;;  %5157 = vst [vmem:[#allocation18_spill] sm:$0xff] %v3848_v27  ;;  %v1609_v16 = vmul.f32 %v3848_v27, %v3767_v4  ;;  %v1541_v45 = vadd.f32 %v1540_v40, %v3848_v27 }
 0x3da   :  { %5155 = vst [vmem:[#allocation16_spill] sm:$0xff] %v3829_v24  ;;  %v1624_v6 = vmul.f32 %v3829_v24, %v1204_v58  ;;  %v1557_v14 = vadd.f32 %v1556_v59, %v3829_v24 }
 0x3db   :  { %5161 = vst [vmem:[#allocation22_spill] sm:$0xff] %v3887_v21 }
 0x3dc   :  { %2425 = vmatmul.msk.bf16.gmra.mxu2 %vm1107_vm9, %v3575_v23 }
 0x3de   :  { %v3773_v10 = vpop.f32.mrf.mxu1 }
 0x3df   :  { %v1206_v5 = vpop.f32.mrf.mxu0  ;;  %v3783_v35 = vpop.f32.mrf.mxu2  ;;  %v3857_v52 = vmul.f32 %v1429_v41, %v3773_v10 }
 0x3e0   :  { %v3843_v25 = vmul.f32 %v1428_v19, %v1206_v5  ;;  %v3859_v19 = vor.u32 %v2339_v22, %v2338_v20  ;;  %v1672_v20 = vadd.f32 %v3747_v28, %v1608_v60  ;;  %v3875_v22 = vmul.f32 %v1431_v0, %v3771_v47 }
 0x3e1   :  { %v3785_v30 = vpop.f32.mrf.mxu3  ;;  %5158 = vst [vmem:[#allocation19_spill] sm:$0xff] %v3857_v52  ;;  %v1657_v28 = vadd.f32 %v1656_v39, %v1594_v49 }
 0x3e2   :  { %5156 = vst [vmem:[#allocation17_spill] sm:$0xff] %v3843_v25  ;;  %v1640_v1 = vmul.f32 %v3843_v25, %v1206_v5  ;;  %v1689_v5 = vadd.f32 %v3751_v53, %v1624_v6  ;;  %v1526_v38 = vadd.f32 %v1525_v48, %v3875_v22  ;;  %v3892_v4 = vperm.slane %v3859_v19, 0 }
 0x3e3   :  { %v1574_v60 = vadd.f32 %v1573_v31, %v3843_v25  ;;  %v3899_v53 = vmul.f32 %v1430_v37, %v3783_v35  ;;  %v1595_v49 = vmul.f32 %v3875_v22, %v3771_v47  ;;  %v1610_v48 = vmul.f32 %v3880_v43, %v3769_v61 }
 0x3e4   :  { %v1706_v59 = vadd.f32 %v3757_v62, %v1640_v1  ;;  %v3906_v40 = vperm.slane %v3859_v19, 1  ;;  %v3913_v62 = vmul.f32 %v1431_v0, %v3777_v55  ;;  %v1626_v47 = vmul.f32 %v3887_v21, %v3775_v42 }
 0x3e5   :  { %2427 = vmatmul.msk.bf16.gmra.mxu3 %vm1107_vm9, %v3575_v23  ;;  %5162 = vst [vmem:[#allocation23_spill] sm:$0xff] %v3899_v53  ;;  %v1542_v1 = vadd.f32 %v1541_v45, %v3880_v43  ;;  %v1658_v45 = vadd.f32 %v1657_v28, %v1595_v49  ;;  %v3944_v43 = vperm.slane %v3859_v19, 3 }
 0x3e6   :  { %v3779_v44 = vpop.f32.mrf.mxu1  ;;  %5163 = vst [vmem:[#allocation24_spill] sm:$0xff] %v3913_v62 }
 0x3e7   :  { %v3869_v58 = vmul.f32 %v1429_v41, %v3779_v44  ;;  %v1625_v41 = vmul.f32 %v3857_v52, %v3773_v10  ;;  %v1673_v10 = vadd.f32 %v1672_v20, %v1609_v16  ;;  %v3924_v20 = vmul.f32 %v1431_v0, %v3785_v30 }
 0x3e8   :  { %v3927_v16 = vperm.slane %v3859_v19, 2 }
 0x3e9   :  { %v3799_v9 = vpop.f32.mrf.mxu3  ;;  %5159 = vst [vmem:[#allocation20_spill] sm:$0xff] %v3869_v58  ;;  %v1641_v6 = vmul.f32 %v3869_v58, %v3779_v44  ;;  %v1558_v44 = vadd.f32 %v1557_v14, %v3857_v52  ;;  %v1690_v37 = vadd.f32 %v1689_v5, %v1625_v41  ;;  %v1575_v25 = vadd.f32 %v1574_v60, %v3869_v58 }
 0x3ea   :  { %5164 = vst [vmem:[#allocation25_spill] sm:$0xff] %v3924_v20  ;;  %v1642_v14 = vmul.f32 %v3899_v53, %v3783_v35  ;;  %v3933_v42 = vmul.f32 %v1431_v0, %v3799_v9  ;;  %v1674_v52 = vadd.f32 %v1673_v10, %v1610_v48  ;;  %v1611_v60 = vmul.f32 %v3913_v62, %v3777_v55 }
 0x3eb   :  { %v1707_v17 = vadd.f32 %v1706_v59, %v1641_v6  ;;  %v1559_v35 = vadd.f32 %v1558_v44, %v3887_v21  ;;  %v1691_v0 = vadd.f32 %v1690_v37, %v1626_v47  ;;  %v1627_v6 = vmul.f32 %v3924_v20, %v3785_v30 }
 0x3ec   :  { %5165 = vst [vmem:[#allocation26_spill] sm:$0xff] %v3933_v42  ;;  %v1543_v55 = vadd.f32 %v1542_v1, %v3913_v62  ;;  %v1576_v48 = vadd.f32 %v1575_v25, %v3899_v53  ;;  %v1643_v37 = vmul.f32 %v3933_v42, %v3799_v9  ;;  %v3976_v58 = vperm.slane %v3859_v19, 4 }
 0x3ed   :  { %v1708_v44 = vadd.f32 %v1707_v17, %v1642_v14  ;;  %v1675_v1 = vadd.f32 %v1674_v52, %v1611_v60  ;;  %v1560_v25 = vadd.f32 %v1559_v35, %v3924_v20  ;;  %v1692_v9 = vadd.f32 %v1691_v0, %v1627_v6 }
 0x3ee   :  { %v3991_v62 = vperm.slane %v3859_v19, 5  ;;  %v3994_v52 = vadd.f32 %v1576_v48, %v3933_v42  ;;  %v4012_v48 = vperm.slane %v3859_v19, 6 }
 0x3ef   :  { %v3996_v60 = vadd.f32 %v1708_v44, %v1643_v37 }
 0x40e   :  { %v3781_v23 = vpop.f32.mrf.mxu0 }
 0x40f   :  { %v3921_v61 = vmul.f32 %v3892_v4, %v3781_v23 }
 0x411   :  { %v1527_v28 = vadd.f32 %v1526_v38, %v3921_v61  ;;  %v1596_v38 = vmul.f32 %v3921_v61, %v3781_v23 }
 0x416   :  { %v3789_v8 = vpop.f32.mrf.mxu0 }
 0x417   :  { %v3951_v59 = vmul.f32 %v3892_v4, %v3789_v8 }
 0x419   :  { %5166 = vst [vmem:[#allocation27_spill] sm:$0xff] %v3951_v59  ;;  %v1612_v17 = vmul.f32 %v3951_v59, %v3789_v8  ;;  %v1544_v44 = vadd.f32 %v1543_v55, %v3951_v59 }
 0x41b   :  { %v1676_v37 = vadd.f32 %v1675_v1, %v1612_v17 }
 0x41e   :  { %v3807_v51 = vpop.f32.mrf.mxu0 }
 0x41f   :  { %v3958_v49 = vmul.f32 %v3892_v4, %v3807_v51 }
 0x421   :  { %5167 = vst [vmem:[#allocation28_spill] sm:$0xff] %v3958_v49  ;;  %v1628_v14 = vmul.f32 %v3958_v49, %v3807_v51  ;;  %v1659_v51 = vadd.f32 %v1658_v45, %v1596_v38  ;;  %v1561_v38 = vadd.f32 %v1560_v25, %v3958_v49 }
 0x426   :  { %v3787_v18 = vpop.f32.mrf.mxu1  ;;  %v3850_v2 = vpop.f32.mrf.mxu0 }
 0x427   :  { %v3941_v24 = vmul.f32 %v3906_v40, %v3787_v18 }
 0x429   :  { %v1528_v30 = vadd.f32 %v1527_v28, %v3941_v24  ;;  %v1597_v8 = vmul.f32 %v3941_v24, %v3787_v18 }
 0x42b   :  { %v1660_v55 = vadd.f32 %v1659_v51, %v1597_v8  ;;  %v4041_v8 = vperm.slane %v3859_v19, 7  ;;  %v4045_v51 = vmul.f32 %v3892_v4, %v3850_v2 }
 0x42d   :  { %v1644_v13 = vmul.f32 %v4045_v51, %v3850_v2 }
 0x42e   :  { %v3795_v33 = vpop.f32.mrf.mxu1 }
 0x42f   :  { %v3793_v15 = vpop.f32.mrf.mxu2  ;;  %v3985_v23 = vmul.f32 %v3906_v40, %v3795_v33 }
 0x430   :  { %v3962_v10 = vmul.f32 %v3927_v16, %v3793_v15 }
 0x431   :  { %v3908_v39 = vpop.f32.mrf.mxu0  ;;  %5168 = vst [vmem:[#allocation29_spill] sm:$0xff] %v3985_v23  ;;  %v1613_v18 = vmul.f32 %v3985_v23, %v3795_v33  ;;  %v1545_v1 = vadd.f32 %v1544_v44, %v3985_v23 }
 0x432   :  { %v1529_v28 = vadd.f32 %v1528_v30, %v3962_v10  ;;  %v4009_v30 = vmul.f32 %v3976_v58, %v3908_v39  ;;  %v1598_v20 = vmul.f32 %v3962_v10, %v3793_v15 }
 0x434   :  { %5170 = vst [vmem:[#allocation31_spill] sm:$0xff] %v4009_v30  ;;  %v1600_v23 = vmul.f32 %v4009_v30, %v3908_v39 }
 0x436   :  { %v3814_v32 = vpop.f32.mrf.mxu1 }
 0x437   :  { %v3809_v3 = vpop.f32.mrf.mxu2  ;;  %v4033_v17 = vmul.f32 %v3906_v40, %v3814_v32 }
 0x438   :  { %v3823_v7 = vpop.f32.mrf.mxu3  ;;  %v4002_v35 = vmul.f32 %v3927_v16, %v3809_v3 }
 0x439   :  { %v3973_v47 = vmul.f32 %v3944_v43, %v3823_v7  ;;  %v1353_v53 = vpop.f32.mrf.mxu0  ;;  %5173 = vst [vmem:[#allocation34_spill] sm:$0xff] %v4033_v17  ;;  %v1629_v4 = vmul.f32 %v4033_v17, %v3814_v32 }
 0x43a   :  { %5169 = vst [vmem:[#allocation30_spill] sm:$0xff] %v4002_v35  ;;  %v1614_v33 = vmul.f32 %v4002_v35, %v3809_v3  ;;  %v1677_v3 = vadd.f32 %v1676_v37, %v1613_v18  ;;  %v4050_v49 = vmul.f32 %v3976_v58, %v1353_v53 }
 0x43b   :  { %v1530_v6 = vadd.f32 %v1529_v28, %v3973_v47  ;;  %v1693_v28 = vadd.f32 %v1692_v9, %v1628_v14  ;;  %v1599_v25 = vmul.f32 %v3973_v47, %v3823_v7  ;;  %v1661_v7 = vadd.f32 %v1660_v55, %v1598_v20 }
 0x43c   :  { %v1678_v59 = vadd.f32 %v1677_v3, %v1614_v33  ;;  %v1616_v33 = vmul.f32 %v4050_v49, %v1353_v53 }
 0x43d   :  { %v1531_v9 = vadd.f32 %v1530_v6, %v4009_v30  ;;  %v1546_v6 = vadd.f32 %v1545_v1, %v4002_v35  ;;  %v1662_v20 = vadd.f32 %v1661_v7, %v1599_v25  ;;  %v1694_v2 = vadd.f32 %v1693_v28, %v1629_v4 }
 0x43e   :  { %v3861_v26 = vpop.f32.mrf.mxu1 }
 0x43f   :  { %v3852_v56 = vpop.f32.mrf.mxu2  ;;  %v4077_v25 = vmul.f32 %v3906_v40, %v3861_v26  ;;  %v1663_v57 = vadd.f32 %v1662_v20, %v1600_v23 }
 0x440   :  { %v3871_v36 = vpop.f32.mrf.mxu3  ;;  %v4060_v37 = vmul.f32 %v3927_v16, %v3852_v56 }
 0x441   :  { %v4019_v42 = vmul.f32 %v3944_v43, %v3871_v36  ;;  %v1356_v1 = vpop.f32.mrf.mxu0  ;;  %v1645_v30 = vmul.f32 %v4077_v25, %v3861_v26 }
 0x442   :  { %v1630_v53 = vmul.f32 %v4060_v37, %v3852_v56 }
 0x443   :  { %5171 = vst [vmem:[#allocation32_spill] sm:$0xff] %v4019_v42  ;;  %v1615_v44 = vmul.f32 %v4019_v42, %v3871_v36  ;;  %v1547_v55 = vadd.f32 %v1546_v6, %v4019_v42 }
 0x444   :  { %v1695_v28 = vadd.f32 %v1694_v2, %v1630_v53 }
 0x445   :  { %v1548_v40 = vadd.f32 %v1547_v55, %v4050_v49 }
 0x446   :  { %v3937_v41 = vpop.f32.mrf.mxu1 }
 0x447   :  { %v3910_v31 = vpop.f32.mrf.mxu2  ;;  %v4026_v27 = vmul.f32 %v3991_v62, %v3937_v41 }
 0x448   :  { %v3935_v5 = vpop.f32.mrf.mxu3 }
 0x449   :  { %5172 = vst [vmem:[#allocation33_spill] sm:$0xff] %v4026_v27  ;;  %v1532_v19 = vadd.f32 %v1531_v9, %v4026_v27  ;;  %v1679_v9 = vadd.f32 %v1678_v59, %v1615_v44  ;;  %v4070_v32 = vmul.f32 %v3944_v43, %v3935_v5  ;;  %v1601_v7 = vmul.f32 %v4026_v27, %v3937_v41 }
 0x44a   :  { %v1562_v59 = vadd.f32 %v1561_v38, %v4033_v17  ;;  %v4085_v44 = vmul.f32 %v3976_v58, %v1356_v1 }
 0x44b   :  { %v1631_v38 = vmul.f32 %v4070_v32, %v3935_v5 }
 0x44c   :  { %v1563_v41 = vadd.f32 %v1562_v59, %v4060_v37  ;;  %v1578_v59 = vadd.f32 %v3994_v52, %v4045_v51 }
 0x44e   :  { %v1372_v45 = vpop.f32.mrf.mxu1 }
 0x44f   :  { %v3978_v21 = vpop.f32.mrf.mxu2  ;;  %v4063_v36 = vmul.f32 %v3991_v62, %v1372_v45 }
 0x450   :  { %v4004_v0 = vpop.f32.mrf.mxu3  ;;  %v1470_v15 = vmul.f32 %v4012_v48, %v3978_v21 }
 0x451   :  { %v1549_v23 = vadd.f32 %v1548_v40, %v4063_v36 }
 0x452   :  { %v1533_v35 = vadd.f32 %v1532_v19, %v1470_v15  ;;  %v1617_v19 = vmul.f32 %v4063_v36, %v1372_v45  ;;  %v1602_v54 = vmul.f32 %v1470_v15, %v3978_v21  ;;  %v1664_v45 = vadd.f32 %v1663_v57, %v1601_v7 }
 0x453   :  { %v4098_v21 = vmul.f32 %v3927_v16, %v3910_v31  ;;  %v1632_v15 = vmul.f32 %v4085_v44, %v1356_v1  ;;  %v1564_v57 = vadd.f32 %v1563_v41, %v4070_v32 }
 0x454   :  { %v1665_v55 = vadd.f32 %v1664_v45, %v1602_v54  ;;  %v1710_v54 = vadd.f32 %v3996_v60, %v1644_v13 }
 0x455   :  { %v1565_v13 = vadd.f32 %v1564_v57, %v4085_v44 }
 0x456   :  { %v1375_v42 = vpop.f32.mrf.mxu1  ;;  %v1711_v2 = vadd.f32 %v1710_v54, %v1645_v30 }
 0x457   :  { %v1391_v14 = vpop.f32.mrf.mxu2  ;;  %v4102_v5 = vmul.f32 %v3991_v62, %v1375_v42 }
 0x458   :  { %v1408_v18 = vpop.f32.mrf.mxu3  ;;  %v1486_v3 = vmul.f32 %v4012_v48, %v1391_v14 }
 0x459   :  { %v1471_v39 = vmul.f32 %v4041_v8, %v1408_v18  ;;  %v1633_v53 = vmul.f32 %v4102_v5, %v1375_v42 }
 0x45a   :  { %v1618_v56 = vmul.f32 %v1486_v3, %v1391_v14  ;;  %v1550_v26 = vadd.f32 %v1549_v23, %v1486_v3  ;;  %v1646_v3 = vmul.f32 %v4098_v21, %v3910_v31 }
 0x45b   :  { %v1534_v6 = vadd.f32 %v1533_v35, %v1471_v39  ;;  %v1680_v35 = vadd.f32 %v1679_v9, %v1616_v33  ;;  %v1603_v27 = vmul.f32 %v1471_v39, %v1408_v18  ;;  %v1696_v18 = vadd.f32 %v1695_v28, %v1631_v38  ;;  %v1358_v9 = vpop.f32.mrf.mxu0 }
 0x45c   :  { %v4108_v39 = vmul.f32 %v3944_v43, %v4004_v0  ;;  %v4121_v40 = vmul.f32 %v3976_v58, %v1358_v9  ;;  %v1712_v42 = vadd.f32 %v1711_v2, %v1646_v3  ;;  %v1566_v58 = vadd.f32 %v1565_v13, %v4102_v5 }
 0x45d   :  { %1535 = vadd.xlane.f32.xlu0 %v1534_v6  ;;  %v1681_v4 = vadd.f32 %v1680_v35, %v1617_v19  ;;  %v1666_v7 = vadd.f32 %v1665_v55, %v1603_v27  ;;  %v1579_v19 = vadd.f32 %v1578_v59, %v4077_v25  ;;  %v1697_v60 = vadd.f32 %v1696_v18, %v1632_v15 }
 0x45e   :  { %v1647_v27 = vmul.f32 %v4108_v39, %v4004_v0  ;;  %v1377_v52 = vpop.f32.mrf.mxu1  ;;  %v1648_v28 = vmul.f32 %v4121_v40, %v1358_v9 }
 0x45f   :  { %v1394_v17 = vpop.f32.mrf.mxu2  ;;  %v1682_v16 = vadd.f32 %v1681_v4, %v1618_v56  ;;  %v1580_v31 = vadd.f32 %v1579_v19, %v4098_v21  ;;  %v1698_v56 = vadd.f32 %v1697_v60, %v1633_v53  ;;  %v4126_v30 = vmul.f32 %v3991_v62, %v1377_v52 }
 0x460   :  { %v1410_v20 = vpop.f32.mrf.mxu3  ;;  %v1502_v1 = vmul.f32 %v4012_v48, %v1394_v17  ;;  %v1713_v23 = vadd.f32 %v1712_v42, %v1647_v27  ;;  %v2621_v53 = vmov 0  }
 0x461   :  { %v1487_v14 = vmul.f32 %v4041_v8, %v1410_v20  ;;  %v1581_v45 = vadd.f32 %v1580_v31, %v4108_v39  ;;  %2599 = vset.pattern.permute.xlu0 %v2621_v53  ;;  %2600 = vset.pattern.permute.xlu2 %v2621_v53 }
 0x462   :  { %v1634_v41 = vmul.f32 %v1502_v1, %v1394_v17  ;;  %v1714_v57 = vadd.f32 %v1713_v23, %v1648_v28  ;;  %2601 = vset.pattern.permute.xlu1 %v2621_v53  ;;  %v1419_v53 = vld [vmem:[%s5009_s3 + $0x8] sm:$0xff] }
 0x463   :  { %v1619_v33 = vmul.f32 %v1487_v14, %v1410_v20  ;;  %v1551_v6 = vadd.f32 %v1550_v26, %v1487_v14  ;;  %v1567_v20 = vadd.f32 %v1566_v58, %v1502_v1  ;;  %v1649_v14 = vmul.f32 %v4126_v30, %v1377_v52 }
 0x464   :  { %v1699_v4 = vadd.f32 %v1698_v56, %v1634_v41  ;;  %v1582_v62 = vadd.f32 %v1581_v45, %v4121_v40 }
 0x465   :  { %1667 = vadd.xlane.f32.xlu0 %v1666_v7  ;;  %1552 = vadd.xlane.f32.xlu2 %v1551_v6  ;;  %v1683_v43 = vadd.f32 %v1682_v16, %v1619_v33  ;;  %v1715_v33 = vadd.f32 %v1714_v57, %v1649_v14 }
 0x466   :  { %v1583_v7 = vadd.f32 %v1582_v62, %v4126_v30 }
 0x467   :  { %1684 = vadd.xlane.f32.xlu1 %v1683_v43  ;;  %v1396_v35 = vpop.f32.mrf.mxu2 }
 0x468   :  { %v1413_v38 = vpop.f32.mrf.mxu3  ;;  %v1518_v17 = vmul.f32 %v4012_v48, %v1396_v35 }
 0x469   :  { %v1503_v0 = vmul.f32 %v4041_v8, %v1413_v38 }
 0x46a   :  { %v1650_v18 = vmul.f32 %v1518_v17, %v1396_v35  ;;  %v1584_v48 = vadd.f32 %v1583_v7, %v1518_v17 }
 0x46b   :  { %v1635_v15 = vmul.f32 %v1503_v0, %v1413_v38  ;;  %v1568_v26 = vadd.f32 %v1567_v20, %v1503_v0 }
 0x46c   :  { %v1716_v6 = vadd.f32 %v1715_v33, %v1650_v18 }
 0x46d   :  { %v1700_v55 = vadd.f32 %v1699_v4, %v1635_v15 }
 0x46f   :  { %1701 = vadd.xlane.f32.xlu2 %v1700_v55  ;;  %1569 = vadd.xlane.f32.xlu1 %v1568_v26 }
 0x470   :  { %v1415_v16 = vpop.f32.mrf.mxu3 }
 0x471   :  { %v1519_v9 = vmul.f32 %v4041_v8, %v1415_v16 }
 0x473   :  { %v1651_v59 = vmul.f32 %v1519_v9, %v1415_v16  ;;  %v1585_v54 = vadd.f32 %v1584_v48, %v1519_v9 }
 0x475   :  { %v1717_v1 = vadd.f32 %v1716_v6, %v1651_v59  ;;  %v1418_v59 = vld [vmem:[%s5009_s3] sm:$0xff] }
 0x477   :  { %1718 = vadd.xlane.f32.xlu0 %v1717_v1  ;;  %1586 = vadd.xlane.f32.xlu2 %v1585_v54 }
 0x4d0   :  { %v1536_v3 = vpop.xlane.xlu0 %1535 }
 0x4d1   :  { %v1720_v43 = vmul.f32 0.000739645, %v1536_v3 }
 0x4d3   :  { %v1728_v27 = vmul.f32 %v1720_v43, %v1720_v43 }
 0x4d8   :  { %v1668_v19 = vpop.xlane.xlu0 %1667  ;;  %v1553_v2 = vpop.xlane.xlu2 %1552 }
 0x4d9   :  { %v1724_v52 = vmul.f32 0.000739645, %v1668_v19  ;;  %v4137_v13 = vmul.f32 0.000739645, %v1553_v2 }
 0x4da   :  { %v1685_v8 = vpop.xlane.xlu1 %1684 }
 0x4db   :  { %v1732_v60 = vsub.f32 %v1724_v52, %v1728_v27  ;;  %v1729_v41 = vmul.f32 %v4137_v13, %v4137_v13  ;;  %v1725_v31 = vmul.f32 0.000739645, %v1685_v8 }
 0x4dd   :  { %v1736_v42 = vadd.f32 1e-05, %v1732_v60  ;;  %v1733_v35 = vsub.f32 %v1725_v31, %v1729_v41 }
 0x4df   :  { %2609 = vrsqrt.f32 %v1736_v42  ;;  %v1737_v38 = vadd.f32 1e-05, %v1733_v35  ;;  %vm1746_vm11 = vweird.f32 %v1736_v42 }
 0x4e1   :  { %2611 = vrsqrt.f32 %v1737_v38  ;;  %vm1756_vm14 = vweird.f32 %v1737_v38 }
 0x4e2   :  { %v1702_v56 = vpop.xlane.xlu2 %1701  ;;  %v1570_v0 = vpop.xlane.xlu1 %1569 }
 0x4e3   :  { %v1722_v58 = vmul.f32 0.000739645, %v1570_v0  ;;  %v1726_v23 = vmul.f32 0.000739645, %v1702_v56  ;;  %v1420_v0 = vld [vmem:[%s5009_s3 + $0x10] sm:$0xff] }
 0x4e5   :  { %v2610_v45 = vpop.eup %2609  ;;  %v1730_v28 = vmul.f32 %v1722_v58, %v1722_v58 }
 0x4e6   :  { %v1741_v17 = vmul.f32 %v2610_v45, %v1736_v42  ;;  %vm1747_vm10 = vweird.f32 %v2610_v45 }
 0x4e7   :  { %v2612_v15 = vpop.eup %2611  ;;  %v1734_v4 = vsub.f32 %v1726_v23, %v1730_v28  ;;  %vm1748_vm13 = vmor %vm1746_vm11, %vm1747_vm10 }
 0x4e8   :  { %v1742_v20 = vmul.f32 %v2610_v45, %v1741_v17  ;;  %v1751_v14 = vmul.f32 %v2612_v15, %v1737_v38  ;;  %vm1757_vm12 = vweird.f32 %v2612_v15 }
 0x4e9   :  { %v1738_v55 = vadd.f32 1e-05, %v1734_v4  ;;  %vm1758_vm15 = vmor %vm1756_vm14, %vm1757_vm12 }
 0x4ea   :  { %v1743_v26 = vmul.f32 0.5, %v1742_v20  ;;  %v1752_v62 = vmul.f32 %v2612_v15, %v1751_v14  ;;  %v1719_v57 = vpop.xlane.xlu0 %1718  ;;  %v1587_v18 = vpop.xlane.xlu2 %1586 }
 0x4eb   :  { %2613 = vrsqrt.f32 %v1738_v55  ;;  %v1723_v16 = vmul.f32 0.000739645, %v1587_v18  ;;  %v1727_v9 = vmul.f32 0.000739645, %v1719_v57  ;;  %vm1766_vm1 = vweird.f32 %v1738_v55 }
 0x4ec   :  { %v1744_v33 = vsub.f32 1.5, %v1743_v26  ;;  %v1753_v7 = vmul.f32 0.5, %v1752_v62  ;;  %v2622_v18 = vmov 1  }
 0x4ed   :  { %v1731_v48 = vmul.f32 %v1723_v16, %v1723_v16 }
 0x4ee   :  { %v1754_v6 = vsub.f32 1.5, %v1753_v7  ;;  %v1745_v1 = vmul.f32 %v2610_v45, %v1744_v33 }
 0x4ef   :  { %v1735_v54 = vsub.f32 %v1727_v9, %v1731_v48 }
 0x4f0   :  { %v1749_v3 = vsel %vm1748_vm13, %v2610_v45, %v1745_v1  ;;  %v1755_v19 = vmul.f32 %v2612_v15, %v1754_v6 }
 0x4f1   :  { %v2614_v2 = vpop.eup %2613  ;;  %v1739_v27 = vadd.f32 1e-05, %v1735_v54  ;;  %v1780_v52 = vmul.f32 %v1749_v3, %v1418_v59 }
 0x4f2   :  { %v1761_v8 = vmul.f32 %v2614_v2, %v1738_v55  ;;  %v1759_v60 = vsel %vm1758_vm15, %v2612_v15, %v1755_v19  ;;  %vm1767_vm0 = vweird.f32 %v2614_v2  ;;  %v1421_v55 = vld [vmem:[%s5009_s3 + $0x18] sm:$0xff] }
 0x4f3   :  { %2615 = vrsqrt.f32 %v1739_v27  ;;  %1810 = vperm.xlu0 %2599, %v1780_v52   ;;  %v1784_v41 = vmul.f32 %v1780_v52, %v1720_v43  ;;  %v1781_v31 = vmul.f32 %v1759_v60, %v1419_v53  ;;  %vm1768_vm2 = vmor %vm1766_vm1, %vm1767_vm0  ;;  %vm1776_vm4 = vweird.f32 %v1739_v27 }
 0x4f4   :  { %v1762_v42 = vmul.f32 %v2614_v2, %v1761_v8 }
 0x4f5   :  { %1792 = vrot.lane.b32.xlu1 %v1784_v41, %s2618_s6  ;;  %1815 = vperm.xlu2 %2600, %v1781_v31   ;;  %v1785_v28 = vmul.f32 %v1781_v31, %v4137_v13 }
 0x4f6   :  { %v1763_v35 = vmul.f32 0.5, %v1762_v42 }
 0x4f8   :  { %v1764_v38 = vsub.f32 1.5, %v1763_v35 }
 0x4f9   :  { %v2616_v56 = vpop.eup %2615 }
 0x4fa   :  { %v1765_v45 = vmul.f32 %v2614_v2, %v1764_v38  ;;  %v1771_v23 = vmul.f32 %v2616_v56, %v1739_v27  ;;  %vm1777_vm3 = vweird.f32 %v2616_v56 }
 0x4fb   :  { %vm1778_vm5 = vmor %vm1776_vm4, %vm1777_vm3  ;;  %2603 = vset.pattern.permute.xlu0 %v2622_v18 }
 0x4fc   :  { %v1769_v43 = vsel %vm1768_vm2, %v2614_v2, %v1765_v45  ;;  %v1772_v17 = vmul.f32 %v2616_v56, %v1771_v23 }
 0x4fd   :  { %v1782_v15 = vmul.f32 %v1769_v43, %v1420_v0  ;;  %1794 = vrot.lane.b32.xlu2 %v1785_v28, %s2618_s6 }
 0x4fe   :  { %v1773_v4 = vmul.f32 0.5, %v1772_v17 }
 0x4ff   :  { %v1786_v20 = vmul.f32 %v1782_v15, %v1722_v58  ;;  %1820 = vperm.xlu1 %2601, %v1782_v15  }
 0x500   :  { %v1774_v14 = vsub.f32 1.5, %v1773_v4 }
 0x501   :  { %1796 = vrot.lane.b32.xlu0 %v1786_v20, %s2618_s6 }
 0x502   :  { %v1775_v26 = vmul.f32 %v2616_v56, %v1774_v14 }
 0x504   :  { %v1779_v13 = vsel %vm1778_vm5, %v2616_v56, %v1775_v26 }
 0x505   :  { %v1783_v62 = vmul.f32 %v1779_v13, %v1421_v55 }
 0x507   :  { %v1787_v57 = vmul.f32 %v1783_v62, %v1723_v16  ;;  %1825 = vperm.xlu2 %2600, %v1783_v62   ;;  %2602 = vset.pattern.permute.xlu1 %v2622_v18 }
 0x509   :  { %1798 = vrot.lane.b32.xlu1 %v1787_v57, %s2618_s6 }
 0x50f   :  { %2604 = vset.pattern.permute.xlu2 %v2622_v18  ;;  %v5175_v18 = vld [vmem:[#allocation31_spill] sm:$0xff] }
 0x54f   :  { %v4158_v58 = vpop.permute.xlu2 %1815 }
 0x557   :  { %v1795_v33 = vpop.permute.xlu2 %1794 }
 0x558   :  { %v1805_v7 = vsub.f32 %v1419_v53, %v1795_v33 }
 0x55a   :  { %1891 = vperm.xlu0 %2603, %v1805_v7   ;;  %v5176_v7 = vld [vmem:[#allocation5_spill] sm:$0xff] }
 0x565   :  { %v1811_v6 = vpop.permute.xlu0 %1810 }
 0x566   :  { %v1829_v2 = vmul.f32 %v1811_v6, %v3697_v46  ;;  %v1828_v27 = vmul.f32 %v1811_v6, %v3687_v50  ;;  %v1830_v52 = vmul.f32 %v1811_v6, %v3699_v34  ;;  %v1832_v50 = vmul.f32 %v1811_v6, %v3804_v11 }
 0x567   :  { %v1793_v9 = vpop.permute.xlu1 %1792  ;;  %v1831_v46 = vmul.f32 %v1811_v6, %v3701_v12  ;;  %v1833_v34 = vmul.f32 %v1811_v6, %v3818_v29  ;;  %v1835_v12 = vmul.f32 %v1811_v6, %v3875_v22  ;;  %v1834_v29 = vmul.f32 %v1811_v6, %v3834_v63 }
 0x568   :  { %v1804_v48 = vsub.f32 %v1418_v59, %v1793_v9  ;;  %v1836_v23 = vmul.f32 %v1811_v6, %v3921_v61  ;;  %v1838_v63 = vmul.f32 %v1811_v6, %v3962_v10  ;;  %v1837_v61 = vmul.f32 %v1811_v6, %v3941_v24  ;;  %v5174_v24 = vld [vmem:[#allocation33_spill] sm:$0xff] }
 0x569   :  { %v1839_v20 = vmul.f32 %v1811_v6, %v3973_v47  ;;  %v1841_v47 = vmul.f32 %v1811_v6, %v5174_v24  ;;  %v1840_v33 = vmul.f32 %v1811_v6, %v5175_v18  ;;  %v1843_v9 = vmul.f32 %v4158_v58, %v5176_v7  ;;  %v5177_v6 = vld [vmem:[#allocation6_spill] sm:$0xff] }
 0x56a   :  { %1886 = vperm.xlu1 %2602, %v1804_v48  }
 0x571   :  { %v4160_v1 = vpop.permute.xlu1 %1820 }
 0x573   :  { %v1797_v54 = vpop.permute.xlu0 %1796 }
 0x574   :  { %v1806_v16 = vsub.f32 %v1420_v0, %v1797_v54 }
 0x576   :  { %1896 = vperm.xlu2 %2604, %v1806_v16  }
 0x57b   :  { %v1799_v3 = vpop.permute.xlu1 %1798 }
 0x57c   :  { %v1807_v19 = vsub.f32 %v1421_v55, %v1799_v3 }
 0x57e   :  { %1901 = vperm.xlu1 %2602, %v1807_v19  }
 0x5cc   :  { %v4237_v57 = vpop.permute.xlu0 %1891 }
 0x5cd   :  { %v4255_v16 = vadd.f32 %v4237_v57, %v1843_v9 }
 0x5dc   :  { %v1887_v53 = vpop.permute.xlu1 %1886 }
 0x5dd   :  { %v4165_v8 = vadd.f32 %v1887_v53, %v1829_v2  ;;  %v4167_v59 = vadd.f32 %v1887_v53, %v1828_v27  ;;  %v4169_v60 = vadd.f32 %v1887_v53, %v1830_v52  ;;  %v4186_v35 = vadd.f32 %v1887_v53, %v1832_v50  ;;  %v5178_v52 = vld [vmem:[#allocation3_spill] sm:$0xff] }
 0x5de   :  { %v4188_v38 = vadd.f32 %v1887_v53, %v1831_v46  ;;  %v4190_v56 = vadd.f32 %v1887_v53, %v1833_v34  ;;  %v4207_v28 = vadd.f32 %v1887_v53, %v1835_v12  ;;  %v4209_v43 = vadd.f32 %v1887_v53, %v1834_v29  ;;  %v5179_v50 = vld [vmem:[#allocation15_spill] sm:$0xff] }
 0x5df   :  { %v5096_v41 = vmax.f32 %v4165_v8, 0.0  ;;  %v5098_v31 = vmax.f32 %v4167_v59, 0.0  ;;  %v5095_v42 = vmax.f32 %v4169_v60, 0.0  ;;  %v5091_v0 = vmax.f32 %v4186_v35, 0.0 }
 0x5e0   :  { %v5093_v45 = vmax.f32 %v4188_v38, 0.0  ;;  %v5088_v11 = vmax.f32 %v4190_v56, 0.0  ;;  %v4211_v17 = vadd.f32 %v1887_v53, %v1836_v23  ;;  %v5084_v15 = vmax.f32 %v4207_v28, 0.0 }
 0x5e1   :  { %2024 = vrot.lane.b32.xlu1 %v5096_v41, %s2620_s7  ;;  %2016 = vrot.lane.b32.xlu2 %v5098_v31, %s2620_s7  ;;  %v5085_v4 = vmax.f32 %v4209_v43, 0.0  ;;  %v4228_v14 = vadd.f32 %v1887_v53, %v1838_v63  ;;  %v4230_v55 = vadd.f32 %v1887_v53, %v1837_v61  ;;  %v4232_v26 = vadd.f32 %v1887_v53, %v1839_v20  ;;  %v5180_v20 = vld [vmem:[#allocation18_spill] sm:$0xff] }
 0x5e2   :  { %2032 = vrot.lane.b32.xlu0 %v5095_v42, %s2620_s7  ;;  %v5082_v22 = vmax.f32 %v4211_v17, 0.0  ;;  %v1917_v48 = vadd.f32 %v1887_v53, %v1841_v47  ;;  %v4252_v54 = vadd.f32 %v1887_v53, %v1840_v33  ;;  %v5071_v2 = vmax.f32 %v4255_v16, 0.0  ;;  %v5181_v47 = vld [vmem:[#allocation7_spill] sm:$0xff]  ;;  %v5182_v33 = vld [vmem:[#allocation24_spill] sm:$0xff] }
 0x5e3   :  { %v5078_v13 = vmax.f32 %v4228_v14, 0.0  ;;  %v5079_v62 = vmax.f32 %v4230_v55, 0.0  ;;  %v5076_v10 = vmax.f32 %v4232_v26, 0.0  ;;  %v1844_v27 = vmul.f32 %v4158_v58, %v5177_v6 }
 0x5e4   :  { %v1973_v3 = vmax.f32 %v1917_v48, 0.0  ;;  %v5073_v19 = vmax.f32 %v4252_v54, 0.0  ;;  %v1842_v53 = vmul.f32 %v4158_v58, %v5178_v52  ;;  %v1846_v46 = vmul.f32 %v4158_v58, %v5179_v50  ;;  %v5183_v50 = vld [vmem:[#allocation27_spill] sm:$0xff] }
 0x5e5   :  { %v4273_v34 = vadd.f32 %v4237_v57, %v1844_v27  ;;  %v1847_v24 = vmul.f32 %v4158_v58, %v5180_v20  ;;  %v1845_v18 = vmul.f32 %v4158_v58, %v5181_v47  ;;  %v1849_v7 = vmul.f32 %v4158_v58, %v5182_v33  ;;  %v5184_v20 = vld [vmem:[#allocation21_spill] sm:$0xff]  ;;  %v5185_v47 = vld [vmem:[#allocation30_spill] sm:$0xff] }
 0x5e6   :  { %v4276_v12 = vadd.f32 %v4237_v57, %v1842_v53  ;;  %v4279_v29 = vadd.f32 %v4237_v57, %v1846_v46  ;;  %v4311_v53 = vpop.permute.xlu2 %1825  ;;  %v1850_v46 = vmul.f32 %v4158_v58, %v5183_v50 }
 0x5e7   :  { %v5065_v23 = vmax.f32 %v4273_v34, 0.0  ;;  %v4300_v9 = vadd.f32 %v4237_v57, %v1847_v24  ;;  %v4303_v48 = vadd.f32 %v4237_v57, %v1845_v18  ;;  %v1848_v24 = vmul.f32 %v4158_v58, %v5184_v20 }
 0x5e8   :  { %v5068_v63 = vmax.f32 %v4276_v12, 0.0  ;;  %v5067_v61 = vmax.f32 %v4279_v29, 0.0  ;;  %v1852_v18 = vmul.f32 %v4158_v58, %v5185_v47  ;;  %v4329_v33 = vadd.f32 %v4237_v57, %v1850_v46  ;;  %v5186_v46 = vld [vmem:[#allocation32_spill] sm:$0xff]  ;;  %v5187_v47 = vld [vmem:[#allocation29_spill] sm:$0xff] }
 0x5e9   :  { %2048 = vrot.lane.b32.xlu1 %v5091_v0, %s2620_s7  ;;  %2040 = vrot.lane.b32.xlu2 %v5093_v45, %s2620_s7  ;;  %v5063_v6 = vmax.f32 %v4300_v9, 0.0  ;;  %v5064_v27 = vmax.f32 %v4303_v48, 0.0 }
 0x5ea   :  { %2056 = vrot.lane.b32.xlu0 %v5088_v11, %s2620_s7  ;;  %v5069_v50 = vmax.f32 %v4329_v33, 0.0 }
 0x5f0   :  { %v4476_v45 = vpop.permute.xlu1 %1901 }
 0x5f1   :  { %2072 = vrot.lane.b32.xlu1 %v5084_v15, %s2620_s7  ;;  %2064 = vrot.lane.b32.xlu2 %v5085_v4, %s2620_s7 }
 0x5f2   :  { %2080 = vrot.lane.b32.xlu0 %v5082_v22, %s2620_s7 }
 0x5f9   :  { %2096 = vrot.lane.b32.xlu1 %v5078_v13, %s2620_s7  ;;  %2088 = vrot.lane.b32.xlu2 %v5079_v62, %s2620_s7 }
 0x5fa   :  { %2104 = vrot.lane.b32.xlu0 %v5076_v10, %s2620_s7 }
 0x601   :  { %2120 = vrot.lane.b32.xlu1 %v1973_v3, %s2620_s7  ;;  %2112 = vrot.lane.b32.xlu2 %v5073_v19, %s2620_s7  ;;  %v4306_v3 = vadd.f32 %v4237_v57, %v1849_v7  ;;  %v4332_v7 = vadd.f32 %v4237_v57, %v1848_v24  ;;  %v1853_v24 = vmul.f32 %v4158_v58, %v5186_v46 }
 0x602   :  { %2026 = vrot.lane.b32.xlu0 %v5071_v2, %s2620_s7 }
 0x603   :  { %v5066_v52 = vmax.f32 %v4306_v3, 0.0  ;;  %v5070_v20 = vmax.f32 %v4332_v7, 0.0 }
 0x609   :  { %2034 = vrot.lane.b32.xlu2 %v5065_v23, %s2620_s7  ;;  %2018 = vrot.lane.b32.xlu1 %v5068_v63, %s2620_s7  ;;  %v4340_v23 = vpop.permute.xlu2 %1896  ;;  %v4358_v63 = vadd.f32 %v4237_v57, %v1853_v24  ;;  %v5189_v24 = vld [vmem:[#allocation8_spill] sm:$0xff] }
 0x60a   :  { %2050 = vrot.lane.b32.xlu0 %v5067_v61, %s2620_s7 }
 0x60b   :  { %v5074_v46 = vmax.f32 %v4358_v63, 0.0 }
 0x611   :  { %2058 = vrot.lane.b32.xlu2 %v5063_v6, %s2620_s7  ;;  %2042 = vrot.lane.b32.xlu1 %v5064_v27, %s2620_s7  ;;  %v4335_v6 = vadd.f32 %v4237_v57, %v1852_v18  ;;  %v1851_v18 = vmul.f32 %v4158_v58, %v5187_v47 }
 0x612   :  { %2074 = vrot.lane.b32.xlu0 %v5066_v52, %s2620_s7  ;;  %v5188_v52 = vld [vmem:[#allocation4_spill] sm:$0xff] }
 0x613   :  { %v5072_v27 = vmax.f32 %v4335_v6, 0.0  ;;  %v1856_v61 = vmul.f32 %v4160_v1, %v5188_v52  ;;  %v1854_v52 = vmul.f32 %v4158_v58, %v4050_v49 }
 0x615   :  { %v4385_v19 = vadd.f32 %v4237_v57, %v1854_v52  ;;  %v5192_v52 = vld [vmem:[#allocation10_spill] sm:$0xff] }
 0x617   :  { %5191 = vst [vmem:[#allocation33_spill] sm:$0xff] %v4385_v19  ;;  %v5080_v49 = vmax.f32 %v4385_v19, 0.0 }
 0x619   :  { %2082 = vrot.lane.b32.xlu2 %v5069_v50, %s2620_s7  ;;  %2066 = vrot.lane.b32.xlu1 %v5070_v20, %s2620_s7  ;;  %v4361_v50 = vadd.f32 %v4237_v57, %v1851_v18  ;;  %v4364_v20 = vadd.f32 %v4340_v23, %v1856_v61  ;;  %v1857_v61 = vmul.f32 %v4160_v1, %v5189_v24  ;;  %v5190_v18 = vld [vmem:[#allocation11_spill] sm:$0xff] }
 0x61a   :  { %2098 = vrot.lane.b32.xlu0 %v5072_v27, %s2620_s7  ;;  %v1859_v27 = vmul.f32 %v4160_v1, %v5190_v18  ;;  %v5193_v18 = vld [vmem:[#allocation16_spill] sm:$0xff] }
 0x61b   :  { %v5075_v47 = vmax.f32 %v4361_v50, 0.0  ;;  %v5077_v2 = vmax.f32 %v4364_v20, 0.0 }
 0x621   :  { %2106 = vrot.lane.b32.xlu2 %v5074_v46, %s2620_s7  ;;  %2090 = vrot.lane.b32.xlu1 %v5075_v47, %s2620_s7  ;;  %v4388_v46 = vadd.f32 %v4340_v23, %v1857_v61  ;;  %v4391_v47 = vadd.f32 %v4340_v23, %v1859_v27  ;;  %v1858_v61 = vmul.f32 %v4160_v1, %v5192_v52 }
 0x622   :  { %2020 = vrot.lane.b32.xlu0 %v5077_v2, %s2620_s7  ;;  %v1860_v27 = vmul.f32 %v4160_v1, %v5193_v18  ;;  %v5194_v2 = vld [vmem:[#allocation22_spill] sm:$0xff] }
 0x623   :  { %v5081_v24 = vmax.f32 %v4388_v46, 0.0  ;;  %v5083_v10 = vmax.f32 %v4391_v47, 0.0  ;;  %v1862_v13 = vmul.f32 %v4160_v1, %v5194_v2  ;;  %v4412_v62 = vadd.f32 %v4340_v23, %v1858_v61  ;;  %v5197_v2 = vld [vmem:[#allocation19_spill] sm:$0xff] }
 0x624   :  { %v1861_v61 = vmul.f32 %v4160_v1, %v5197_v2 }
 0x625   :  { %v5086_v52 = vmax.f32 %v4412_v62, 0.0 }
 0x626   :  { %v4439_v4 = vadd.f32 %v4340_v23, %v1861_v61 }
 0x628   :  { %5200 = vst [vmem:[#allocation6_spill] sm:$0xff] %v4439_v4  ;;  %v5090_v2 = vmax.f32 %v4439_v4, 0.0 }
 0x629   :  { %2114 = vrot.lane.b32.xlu1 %v5080_v49, %s2620_s7  ;;  %2028 = vrot.lane.b32.xlu2 %v5081_v24, %s2620_s7  ;;  %v4415_v49 = vadd.f32 %v4340_v23, %v1860_v27  ;;  %v4418_v24 = vadd.f32 %v4340_v23, %v1862_v13  ;;  %v5198_v27 = vld [vmem:[#allocation25_spill] sm:$0xff] }
 0x62a   :  { %2044 = vrot.lane.b32.xlu0 %v5083_v10, %s2620_s7  ;;  %v1863_v13 = vmul.f32 %v4160_v1, %v5198_v27  ;;  %v5199_v10 = vld [vmem:[#allocation34_spill] sm:$0xff] }
 0x62b   :  { %5195 = vst [vmem:[#allocation31_spill] sm:$0xff] %v4415_v49  ;;  %v5087_v18 = vmax.f32 %v4415_v49, 0.0  ;;  %v5089_v22 = vmax.f32 %v4418_v24, 0.0  ;;  %v1865_v15 = vmul.f32 %v4160_v1, %v5199_v10  ;;  %v5203_v10 = vld [vmem:[#allocation28_spill] sm:$0xff] }
 0x62c   :  { %5196 = vst [vmem:[#allocation5_spill] sm:$0xff] %v4418_v24  ;;  %v1864_v61 = vmul.f32 %v4160_v1, %v5203_v10 }
 0x631   :  { %2036 = vrot.lane.b32.xlu1 %v5086_v52, %s2620_s7  ;;  %2052 = vrot.lane.b32.xlu2 %v5087_v18, %s2620_s7  ;;  %v4442_v52 = vadd.f32 %v4340_v23, %v1863_v13  ;;  %v4445_v18 = vadd.f32 %v4340_v23, %v1865_v15  ;;  %v1866_v15 = vmul.f32 %v4160_v1, %v4060_v37 }
 0x632   :  { %2068 = vrot.lane.b32.xlu0 %v5089_v22, %s2620_s7  ;;  %v1868_v13 = vmul.f32 %v4160_v1, %v4085_v44  ;;  %v1867_v44 = vmul.f32 %v4160_v1, %v4070_v32 }
 0x633   :  { %5201 = vst [vmem:[#allocation3_spill] sm:$0xff] %v4442_v52  ;;  %v5092_v27 = vmax.f32 %v4442_v52, 0.0  ;;  %v5094_v11 = vmax.f32 %v4445_v18, 0.0  ;;  %v4469_v0 = vadd.f32 %v4340_v23, %v1866_v15  ;;  %v5222_v52 = vmax.f32 %v4165_v8, 0.0  ;;  %v5224_v8 = vld [vmem:[#allocation26_spill] sm:$0xff] }
 0x634   :  { %5202 = vst [vmem:[#allocation15_spill] sm:$0xff] %v4445_v18  ;;  %v5223_v18 = vmax.f32 %v4169_v60, 0.0  ;;  %v1877_v60 = vmul.f32 %v4311_v53, %v5224_v8 }
 0x635   :  { %5205 = vst [vmem:[#allocation7_spill] sm:$0xff] %v4469_v0  ;;  %v5099_v37 = vmax.f32 %v4469_v0, 0.0 }
 0x639   :  { %2060 = vrot.lane.b32.xlu1 %v5090_v2, %s2620_s7  ;;  %2076 = vrot.lane.b32.xlu2 %v5092_v27, %s2620_s7  ;;  %v4466_v2 = vadd.f32 %v4340_v23, %v1864_v61  ;;  %v4472_v27 = vadd.f32 %v4340_v23, %v1868_v13  ;;  %v5207_v61 = vld [vmem:[#allocation9_spill] sm:$0xff] }
 0x63a   :  { %2092 = vrot.lane.b32.xlu0 %v5094_v11, %s2620_s7  ;;  %v1870_v15 = vmul.f32 %v4311_v53, %v5207_v61  ;;  %v5208_v13 = vld [vmem:[#allocation13_spill] sm:$0xff] }
 0x63b   :  { %v2017_v22 = vpop.permute.xlu2 %2016  ;;  %5204 = vst [vmem:[#allocation18_spill] sm:$0xff] %v4466_v2  ;;  %v5097_v10 = vmax.f32 %v4466_v2, 0.0  ;;  %v5101_v11 = vmax.f32 %v4472_v27, 0.0  ;;  %v1872_v42 = vmul.f32 %v4311_v53, %v5208_v13  ;;  %v5213_v13 = vld [vmem:[#allocation14_spill] sm:$0xff] }
 0x63c   :  { %5206 = vst [vmem:[#allocation24_spill] sm:$0xff] %v4472_v27  ;;  %v4498_v31 = vadd.f32 %v4476_v45, %v1870_v15 }
 0x63e   :  { %5210 = vst [vmem:[#allocation21_spill] sm:$0xff] %v4498_v31  ;;  %v5105_v61 = vmax.f32 %v4498_v31, 0.0 }
 0x641   :  { %2084 = vrot.lane.b32.xlu1 %v5097_v10, %s2620_s7  ;;  %2100 = vrot.lane.b32.xlu2 %v5099_v37, %s2620_s7  ;;  %v4495_v10 = vadd.f32 %v4340_v23, %v1867_v44  ;;  %v4501_v37 = vadd.f32 %v4476_v45, %v1872_v42  ;;  %v5212_v44 = vld [vmem:[#allocation12_spill] sm:$0xff]  ;;  %v1873_v42 = vmul.f32 %v4311_v53, %v5213_v13 }
 0x642   :  { %2116 = vrot.lane.b32.xlu0 %v5101_v11, %s2620_s7  ;;  %v1871_v15 = vmul.f32 %v4311_v53, %v5212_v44  ;;  %v5214_v11 = vld [vmem:[#allocation20_spill] sm:$0xff] }
 0x643   :  { %v2041_v41 = vpop.permute.xlu2 %2040  ;;  %5209 = vst [vmem:[#allocation27_spill] sm:$0xff] %v4495_v10  ;;  %v5104_v32 = vmax.f32 %v4495_v10, 0.0  ;;  %v5107_v19 = vmax.f32 %v4501_v37, 0.0  ;;  %v1875_v27 = vmul.f32 %v4311_v53, %v5214_v11  ;;  %v5218_v11 = vld [vmem:[#allocation17_spill] sm:$0xff] }
 0x644   :  { %5211 = vst [vmem:[#allocation30_spill] sm:$0xff] %v4501_v37  ;;  %v1878_v37 = vmul.f32 %v4311_v53, %v4045_v51 }
 0x645   :  { %v4530_v44 = vadd.f32 %v4476_v45, %v1875_v27 }
 0x646   :  { %v4561_v2 = vadd.f32 %v4476_v45, %v1878_v37 }
 0x647   :  { %5217 = vst [vmem:[#allocation4_spill] sm:$0xff] %v4530_v44 }
 0x649   :  { %2108 = vrot.lane.b32.xlu1 %v5104_v32, %s2620_s7  ;;  %2022 = vrot.lane.b32.xlu2 %v5105_v61, %s2620_s7  ;;  %v4524_v32 = vadd.f32 %v4476_v45, %v1871_v15  ;;  %v4527_v61 = vadd.f32 %v4476_v45, %v1873_v42  ;;  %v1874_v15 = vmul.f32 %v4311_v53, %v5218_v11  ;;  %v5219_v42 = vld [vmem:[#allocation23_spill] sm:$0xff] }
 0x64a   :  { %2038 = vrot.lane.b32.xlu0 %v5107_v19, %s2620_s7  ;;  %v5115_v19 = vmax.f32 %v4530_v44, 0.0  ;;  %v1876_v27 = vmul.f32 %v4311_v53, %v5219_v42 }
 0x64b   :  { %v4521_v0 = vpop.permute.xlu2 %2064  ;;  %5215 = vst [vmem:[#allocation32_spill] sm:$0xff] %v4524_v32  ;;  %v5111_v13 = vmax.f32 %v4524_v32, 0.0  ;;  %v5112_v31 = vmax.f32 %v4527_v61, 0.0 }
 0x64c   :  { %5216 = vst [vmem:[#allocation29_spill] sm:$0xff] %v4527_v61 }
 0x651   :  { %2030 = vrot.lane.b32.xlu1 %v5111_v13, %s2620_s7  ;;  %2046 = vrot.lane.b32.xlu2 %v5112_v31, %s2620_s7  ;;  %v4553_v13 = vadd.f32 %v4476_v45, %v1874_v15  ;;  %v4556_v31 = vadd.f32 %v4476_v45, %v1876_v27 }
 0x652   :  { %2062 = vrot.lane.b32.xlu0 %v5115_v19, %s2620_s7  ;;  %v5221_v19 = vmax.f32 %v4167_v59, 0.0  ;;  %v2010_v59 = vmax.f32 %v4561_v2, 0.0 }
 0x653   :  { %v2025_v10 = vpop.permute.xlu1 %2024  ;;  %v4550_v32 = vpop.permute.xlu2 %2088  ;;  %v5122_v37 = vmax.f32 %v4556_v31, 0.0 }
 0x654   :  { %v2176_v61 = vsel %vm868_vm8, %v2017_v22, %v2025_v10  ;;  %v2033_v42 = vpop.permute.xlu0 %2032  ;;  %v2006_v22 = vmax.f32 %v4553_v13, 0.0 }
 0x655   :  { %v2180_v44 = vmax.f32 %v5221_v19, %v2176_v61  ;;  %v2168_v51 = vsel %vm868_vm8, %v2033_v42, %v2041_v41  ;;  %v2172_v15 = vsel %vm868_vm8, %v2025_v10, %v2033_v42  ;;  %v1879_v19 = vmul.f32 %v4311_v53, %v4077_v25 }
 0x656   :  { %v2181_v27 = vmax.f32 %v5222_v52, %v2172_v15  ;;  %v2182_v4 = vmax.f32 %v5223_v18, %v2168_v51  ;;  %v1881_v52 = vmul.f32 %v4311_v53, %v4108_v39  ;;  %v4600_v25 = vadd.f32 %v4476_v45, %v1877_v60 }
 0x657   :  { %v4603_v61 = vadd.f32 %v4476_v45, %v1879_v19  ;;  %v5225_v39 = vmax.f32 %v4188_v38, 0.0  ;;  %v5227_v60 = vmax.f32 %v4190_v56, 0.0  ;;  %v1882_v56 = vmul.f32 %v4311_v53, %v4121_v40 }
 0x658   :  { %v2232_v49 = vmax.f32 %v2180_v44, %v2181_v27  ;;  %v2233_v24 = vmax.f32 %v2181_v27, %v2182_v4  ;;  %v4608_v42 = vadd.f32 %v4476_v45, %v1881_v52  ;;  %v5226_v27 = vmax.f32 %v4186_v35, 0.0 }
 0x659   :  { %2054 = vrot.lane.b32.xlu1 %v2006_v22, %s2620_s7  ;;  %2070 = vrot.lane.b32.xlu2 %v5122_v37, %s2620_s7  ;;  %v2009_v52 = vmax.f32 %v4600_v25, 0.0  ;;  %v2011_v37 = vmax.f32 %v4603_v61, 0.0  ;;  %v1880_v35 = vmul.f32 %v4311_v53, %v4098_v21 }
 0x65a   :  { %2280 = vst [vmem:[%s5010_s4] sm:$0xff] %v2232_v49  ;;  %2086 = vrot.lane.b32.xlu0 %v2010_v59, %s2620_s7 }
 0x65b   :  { %2281 = vst [vmem:[%s5010_s4 + $0x8] sm:$0xff] %v2233_v24  ;;  %v2049_v18 = vpop.permute.xlu1 %2048  ;;  %v4597_v10 = vpop.permute.xlu2 %2112  ;;  %v4651_v40 = vadd.f32 %v4476_v45, %v1880_v35 }
 0x65c   :  { %v2164_v49 = vsel %vm868_vm8, %v2041_v41, %v2049_v18  ;;  %v2057_v44 = vpop.permute.xlu0 %2056 }
 0x65d   :  { %v2183_v51 = vmax.f32 %v5225_v39, %v2164_v49  ;;  %v2156_v24 = vsel %vm868_vm8, %v2057_v44, %v4521_v0  ;;  %v2160_v15 = vsel %vm868_vm8, %v2049_v18, %v2057_v44  ;;  %v2013_v39 = vmax.f32 %v4608_v42, 0.0 }
 0x65e   :  { %v2184_v8 = vmax.f32 %v5226_v27, %v2160_v15  ;;  %v2185_v41 = vmax.f32 %v5227_v60, %v2156_v24  ;;  %v4654_v44 = vadd.f32 %v4476_v45, %v1882_v56  ;;  %v5229_v60 = vmax.f32 %v4207_v28, 0.0 }
 0x65f   :  { %v2234_v19 = vmax.f32 %v2182_v4, %v2183_v51  ;;  %v1855_v4 = vmul.f32 %v4158_v58, %v4063_v36  ;;  %v5228_v58 = vmax.f32 %v4209_v43, 0.0  ;;  %v2012_v35 = vmax.f32 %v4651_v40, 0.0 }
 0x660   :  { %v2235_v38 = vmax.f32 %v2183_v51, %v2184_v8  ;;  %v2236_v49 = vmax.f32 %v2184_v8, %v2185_v41  ;;  %v1883_v28 = vmul.f32 %v4311_v53, %v4126_v30 }
 0x661   :  { %2282 = vst [vmem:[%s5010_s4 + $0x10] sm:$0xff] %v2234_v19  ;;  %2078 = vrot.lane.b32.xlu1 %v2009_v52, %s2620_s7  ;;  %2094 = vrot.lane.b32.xlu2 %v2011_v37, %s2620_s7  ;;  %v1931_v36 = vadd.f32 %v4237_v57, %v1855_v4  ;;  %v2014_v57 = vmax.f32 %v4654_v44, 0.0 }
 0x662   :  { %2283 = vst [vmem:[%s5010_s4 + $0x18] sm:$0xff] %v2235_v38  ;;  %2110 = vrot.lane.b32.xlu0 %v2013_v39, %s2620_s7  ;;  %v5230_v38 = vmax.f32 %v4211_v17, 0.0  ;;  %v1869_v17 = vmul.f32 %v4160_v1, %v4102_v5  ;;  %v5231_v1 = vmax.f32 %v4230_v55, 0.0 }
 0x663   :  { %2284 = vst [vmem:[%s5010_s4 + $0x20] sm:$0xff] %v2236_v49  ;;  %v2073_v18 = vpop.permute.xlu1 %2072  ;;  %v4648_v21 = vpop.permute.xlu2 %2034  ;;  %v1987_v4 = vmax.f32 %v1931_v36, 0.0 }
 0x664   :  { %v2152_v51 = vsel %vm868_vm8, %v4521_v0, %v2073_v18  ;;  %v2081_v24 = vpop.permute.xlu0 %2080 }
 0x665   :  { %v2186_v15 = vmax.f32 %v5228_v58, %v2152_v51  ;;  %v2144_v27 = vsel %vm868_vm8, %v2081_v24, %v4550_v32  ;;  %v2148_v8 = vsel %vm868_vm8, %v2073_v18, %v2081_v24  ;;  %v1959_v51 = vadd.f32 %v4476_v45, %v1883_v28 }
 0x666   :  { %v2187_v19 = vmax.f32 %v5229_v60, %v2148_v8  ;;  %v2188_v49 = vmax.f32 %v5230_v38, %v2144_v27  ;;  %v1945_v24 = vadd.f32 %v4340_v23, %v1869_v17  ;;  %v5233_v23 = vmax.f32 %v4232_v26, 0.0 }
 0x667   :  { %v2237_v0 = vmax.f32 %v2185_v41, %v2186_v15  ;;  %v2015_v60 = vmax.f32 %v1959_v51, 0.0 }
 0x668   :  { %v2238_v43 = vmax.f32 %v2186_v15, %v2187_v19  ;;  %v2239_v56 = vmax.f32 %v2187_v19, %v2188_v49  ;;  %v5232_v15 = vmax.f32 %v4228_v14, 0.0 }
 0x669   :  { %2285 = vst [vmem:[%s5010_s4 + $0x28] sm:$0xff] %v2237_v0  ;;  %2102 = vrot.lane.b32.xlu1 %v2012_v35, %s2620_s7  ;;  %2118 = vrot.lane.b32.xlu2 %v2014_v57, %s2620_s7  ;;  %v5234_v0 = vmax.f32 %v4252_v54, 0.0  ;;  %v5236_v54 = vmax.f32 %v4276_v12, 0.0  ;;  %v5237_v12 = vmax.f32 %v4279_v29, 0.0 }
 0x66a   :  { %2286 = vst [vmem:[%s5010_s4 + $0x30] sm:$0xff] %v2238_v43  ;;  %2122 = vrot.lane.b32.xlu0 %v1987_v4, %s2620_s7 }
 0x66b   :  { %2287 = vst [vmem:[%s5010_s4 + $0x38] sm:$0xff] %v2239_v56  ;;  %v2097_v41 = vpop.permute.xlu1 %2096  ;;  %v2059_v18 = vpop.permute.xlu2 %2058 }
 0x66c   :  { %v2140_v5 = vsel %vm868_vm8, %v4550_v32, %v2097_v41  ;;  %v2105_v30 = vpop.permute.xlu0 %2104  ;;  %v2001_v32 = vmax.f32 %v1945_v24, 0.0 }
 0x66d   :  { %v2189_v53 = vmax.f32 %v5231_v1, %v2140_v5  ;;  %v2132_v36 = vsel %vm868_vm8, %v2105_v30, %v4597_v10  ;;  %v2136_v58 = vsel %vm868_vm8, %v2097_v41, %v2105_v30 }
 0x66e   :  { %v2190_v45 = vmax.f32 %v5232_v15, %v2136_v58  ;;  %v2191_v27 = vmax.f32 %v5233_v23, %v2132_v36  ;;  %v5238_v23 = vmax.f32 %v4273_v34, 0.0 }
 0x66f   :  { %v2240_v8 = vmax.f32 %v2188_v49, %v2189_v53 }
 0x670   :  { %v2241_v19 = vmax.f32 %v2189_v53, %v2190_v45  ;;  %v2242_v38 = vmax.f32 %v2190_v45, %v2191_v27 }
 0x671   :  { %2288 = vst [vmem:[%s5010_s4 + $0x40] sm:$0xff] %v2240_v8  ;;  %2126 = vrot.lane.b32.xlu1 %v2015_v60, %s2620_s7  ;;  %2124 = vrot.lane.b32.xlu2 %v2001_v32, %s2620_s7  ;;  %v5239_v8 = vmax.f32 %v4303_v48, 0.0 }
 0x672   :  { %2289 = vst [vmem:[%s5010_s4 + $0x48] sm:$0xff] %v2241_v19 }
 0x673   :  { %2290 = vst [vmem:[%s5010_s4 + $0x50] sm:$0xff] %v2242_v38  ;;  %v2121_v14 = vpop.permute.xlu1 %2120  ;;  %v2083_v55 = vpop.permute.xlu2 %2082 }
 0x674   :  { %v2128_v26 = vsel %vm868_vm8, %v4597_v10, %v2121_v14  ;;  %v2027_v49 = vpop.permute.xlu0 %2026  ;;  %v5235_v10 = vmax.f32 %v4255_v16, 0.0 }
 0x675   :  { %v2228_v43 = vmax.f32 %v5234_v0, %v2128_v26  ;;  %v2173_v4 = vsel %vm868_vm8, %v2027_v49, %v4648_v21 }
 0x676   :  { %v2193_v24 = vmax.f32 %v5235_v10, %v2173_v4  ;;  %v5242_v4 = vmax.f32 %v4332_v7, 0.0 }
 0x677   :  { %v2243_v56 = vmax.f32 %v2191_v27, %v2228_v43  ;;  %v5241_v43 = vmax.f32 %v4300_v9, 0.0 }
 0x679   :  { %2291 = vst [vmem:[%s5010_s4 + $0x58] sm:$0xff] %v2243_v56 }
 0x67b   :  { %v2019_v28 = vpop.permute.xlu1 %2018  ;;  %v2107_v17 = vpop.permute.xlu2 %2106 }
 0x67c   :  { %v2177_v41 = vsel %vm868_vm8, %v2019_v28, %v2027_v49  ;;  %v2051_v51 = vpop.permute.xlu0 %2050  ;;  %v5240_v49 = vmax.f32 %v4306_v3, 0.0 }
 0x67d   :  { %v2192_v5 = vmax.f32 %v5236_v54, %v2177_v41  ;;  %v2161_v1 = vsel %vm868_vm8, %v2051_v51, %v2059_v18 }
 0x67e   :  { %v2196_v45 = vmax.f32 %v5237_v12, %v2161_v1  ;;  %v5244_v1 = vmax.f32 %v4329_v33, 0.0 }
 0x67f   :  { %v2244_v30 = vmax.f32 %v2192_v5, %v2193_v24  ;;  %v5243_v5 = vmax.f32 %v4335_v6, 0.0 }
 0x681   :  { %2292 = vst [vmem:[%s5010_s4 + $0x60] sm:$0xff] %v2244_v30 }
 0x683   :  { %v2043_v53 = vpop.permute.xlu1 %2042  ;;  %v2029_v36 = vpop.permute.xlu2 %2028 }
 0x684   :  { %v2165_v58 = vsel %vm868_vm8, %v2043_v53, %v2051_v51  ;;  %v2169_v16 = vsel %vm868_vm8, %v4648_v21, %v2043_v53  ;;  %v2075_v15 = vpop.permute.xlu0 %2074 }
 0x685   :  { %v2194_v27 = vmax.f32 %v5238_v23, %v2169_v16  ;;  %v2195_v60 = vmax.f32 %v5239_v8, %v2165_v58  ;;  %v2149_v29 = vsel %vm868_vm8, %v2075_v15, %v2083_v55  ;;  %v5245_v58 = vmax.f32 %v4361_v50, 0.0 }
 0x686   :  { %v2199_v0 = vmax.f32 %v5240_v49, %v2149_v29  ;;  %v5246_v23 = vmax.f32 %v4358_v63, 0.0  ;;  %v5249_v49 = vmax.f32 %v4388_v46, 0.0 }
 0x687   :  { %v2245_v32 = vmax.f32 %v2193_v24, %v2194_v27  ;;  %v2246_v19 = vmax.f32 %v2194_v27, %v2195_v60  ;;  %v2247_v38 = vmax.f32 %v2195_v60, %v2196_v45 }
 0x689   :  { %2293 = vst [vmem:[%s5010_s4 + $0x68] sm:$0xff] %v2245_v32 }
 0x68a   :  { %2294 = vst [vmem:[%s5010_s4 + $0x70] sm:$0xff] %v2246_v19 }
 0x68b   :  { %2295 = vst [vmem:[%s5010_s4 + $0x78] sm:$0xff] %v2247_v38  ;;  %v2067_v34 = vpop.permute.xlu1 %2066  ;;  %v2053_v48 = vpop.permute.xlu2 %2052 }
 0x68c   :  { %v2153_v21 = vsel %vm868_vm8, %v2067_v34, %v2075_v15  ;;  %v2157_v14 = vsel %vm868_vm8, %v2059_v18, %v2067_v34  ;;  %v2099_v26 = vpop.permute.xlu0 %2098  ;;  %v5247_v34 = vmax.f32 %v4364_v20, 0.0 }
 0x68d   :  { %v2197_v56 = vmax.f32 %v5241_v43, %v2157_v14  ;;  %v2198_v28 = vmax.f32 %v5242_v4, %v2153_v21  ;;  %v2137_v3 = vsel %vm868_vm8, %v2099_v26, %v2107_v17  ;;  %v5248_v14 = vmax.f32 %v4391_v47, 0.0 }
 0x68e   :  { %v2202_v30 = vmax.f32 %v5243_v5, %v2137_v3  ;;  %v5250_v43 = vmax.f32 %v4412_v62, 0.0  ;;  %v5255_v5 = vld [vmem:[#allocation6_spill] sm:$0xff] }
 0x68f   :  { %v2248_v41 = vmax.f32 %v2196_v45, %v2197_v56  ;;  %v2249_v51 = vmax.f32 %v2197_v56, %v2198_v28  ;;  %v2250_v10 = vmax.f32 %v2198_v28, %v2199_v0 }
 0x691   :  { %2296 = vst [vmem:[%s5010_s4 + $0x80] sm:$0xff] %v2248_v41 }
 0x692   :  { %2297 = vst [vmem:[%s5010_s4 + $0x88] sm:$0xff] %v2249_v51 }
 0x693   :  { %2298 = vst [vmem:[%s5010_s4 + $0x90] sm:$0xff] %v2250_v10  ;;  %v2091_v9 = vpop.permute.xlu1 %2090  ;;  %v2077_v7 = vpop.permute.xlu2 %2076  ;;  %v5251_v10 = vld [vmem:[#allocation5_spill] sm:$0xff] }
 0x694   :  { %v2141_v18 = vsel %vm868_vm8, %v2091_v9, %v2099_v26  ;;  %v2145_v24 = vsel %vm868_vm8, %v2083_v55, %v2091_v9  ;;  %v2021_v54 = vpop.permute.xlu0 %2020  ;;  %v5252_v3 = vmax.f32 %v5251_v10, 0.0 }
 0x695   :  { %v2200_v53 = vmax.f32 %v5244_v1, %v2145_v24  ;;  %v2201_v16 = vmax.f32 %v5245_v58, %v2141_v18  ;;  %v2178_v60 = vsel %vm868_vm8, %v2021_v54, %v2029_v36  ;;  %v5253_v18 = vld [vmem:[#allocation31_spill] sm:$0xff] }
 0x696   :  { %v2204_v21 = vmax.f32 %v5247_v34, %v2178_v60  ;;  %v5254_v24 = vmax.f32 %v5253_v18, 0.0 }
 0x697   :  { %v2251_v15 = vmax.f32 %v2199_v0, %v2200_v53  ;;  %v2252_v12 = vmax.f32 %v2200_v53, %v2201_v16  ;;  %v2253_v45 = vmax.f32 %v2201_v16, %v2202_v30 }
 0x699   :  { %2299 = vst [vmem:[%s5010_s4 + $0x98] sm:$0xff] %v2251_v15 }
 0x69a   :  { %2300 = vst [vmem:[%s5010_s4 + $0xa0] sm:$0xff] %v2252_v12 }
 0x69b   :  { %2301 = vst [vmem:[%s5010_s4 + $0xa8] sm:$0xff] %v2253_v45  ;;  %v4804_v6 = vpop.permute.xlu1 %2114  ;;  %v2101_v33 = vpop.permute.xlu2 %2100 }
 0x69c   :  { %v2133_v50 = vsel %vm868_vm8, %v2107_v17, %v4804_v6  ;;  %v2045_v55 = vpop.permute.xlu0 %2044 }
 0x69d   :  { %v4811_v27 = vmax.f32 %v5246_v23, %v2133_v50  ;;  %v2166_v32 = vsel %vm868_vm8, %v2045_v55, %v2053_v48  ;;  %v5257_v23 = vld [vmem:[#allocation15_spill] sm:$0xff] }
 0x69e   :  { %v2207_v26 = vmax.f32 %v5248_v14, %v2166_v32  ;;  %v5259_v32 = vld [vmem:[#allocation3_spill] sm:$0xff] }
 0x69f   :  { %v2254_v8 = vmax.f32 %v2202_v30, %v4811_v27  ;;  %v5256_v30 = vmax.f32 %v5255_v5, 0.0 }
 0x6a1   :  { %2302 = vst [vmem:[%s5010_s4 + $0xb0] sm:$0xff] %v2254_v8  ;;  %v5258_v8 = vmax.f32 %v5257_v23, 0.0 }
 0x6a3   :  { %v2037_v19 = vpop.permute.xlu1 %2036  ;;  %v2023_v38 = vpop.permute.xlu2 %2022 }
 0x6a4   :  { %v2170_v17 = vsel %vm868_vm8, %v2037_v19, %v2045_v55  ;;  %v2174_v63 = vsel %vm868_vm8, %v2029_v36, %v2037_v19  ;;  %v2069_v29 = vpop.permute.xlu0 %2068  ;;  %v5260_v19 = vmax.f32 %v5259_v32, 0.0 }
 0x6a5   :  { %v2205_v0 = vmax.f32 %v5249_v49, %v2174_v63  ;;  %v2206_v56 = vmax.f32 %v5250_v43, %v2170_v17  ;;  %v2154_v20 = vsel %vm868_vm8, %v2069_v29, %v2077_v7  ;;  %v5261_v63 = vld [vmem:[#allocation18_spill] sm:$0xff] }
 0x6a6   :  { %v2210_v9 = vmax.f32 %v5252_v3, %v2154_v20  ;;  %v5265_v20 = vld [vmem:[#allocation27_spill] sm:$0xff] }
 0x6a7   :  { %v2256_v4 = vmax.f32 %v2204_v21, %v2205_v0  ;;  %v2257_v28 = vmax.f32 %v2205_v0, %v2206_v56  ;;  %v2258_v41 = vmax.f32 %v2206_v56, %v2207_v26 }
 0x6a9   :  { %2304 = vst [vmem:[%s5010_s4 + $0xc0] sm:$0xff] %v2256_v4  ;;  %v5263_v4 = vld [vmem:[#allocation7_spill] sm:$0xff] }
 0x6aa   :  { %2305 = vst [vmem:[%s5010_s4 + $0xc8] sm:$0xff] %v2257_v28  ;;  %v5264_v28 = vmax.f32 %v5263_v4, 0.0 }
 0x6ab   :  { %2306 = vst [vmem:[%s5010_s4 + $0xd0] sm:$0xff] %v2258_v41  ;;  %v2061_v62 = vpop.permute.xlu1 %2060  ;;  %v2047_v46 = vpop.permute.xlu2 %2046 }
 0x6ac   :  { %v2158_v47 = vsel %vm868_vm8, %v2061_v62, %v2069_v29  ;;  %v2162_v36 = vsel %vm868_vm8, %v2053_v48, %v2061_v62  ;;  %v2093_v51 = vpop.permute.xlu0 %2092  ;;  %v5262_v29 = vmax.f32 %v5261_v63, 0.0  ;;  %v5266_v62 = vmax.f32 %v5265_v20, 0.0  ;;  %v5273_v63 = vld [vmem:[#allocation4_spill] sm:$0xff] }
 0x6ad   :  { %v2208_v54 = vmax.f32 %v5254_v24, %v2162_v36  ;;  %v2209_v1 = vmax.f32 %v5256_v30, %v2158_v47  ;;  %v2142_v48 = vsel %vm868_vm8, %v2093_v51, %v2101_v33 }
 0x6ae   :  { %v2213_v60 = vmax.f32 %v5258_v8, %v2142_v48 }
 0x6af   :  { %v2259_v53 = vmax.f32 %v2207_v26, %v2208_v54  ;;  %v2260_v58 = vmax.f32 %v2208_v54, %v2209_v1  ;;  %v2261_v16 = vmax.f32 %v2209_v1, %v2210_v9  ;;  %v5267_v54 = vld [vmem:[#allocation30_spill] sm:$0xff]  ;;  %v5269_v1 = vld [vmem:[#allocation21_spill] sm:$0xff] }
 0x6b0   :  { %v5268_v5 = vmax.f32 %v5267_v54, 0.0 }
 0x6b1   :  { %2307 = vst [vmem:[%s5010_s4 + $0xd8] sm:$0xff] %v2259_v53  ;;  %v5270_v53 = vmax.f32 %v5269_v1, 0.0 }
 0x6b2   :  { %2308 = vst [vmem:[%s5010_s4 + $0xe0] sm:$0xff] %v2260_v58 }
 0x6b3   :  { %2309 = vst [vmem:[%s5010_s4 + $0xe8] sm:$0xff] %v2261_v16  ;;  %v2085_v15 = vpop.permute.xlu1 %2084  ;;  %v2071_v12 = vpop.permute.xlu2 %2070  ;;  %v5271_v16 = vld [vmem:[#allocation32_spill] sm:$0xff] }
 0x6b4   :  { %v2146_v45 = vsel %vm868_vm8, %v2085_v15, %v2093_v51  ;;  %v2150_v50 = vsel %vm868_vm8, %v2077_v7, %v2085_v15  ;;  %v2117_v55 = vpop.permute.xlu0 %2116  ;;  %v5272_v48 = vmax.f32 %v5271_v16, 0.0 }
 0x6b5   :  { %v2211_v17 = vmax.f32 %v5260_v19, %v2150_v50  ;;  %v2212_v34 = vmax.f32 %v5262_v29, %v2146_v45  ;;  %v5274_v29 = vmax.f32 %v5273_v63, 0.0 }
 0x6b7   :  { %v2262_v21 = vmax.f32 %v2210_v9, %v2211_v17  ;;  %v2263_v14 = vmax.f32 %v2211_v17, %v2212_v34  ;;  %v2264_v26 = vmax.f32 %v2212_v34, %v2213_v60 }
 0x6b9   :  { %2310 = vst [vmem:[%s5010_s4 + $0xf0] sm:$0xff] %v2262_v21  ;;  %v5275_v21 = vld [vmem:[#allocation29_spill] sm:$0xff] }
 0x6ba   :  { %2311 = vst [vmem:[%s5010_s4 + $0xf8] sm:$0xff] %v2263_v14  ;;  %v5276_v14 = vmax.f32 %v5275_v21, 0.0 }
 0x6bb   :  { %2312 = vst [vmem:[%s5010_s4 + $0x100] sm:$0xff] %v2264_v26  ;;  %v2109_v7 = vpop.permute.xlu1 %2108  ;;  %v2095_v49 = vpop.permute.xlu2 %2094 }
 0x6bc   :  { %v2134_v0 = vsel %vm868_vm8, %v2109_v7, %v2117_v55  ;;  %v2138_v43 = vsel %vm868_vm8, %v2101_v33, %v2109_v7  ;;  %v2039_v56 = vpop.permute.xlu0 %2038 }
 0x6bd   :  { %v2214_v41 = vmax.f32 %v5264_v28, %v2138_v43  ;;  %v2215_v47 = vmax.f32 %v5266_v62, %v2134_v0  ;;  %v2171_v33 = vsel %vm868_vm8, %v2039_v56, %v2047_v46  ;;  %v5277_v0 = vld [vmem:[#allocation24_spill] sm:$0xff] }
 0x6be   :  { %v2218_v30 = vmax.f32 %v5268_v5, %v2171_v33  ;;  %v5278_v43 = vmax.f32 %v5277_v0, 0.0 }
 0x6bf   :  { %v2265_v36 = vmax.f32 %v2213_v60, %v2214_v41  ;;  %v2266_v51 = vmax.f32 %v2214_v41, %v2215_v47 }
 0x6c1   :  { %2313 = vst [vmem:[%s5010_s4 + $0x108] sm:$0xff] %v2265_v36  ;;  %v5279_v36 = vmax.f32 %v4556_v31, 0.0 }
 0x6c2   :  { %2314 = vst [vmem:[%s5010_s4 + $0x110] sm:$0xff] %v2266_v51 }
 0x6c3   :  { %v2031_v10 = vpop.permute.xlu1 %2030  ;;  %v4900_v3 = vpop.permute.xlu2 %2118 }
 0x6c4   :  { %v2175_v9 = vsel %vm868_vm8, %v2031_v10, %v2039_v56  ;;  %v2179_v18 = vsel %vm868_vm8, %v2023_v38, %v2031_v10  ;;  %v2063_v24 = vpop.permute.xlu0 %2062 }
 0x6c5   :  { %v2216_v58 = vmax.f32 %v5270_v53, %v2179_v18  ;;  %v2217_v15 = vmax.f32 %v5272_v48, %v2175_v9  ;;  %v2159_v38 = vsel %vm868_vm8, %v2063_v24, %v2071_v12 }
 0x6c6   :  { %v2221_v34 = vmax.f32 %v5274_v29, %v2159_v38 }
 0x6c7   :  { %v2268_v45 = vmax.f32 %v2216_v58, %v2217_v15  ;;  %v2269_v50 = vmax.f32 %v2217_v15, %v2218_v30 }
 0x6c9   :  { %2316 = vst [vmem:[%s5010_s4 + $0x120] sm:$0xff] %v2268_v45 }
 0x6ca   :  { %2317 = vst [vmem:[%s5010_s4 + $0x128] sm:$0xff] %v2269_v50 }
 0x6cb   :  { %v2055_v23 = vpop.permute.xlu1 %2054  ;;  %v2125_v8 = vpop.permute.xlu2 %2124 }
 0x6cc   :  { %v2163_v60 = vsel %vm868_vm8, %v2055_v23, %v2063_v24  ;;  %v2167_v32 = vsel %vm868_vm8, %v2047_v46, %v2055_v23  ;;  %v2087_v19 = vpop.permute.xlu0 %2086  ;;  %v2130_v17 = vsel %vm868_vm8, %v2117_v55, %v2125_v8 }
 0x6cd   :  { %v2219_v26 = vmax.f32 %v5276_v14, %v2167_v32  ;;  %v2220_v7 = vmax.f32 %v2006_v22, %v2163_v60  ;;  %v2230_v56 = vmax.f32 %v5278_v43, %v2130_v17  ;;  %v2147_v55 = vsel %vm868_vm8, %v2087_v19, %v2095_v49 }
 0x6cf   :  { %v2270_v4 = vmax.f32 %v2218_v30, %v2219_v26  ;;  %v2271_v28 = vmax.f32 %v2219_v26, %v2220_v7  ;;  %v2272_v41 = vmax.f32 %v2220_v7, %v2221_v34  ;;  %v2267_v46 = vmax.f32 %v2215_v47, %v2230_v56  ;;  %v5280_v30 = vld [vmem:[#allocation33_spill] sm:$0xff] }
 0x6d0   :  { %v2224_v47 = vmax.f32 %v2010_v59, %v2147_v55  ;;  %v5281_v1 = vmax.f32 %v5280_v30, 0.0 }
 0x6d1   :  { %2318 = vst [vmem:[%s5010_s4 + $0x130] sm:$0xff] %v2270_v4 }
 0x6d2   :  { %2319 = vst [vmem:[%s5010_s4 + $0x138] sm:$0xff] %v2271_v28 }
 0x6d3   :  { %2320 = vst [vmem:[%s5010_s4 + $0x140] sm:$0xff] %v2272_v41  ;;  %v2079_v13 = vpop.permute.xlu1 %2078 }
 0x6d4   :  { %2315 = vst [vmem:[%s5010_s4 + $0x118] sm:$0xff] %v2267_v46  ;;  %v2151_v22 = vsel %vm868_vm8, %v2079_v13, %v2087_v19  ;;  %v2155_v20 = vsel %vm868_vm8, %v2071_v12, %v2079_v13  ;;  %v2111_v62 = vpop.permute.xlu0 %2110 }
 0x6d5   :  { %v2222_v51 = vmax.f32 %v5279_v36, %v2155_v20  ;;  %v2223_v33 = vmax.f32 %v2009_v52, %v2151_v22  ;;  %v2135_v2 = vsel %vm868_vm8, %v2111_v62, %v4900_v3 }
 0x6d6   :  { %v2227_v12 = vmax.f32 %v2013_v39, %v2135_v2 }
 0x6d7   :  { %v2273_v10 = vmax.f32 %v2221_v34, %v2222_v51  ;;  %v2274_v9 = vmax.f32 %v2222_v51, %v2223_v33  ;;  %v2275_v18 = vmax.f32 %v2223_v33, %v2224_v47 }
 0x6d9   :  { %2321 = vst [vmem:[%s5010_s4 + $0x148] sm:$0xff] %v2273_v10 }
 0x6da   :  { %2322 = vst [vmem:[%s5010_s4 + $0x150] sm:$0xff] %v2274_v9 }
 0x6db   :  { %2323 = vst [vmem:[%s5010_s4 + $0x158] sm:$0xff] %v2275_v18  ;;  %v2103_v31 = vpop.permute.xlu1 %2102 }
 0x6dc   :  { %v2139_v59 = vsel %vm868_vm8, %v2103_v31, %v2111_v62  ;;  %v2143_v25 = vsel %vm868_vm8, %v2095_v49, %v2103_v31  ;;  %v2123_v52 = vpop.permute.xlu0 %2122 }
 0x6dd   :  { %v2225_v24 = vmax.f32 %v2011_v37, %v2143_v25  ;;  %v2226_v54 = vmax.f32 %v2012_v35, %v2139_v59  ;;  %v2129_v5 = vsel %vm868_vm8, %v4804_v6, %v2123_v52 }
 0x6de   :  { %v2229_v53 = vmax.f32 %v5281_v1, %v2129_v5 }
 0x6df   :  { %v2276_v58 = vmax.f32 %v2224_v47, %v2225_v24  ;;  %v2277_v16 = vmax.f32 %v2225_v24, %v2226_v54  ;;  %v2278_v49 = vmax.f32 %v2226_v54, %v2227_v12 }
 0x6e0   :  { %v2255_v48 = vmax.f32 %v4811_v27, %v2229_v53 }
 0x6e1   :  { %2324 = vst [vmem:[%s5010_s4 + $0x160] sm:$0xff] %v2276_v58 }
 0x6e2   :  { %2325 = vst [vmem:[%s5010_s4 + $0x168] sm:$0xff] %v2277_v16 }
 0x6e3   :  { %2326 = vst [vmem:[%s5010_s4 + $0x170] sm:$0xff] %v2278_v49  ;;  %v2127_v37 = vpop.permute.xlu1 %2126 }
 0x6e4   :  { %2303 = vst [vmem:[%s5010_s4 + $0xb8] sm:$0xff] %v2255_v48  ;;  %v2131_v61 = vsel %vm868_vm8, %v4900_v3, %v2127_v37 }
 0x6e5   :  { %v2231_v42 = vmax.f32 %v2014_v57, %v2131_v61 }
 0x6e7   :  { %v2279_v39 = vmax.f32 %v2227_v12, %v2231_v42 }
 0x6e9   :  { %2327 = vst [vmem:[%s5010_s4 + $0x178] sm:$0xff] %v2279_v39 }

</bundles_post_ra>
